<compile_context>
chip_gen: v5e
topology: v5e:2x2
jax: 0.10.0
libtpu: 0.0.40
codegen_flags: <defaults>
</compile_context>

<pallas_src>
import functools
import math

import jax
import jax.numpy as jnp
from jax.experimental import pallas as pl
from jax.experimental.pallas import tpu as pltpu

_EPS = 1e-5


def _full_spec(shape):
    """Whole-array block for a grid=(1,) pallas_call."""
    nd = len(shape)
    return pl.BlockSpec(tuple(shape), lambda i, _nd=nd: (0,) * _nd)


def _generator_kernel(*args, num_bn_blocks):
    """Fused DCGAN generator forward pass.

    Ref order:
      inputs : z, w0, gamma0, beta0, [w_mid_i, gamma_i, beta_i]*, w_fin, b_fin
      outputs: out [B*Sf*Sf, 12]   (4 output parities x 3 channels)
      scratch: dil_i (zero-dilated + padded f32 input of each middle block),
               padf  (pad-1 f32 input of the final block)
    """
    n = num_bn_blocks
    pos = 0
    z_ref = args[pos]; pos += 1
    w0_ref = args[pos]; pos += 1
    bn_params = [(args[pos], args[pos + 1])]; pos += 2
    mid_w_refs = []
    for _ in range(1, n):
        mid_w_refs.append(args[pos]); pos += 1
        bn_params.append((args[pos], args[pos + 1])); pos += 2
    wfin_ref = args[pos]; bfin_ref = args[pos + 1]; pos += 2
    out_ref = args[pos]; pos += 1
    dil_refs = list(args[pos:pos + (n - 1)]); pos += n - 1
    padf_ref = args[pos]; pos += 1

    f32 = jnp.float32
    bf16 = jnp.bfloat16
    B = z_ref.shape[0]

    # Zero the staging buffers: borders / zero-insertion sites must read 0.
    for r in dil_refs:
        r[...] = jnp.zeros(r.shape, r.dtype)
    padf_ref[...] = jnp.zeros(padf_ref.shape, padf_ref.dtype)

    # --- Block 0: ConvTranspose2d(latent, C0, 4, 1, 0) on 1x1 + BN + ReLU ----
    # For a 1x1 input this is a plain matmul producing all 4x4*C0 outputs.
    c0 = bn_params[0][0].shape[-1]
    y0 = jnp.dot(z_ref[...].astype(bf16), w0_ref[...],
                 preferred_element_type=f32)                   # [B, 16*C0]
    chunks = [y0[:, k * c0:(k + 1) * c0] for k in range(16)]   # 16 x [B, C0]
    s = chunks[0]
    ss = chunks[0] * chunks[0]
    for c in chunks[1:]:
        s = s + c
        ss = ss + c * c
    cnt = 16.0 * B
    mean = jnp.sum(s, axis=0, keepdims=True) / cnt
    ex2 = jnp.sum(ss, axis=0, keepdims=True) / cnt
    var = jnp.maximum(ex2 - mean * mean, 0.0)
    gamma, beta = bn_params[0]
    scale = gamma[...] * jax.lax.rsqrt(var + _EPS)
    shift = beta[...] - mean * scale
    if n > 1:                    # feeds a stride-2 block: zero-dilate + pad 2
        tgt, off, step = dil_refs[0], 2, 2
    else:                        # feeds the final block directly: pad 1
        tgt, off, step = padf_ref, 1, 1
    for k in range(16):
        i, j = k // 4, k % 4
        a = jnp.maximum(chunks[k] * scale + shift, 0.0)
        tgt[:, off + step * i, off + step * j, :] = a.astype(tgt.dtype)

    # --- Middle blocks: ConvTranspose2d(Cin, Cout, 4, 2, 1) + BN + ReLU ------
    # Realized as a stride-1 valid conv (flipped kernel) over the zero-dilated,
    # padded VMEM buffer, as ONE im2col matmul with contraction depth 16*Cin.
    for bi in range(1, n):
        s_out = 4 * (2 ** bi)
        x = dil_refs[bi - 1][...]                              # [B, S+3, S+3, Cin]
        cin = x.shape[-1]
        rows = B * s_out * s_out
        taps = [x[:, ky:ky + s_out, kx:kx + s_out, :].reshape(rows, cin)
                for ky in range(4) for kx in range(4)]
        patches = jnp.concatenate(taps, axis=-1).astype(bf16)  # [rows, 16*Cin]
        acc = jnp.dot(patches, mid_w_refs[bi - 1][...],
                      preferred_element_type=f32)              # [rows, Cout]
        cnt = float(rows)
        mean = jnp.sum(acc, axis=0, keepdims=True) / cnt
        ex2 = jnp.sum(acc * acc, axis=0, keepdims=True) / cnt
        var = jnp.maximum(ex2 - mean * mean, 0.0)
        gamma, beta = bn_params[bi]
        scale = gamma[...] * jax.lax.rsqrt(var + _EPS)
        shift = beta[...] - mean * scale
        h = jnp.maximum(acc * scale + shift, 0.0)
        cout = h.shape[-1]
        hv = h.reshape(B, s_out, s_out, cout)
        if bi < n - 1:
            # Next consumer is another dilated conv: scatter into the even
            # sites of its zero-dilated buffer (only reached for input_size>=32).
            tgt = dil_refs[bi]
            for yy in range(s_out):
                for xx in range(s_out):
                    val = hv[:, yy, xx, :].astype(tgt.dtype)
                    tgt[:, 2 + 2 * yy, 2 + 2 * xx, :] = val
        else:
            padf_ref[:, 1:1 + s_out, 1:1 + s_out, :] = hv.astype(padf_ref.dtype)

    # --- Final block: ConvTranspose2d(Cl, 3, 4, 2, 1) + Tanh (sub-pixel) -----
    # One deep matmul per output parity (ry, rx); the parity interleave to the
    # full 2*Sf x 2*Sf image is done in the JAX wrapper (pure layout plumbing).
    sf = 4 * (2 ** (n - 1))
    xp = padf_ref[...]                                         # [B, sf+2, sf+2, Cl]
    cl = xp.shape[-1]
    rows = B * sf * sf
    wf = wfin_ref[...]                                         # [4, 4*Cl, 3] bf16
    b3 = bfin_ref[...]                                         # [1, 3] f32
    sl = [[xp[:, a:a + sf, b:b + sf, :].reshape(rows, cl) for b in range(3)]
          for a in range(3)]
    outs = []
    for ry in range(2):
        for rx in range(2):
            patches = jnp.concatenate(
                [sl[ry + dy][rx + dx] for dy in range(2) for dx in range(2)],
                axis=-1).astype(bf16)                          # [rows, 4*Cl]
            o = jnp.dot(patches, wf[2 * ry + rx],
                        preferred_element_type=f32) + b3       # [rows, 3]
            outs.append(jnp.tanh(o))
    out_ref[...] = jnp.concatenate(outs, axis=-1)              # [rows, 12]


class Generator:
    """JAX/Pallas port of the PyTorch DCGAN Generator (training-mode BN, f32 out)."""

    def __init__(self, latent_dim, input_size, hidden_dim, key):
        d_num = int(math.log2(input_size))
        assert d_num >= 3, "input_size must be a power of two >= 8"
        self.latent_dim = latent_dim
        self.input_size = input_size

        chans = [hidden_dim * (2 ** a) for a in reversed(range(d_num - 2))]
        self.chans = chans
        n = len(chans)

        keys = iter(jax.random.split(key, 4 * n + 8))

        def nrm(shape, scale=0.05):
            return scale * jax.random.normal(next(keys), shape, jnp.float32)

        # Block 0: ConvT(latent, C0, 4, 1, 0).  Torch weight layout [in,out,kH,kW];
        # for a 1x1 input it's a plain matmul, pre-reshaped to [latent, kH*kW*C0]
        # with output laid out as (i, j, oc).
        w0 = nrm((latent_dim, chans[0], 4, 4))
        self.w0 = (jnp.transpose(w0, (0, 2, 3, 1))
                   .reshape(latent_dim, 16 * chans[0]).astype(jnp.bfloat16))
        self.gammas = [1.0 + nrm((1, chans[0]))]
        self.betas = [nrm((1, chans[0]))]
        # NOTE: conv biases of BN-followed layers are omitted — training-mode
        # BatchNorm's batch-mean subtraction cancels them exactly.

        # Middle blocks: ConvT(Cin, Cout, 4, 2, 1) as stride-1 conv (flipped
        # kernel) over the zero-dilated+padded input, pre-flattened to im2col
        # form [4*4*Cin, Cout].
        self.wmid = []
        for i in range(1, n):
            w = nrm((chans[i - 1], chans[i], 4, 4))
            wf = jnp.transpose(jnp.flip(w, axis=(2, 3)), (2, 3, 0, 1))
            self.wmid.append(wf.reshape(16 * chans[i - 1], chans[i])
                             .astype(jnp.bfloat16))
            self.gammas.append(1.0 + nrm((1, chans[i])))
            self.betas.append(nrm((1, chans[i])))

        # Final block: ConvT(chans[-1], 3, 4, 2, 1) + Tanh, sub-pixel form:
        # one [4*Cin, 3] sub-weight per output parity (ry, rx).
        wl = nrm((chans[-1], 3, 4, 4))
        kt = [[3, 1], [2, 0]]      # kernel tap per (output parity, window offset)
        subs = []
        for ry in range(2):
            for rx in range(2):
                taps = [wl[:, :, kt[ry][dy], kt[rx][dx]]
                        for dy in range(2) for dx in range(2)]   # each [Cin, 3]
                subs.append(jnp.concatenate(taps, axis=0))       # [4*Cin, 3]
        self.wfin = jnp.stack(subs, axis=0).astype(jnp.bfloat16)  # [4, 4*Cin, 3]
        self.bfin = nrm((1, 3))

    def __call__(self, x):
        # mirrors torch: x = x.view(-1, latent_dim, 1, 1)
        x = x.reshape(-1, self.latent_dim).astype(jnp.float32)
        B = x.shape[0]
        n = len(self.chans)
        sf = self.input_size // 2
        out_rows = B * sf * sf

        operands = [x, self.w0, self.gammas[0], self.betas[0]]
        for i in range(1, n):
            operands += [self.wmid[i - 1], self.gammas[i], self.betas[i]]
        operands += [self.wfin, self.bfin]

        scratch = []
        for i in range(1, n):
            s_in = 4 * (2 ** (i - 1))
            scratch.append(pltpu.VMEM(
                (B, 2 * s_in + 3, 2 * s_in + 3, self.chans[i - 1]), jnp.float32))
        scratch.append(pltpu.VMEM((B, sf + 2, sf + 2, self.chans[-1]), jnp.float32))

        kernel = functools.partial(_generator_kernel, num_bn_blocks=n)
        out2d = pl.pallas_call(
            kernel,
            out_shape=jax.ShapeDtypeStruct((out_rows, 12), jnp.float32),
            grid=(1,),
            in_specs=[_full_spec(op.shape) for op in operands],
            out_specs=_full_spec((out_rows, 12)),
            scratch_shapes=scratch,
            compiler_params=pltpu.CompilerParams(
                dimension_semantics=("arbitrary",)),
        )(*operands)

        # Parity interleave + NHWC -> NCHW: pure XLA layout plumbing.
        y = out2d.reshape(B, sf, sf, 2, 2, 3)                  # [b, m, n, ry, rx, c]
        y = jnp.transpose(y, (0, 1, 3, 2, 4, 5)).reshape(B, 2 * sf, 2 * sf, 3)
        return jnp.transpose(y, (0, 3, 1, 2))                  # NCHW like PyTorch


if __name__ == "__main__":
    key = jax.random.PRNGKey(0)
    k_param, k_z = jax.random.split(key)

    latent_dim, input_size, hidden_dim, batch = 8, 16, 16, 2
    gen = Generator(latent_dim, input_size, hidden_dim, k_param)

    z = jax.random.normal(k_z, (batch, latent_dim), jnp.float32)
    out = jax.jit(gen.__call__)(z)
    out = jax.block_until_ready(out)

    assert out.shape == (batch, 3, input_size, input_size), out.shape
    assert bool(jnp.all(jnp.isfinite(out)))
    assert bool(jnp.all(jnp.abs(out) <= 1.0 + 1e-6))   # tanh output range
    print("KERNEL_OK")
</pallas_src>

<mosaic_0001>
module attributes {stable_mosaic.version = 11 : i64} {
  func.func @_generator_kernel(%arg0: i32, %arg1: memref<2x8xf32, #tpu.memory_space<vmem>>, %arg2: memref<8x512xbf16, #tpu.memory_space<vmem>>, %arg3: memref<1x32xf32, #tpu.memory_space<vmem>>, %arg4: memref<1x32xf32, #tpu.memory_space<vmem>>, %arg5: memref<512x16xbf16, #tpu.memory_space<vmem>>, %arg6: memref<1x16xf32, #tpu.memory_space<vmem>>, %arg7: memref<1x16xf32, #tpu.memory_space<vmem>>, %arg8: memref<4x64x3xbf16, #tpu.memory_space<vmem>>, %arg9: memref<1x3xf32, #tpu.memory_space<vmem>>, %arg10: memref<128x12xf32, #tpu.memory_space<vmem>>, %arg11: memref<2x11x11x32xf32, #tpu.memory_space<vmem>>, %arg12: memref<2x10x10x16xf32, #tpu.memory_space<vmem>>) attributes {dimension_semantics = [#tpu.dimension_semantics<arbitrary>], iteration_bounds = array<i64: 1>, scalar_prefetch = 0 : i64, scratch_operands = 2 : i64, tpu.core_type = #tpu.core_type<tc>, window_params = [{pipeline_mode = #tpu.pipeline_mode<synchronous>, transform_indices = @transform_0, window_bounds = array<i64: 2, 8>}, {pipeline_mode = #tpu.pipeline_mode<synchronous>, transform_indices = @transform_1, window_bounds = array<i64: 8, 512>}, {pipeline_mode = #tpu.pipeline_mode<synchronous>, transform_indices = @transform_2, window_bounds = array<i64: 1, 32>}, {pipeline_mode = #tpu.pipeline_mode<synchronous>, transform_indices = @transform_3, window_bounds = array<i64: 1, 32>}, {pipeline_mode = #tpu.pipeline_mode<synchronous>, transform_indices = @transform_4, window_bounds = array<i64: 512, 16>}, {pipeline_mode = #tpu.pipeline_mode<synchronous>, transform_indices = @transform_5, window_bounds = array<i64: 1, 16>}, {pipeline_mode = #tpu.pipeline_mode<synchronous>, transform_indices = @transform_6, window_bounds = array<i64: 1, 16>}, {pipeline_mode = #tpu.pipeline_mode<synchronous>, transform_indices = @transform_7, window_bounds = array<i64: 4, 64, 3>}, {pipeline_mode = #tpu.pipeline_mode<synchronous>, transform_indices = @transform_8, window_bounds = array<i64: 1, 3>}, {pipeline_mode = #tpu.pipeline_mode<synchronous>, transform_indices = @transform_9, window_bounds = array<i64: 128, 12>}]} {
    %cst = arith.constant 0.000000e+00 : f32
    %0 = vector.broadcast %cst : f32 to vector<2x11x11x32xf32>
    %c0 = arith.constant 0 : index
    %c0_0 = arith.constant 0 : index
    %c0_1 = arith.constant 0 : index
    %c0_2 = arith.constant 0 : index
    %1 = vector.load %arg11[%c0, %c0_0, %c0_1, %c0_2] : memref<2x11x11x32xf32, #tpu.memory_space<vmem>>, vector<2x11x11x32xf32>
    tpu.vector_store %arg11[%c0, %c0_0, %c0_1, %c0_2], %0 {strides = array<i32>} : memref<2x11x11x32xf32, #tpu.memory_space<vmem>>, vector<2x11x11x32xf32>,
    %cst_3 = arith.constant 0.000000e+00 : f32
    %2 = vector.broadcast %cst_3 : f32 to vector<2x10x10x16xf32>
    %c0_4 = arith.constant 0 : index
    %c0_5 = arith.constant 0 : index
    %c0_6 = arith.constant 0 : index
    %c0_7 = arith.constant 0 : index
    %3 = vector.load %arg12[%c0_4, %c0_5, %c0_6, %c0_7] : memref<2x10x10x16xf32, #tpu.memory_space<vmem>>, vector<2x10x10x16xf32>
    tpu.vector_store %arg12[%c0_4, %c0_5, %c0_6, %c0_7], %2 {strides = array<i32>} : memref<2x10x10x16xf32, #tpu.memory_space<vmem>>, vector<2x10x10x16xf32>,
    %c0_8 = arith.constant 0 : index
    %c0_9 = arith.constant 0 : index
    %4 = vector.load %arg1[%c0_8, %c0_9] : memref<2x8xf32, #tpu.memory_space<vmem>>, vector<2x8xf32>
    %5 = arith.truncf %4 : vector<2x8xf32> to vector<2x8xbf16>
    %c0_10 = arith.constant 0 : index
    %c0_11 = arith.constant 0 : index
    %6 = vector.load %arg2[%c0_10, %c0_11] : memref<8x512xbf16, #tpu.memory_space<vmem>>, vector<8x512xbf16>
    %cst_12 = arith.constant dense<0.000000e+00> : vector<2x512xf32>
    %7 = tpu.matmul %5, %6, %cst_12 {dimension_numbers = #tpu.dot_dimension_numbers<[1], [0], [0], [1], [0, 0, 1, 1], [], []>} : vector<2x8xbf16>, vector<8x512xbf16>, vector<2x512xf32> -> vector<2x512xf32>
    %8 = vector.extract_strided_slice %7 {offsets = [0, 0], sizes = [2, 32], strides = [1, 1]} : vector<2x512xf32> to vector<2x32xf32>
    %9 = vector.extract_strided_slice %7 {offsets = [0, 32], sizes = [2, 32], strides = [1, 1]} : vector<2x512xf32> to vector<2x32xf32>
    %10 = vector.extract_strided_slice %7 {offsets = [0, 64], sizes = [2, 32], strides = [1, 1]} : vector<2x512xf32> to vector<2x32xf32>
    %11 = vector.extract_strided_slice %7 {offsets = [0, 96], sizes = [2, 32], strides = [1, 1]} : vector<2x512xf32> to vector<2x32xf32>
    %12 = vector.extract_strided_slice %7 {offsets = [0, 128], sizes = [2, 32], strides = [1, 1]} : vector<2x512xf32> to vector<2x32xf32>
    %13 = vector.extract_strided_slice %7 {offsets = [0, 160], sizes = [2, 32], strides = [1, 1]} : vector<2x512xf32> to vector<2x32xf32>
    %14 = vector.extract_strided_slice %7 {offsets = [0, 192], sizes = [2, 32], strides = [1, 1]} : vector<2x512xf32> to vector<2x32xf32>
    %15 = vector.extract_strided_slice %7 {offsets = [0, 224], sizes = [2, 32], strides = [1, 1]} : vector<2x512xf32> to vector<2x32xf32>
    %16 = vector.extract_strided_slice %7 {offsets = [0, 256], sizes = [2, 32], strides = [1, 1]} : vector<2x512xf32> to vector<2x32xf32>
    %17 = vector.extract_strided_slice %7 {offsets = [0, 288], sizes = [2, 32], strides = [1, 1]} : vector<2x512xf32> to vector<2x32xf32>
    %18 = vector.extract_strided_slice %7 {offsets = [0, 320], sizes = [2, 32], strides = [1, 1]} : vector<2x512xf32> to vector<2x32xf32>
    %19 = vector.extract_strided_slice %7 {offsets = [0, 352], sizes = [2, 32], strides = [1, 1]} : vector<2x512xf32> to vector<2x32xf32>
    %20 = vector.extract_strided_slice %7 {offsets = [0, 384], sizes = [2, 32], strides = [1, 1]} : vector<2x512xf32> to vector<2x32xf32>
    %21 = vector.extract_strided_slice %7 {offsets = [0, 416], sizes = [2, 32], strides = [1, 1]} : vector<2x512xf32> to vector<2x32xf32>
    %22 = vector.extract_strided_slice %7 {offsets = [0, 448], sizes = [2, 32], strides = [1, 1]} : vector<2x512xf32> to vector<2x32xf32>
    %23 = vector.extract_strided_slice %7 {offsets = [0, 480], sizes = [2, 32], strides = [1, 1]} : vector<2x512xf32> to vector<2x32xf32>
    %24 = arith.mulf %8, %8 : vector<2x32xf32>
    %25 = arith.addf %8, %9 : vector<2x32xf32>
    %26 = arith.mulf %9, %9 : vector<2x32xf32>
    %27 = arith.addf %24, %26 : vector<2x32xf32>
    %28 = arith.addf %25, %10 : vector<2x32xf32>
    %29 = arith.mulf %10, %10 : vector<2x32xf32>
    %30 = arith.addf %27, %29 : vector<2x32xf32>
    %31 = arith.addf %28, %11 : vector<2x32xf32>
    %32 = arith.mulf %11, %11 : vector<2x32xf32>
    %33 = arith.addf %30, %32 : vector<2x32xf32>
    %34 = arith.addf %31, %12 : vector<2x32xf32>
    %35 = arith.mulf %12, %12 : vector<2x32xf32>
    %36 = arith.addf %33, %35 : vector<2x32xf32>
    %37 = arith.addf %34, %13 : vector<2x32xf32>
    %38 = arith.mulf %13, %13 : vector<2x32xf32>
    %39 = arith.addf %36, %38 : vector<2x32xf32>
    %40 = arith.addf %37, %14 : vector<2x32xf32>
    %41 = arith.mulf %14, %14 : vector<2x32xf32>
    %42 = arith.addf %39, %41 : vector<2x32xf32>
    %43 = arith.addf %40, %15 : vector<2x32xf32>
    %44 = arith.mulf %15, %15 : vector<2x32xf32>
    %45 = arith.addf %42, %44 : vector<2x32xf32>
    %46 = arith.addf %43, %16 : vector<2x32xf32>
    %47 = arith.mulf %16, %16 : vector<2x32xf32>
    %48 = arith.addf %45, %47 : vector<2x32xf32>
    %49 = arith.addf %46, %17 : vector<2x32xf32>
    %50 = arith.mulf %17, %17 : vector<2x32xf32>
    %51 = arith.addf %48, %50 : vector<2x32xf32>
    %52 = arith.addf %49, %18 : vector<2x32xf32>
    %53 = arith.mulf %18, %18 : vector<2x32xf32>
    %54 = arith.addf %51, %53 : vector<2x32xf32>
    %55 = arith.addf %52, %19 : vector<2x32xf32>
    %56 = arith.mulf %19, %19 : vector<2x32xf32>
    %57 = arith.addf %54, %56 : vector<2x32xf32>
    %58 = arith.addf %55, %20 : vector<2x32xf32>
    %59 = arith.mulf %20, %20 : vector<2x32xf32>
    %60 = arith.addf %57, %59 : vector<2x32xf32>
    %61 = arith.addf %58, %21 : vector<2x32xf32>
    %62 = arith.mulf %21, %21 : vector<2x32xf32>
    %63 = arith.addf %60, %62 : vector<2x32xf32>
    %64 = arith.addf %61, %22 : vector<2x32xf32>
    %65 = arith.mulf %22, %22 : vector<2x32xf32>
    %66 = arith.addf %63, %65 : vector<2x32xf32>
    %67 = arith.addf %64, %23 : vector<2x32xf32>
    %68 = arith.mulf %23, %23 : vector<2x32xf32>
    %69 = arith.addf %66, %68 : vector<2x32xf32>
    %cst_13 = arith.constant dense<0.000000e+00> : vector<32xf32>
    %70 = vector.multi_reduction <add>, %67, %cst_13 [0] : vector<2x32xf32> to vector<32xf32>
    %71 = vector.shape_cast %70 : vector<32xf32> to vector<1x32xf32>
    %cst_14 = arith.constant 3.200000e+01 : f32
    %72 = vector.broadcast %cst_14 : f32 to vector<1x32xf32>
    %73 = arith.divf %71, %72 : vector<1x32xf32>
    %cst_15 = arith.constant dense<0.000000e+00> : vector<32xf32>
    %74 = vector.multi_reduction <add>, %69, %cst_15 [0] : vector<2x32xf32> to vector<32xf32>
    %75 = vector.shape_cast %74 : vector<32xf32> to vector<1x32xf32>
    %cst_16 = arith.constant 3.200000e+01 : f32
    %76 = vector.broadcast %cst_16 : f32 to vector<1x32xf32>
    %77 = arith.divf %75, %76 : vector<1x32xf32>
    %78 = arith.mulf %73, %73 : vector<1x32xf32>
    %79 = arith.subf %77, %78 : vector<1x32xf32>
    %cst_17 = arith.constant 0.000000e+00 : f32
    %80 = vector.broadcast %cst_17 : f32 to vector<1x32xf32>
    %81 = arith.maximumf %79, %80 : vector<1x32xf32>
    %c0_18 = arith.constant 0 : index
    %c0_19 = arith.constant 0 : index
    %82 = vector.load %arg3[%c0_18, %c0_19] : memref<1x32xf32, #tpu.memory_space<vmem>>, vector<1x32xf32>
    %cst_20 = arith.constant 9.99999974E-6 : f32
    %83 = vector.broadcast %cst_20 : f32 to vector<1x32xf32>
    %84 = arith.addf %81, %83 : vector<1x32xf32>
    %85 = math.rsqrt %84 : vector<1x32xf32>
    %86 = arith.mulf %82, %85 : vector<1x32xf32>
    %c0_21 = arith.constant 0 : index
    %c0_22 = arith.constant 0 : index
    %87 = vector.load %arg4[%c0_21, %c0_22] : memref<1x32xf32, #tpu.memory_space<vmem>>, vector<1x32xf32>
    %88 = arith.mulf %73, %86 : vector<1x32xf32>
    %89 = arith.subf %87, %88 : vector<1x32xf32>
    %90 = vector.broadcast %86 : vector<1x32xf32> to vector<2x32xf32>
    %91 = arith.mulf %8, %90 : vector<2x32xf32>
    %92 = vector.broadcast %89 : vector<1x32xf32> to vector<2x32xf32>
    %93 = arith.addf %91, %92 : vector<2x32xf32>
    %cst_23 = arith.constant 0.000000e+00 : f32
    %94 = vector.broadcast %cst_23 : f32 to vector<2x32xf32>
    %95 = arith.maximumf %93, %94 : vector<2x32xf32>
    %c0_24 = arith.constant 0 : index
    %c2 = arith.constant 2 : index
    %c2_25 = arith.constant 2 : index
    %c0_26 = arith.constant 0 : index
    %96 = vector.load %arg11[%c0_24, %c2, %c2_25, %c0_26] : memref<2x11x11x32xf32, #tpu.memory_space<vmem>>, vector<2x1x1x32xf32>
    %97 = vector.shape_cast %96 : vector<2x1x1x32xf32> to vector<2x32xf32>
    %98 = vector.shape_cast %95 : vector<2x32xf32> to vector<2x1x1x32xf32>
    tpu.vector_store %arg11[%c0_24, %c2, %c2_25, %c0_26], %98 {strides = array<i32>} : memref<2x11x11x32xf32, #tpu.memory_space<vmem>>, vector<2x1x1x32xf32>,
    %99 = vector.broadcast %86 : vector<1x32xf32> to vector<2x32xf32>
    %100 = arith.mulf %9, %99 : vector<2x32xf32>
    %101 = vector.broadcast %89 : vector<1x32xf32> to vector<2x32xf32>
    %102 = arith.addf %100, %101 : vector<2x32xf32>
    %cst_27 = arith.constant 0.000000e+00 : f32
    %103 = vector.broadcast %cst_27 : f32 to vector<2x32xf32>
    %104 = arith.maximumf %102, %103 : vector<2x32xf32>
    %c0_28 = arith.constant 0 : index
    %c2_29 = arith.constant 2 : index
    %c4 = arith.constant 4 : index
    %c0_30 = arith.constant 0 : index
    %105 = vector.load %arg11[%c0_28, %c2_29, %c4, %c0_30] : memref<2x11x11x32xf32, #tpu.memory_space<vmem>>, vector<2x1x1x32xf32>
    %106 = vector.shape_cast %105 : vector<2x1x1x32xf32> to vector<2x32xf32>
    %107 = vector.shape_cast %104 : vector<2x32xf32> to vector<2x1x1x32xf32>
    tpu.vector_store %arg11[%c0_28, %c2_29, %c4, %c0_30], %107 {strides = array<i32>} : memref<2x11x11x32xf32, #tpu.memory_space<vmem>>, vector<2x1x1x32xf32>,
    %108 = vector.broadcast %86 : vector<1x32xf32> to vector<2x32xf32>
    %109 = arith.mulf %10, %108 : vector<2x32xf32>
    %110 = vector.broadcast %89 : vector<1x32xf32> to vector<2x32xf32>
    %111 = arith.addf %109, %110 : vector<2x32xf32>
    %cst_31 = arith.constant 0.000000e+00 : f32
    %112 = vector.broadcast %cst_31 : f32 to vector<2x32xf32>
    %113 = arith.maximumf %111, %112 : vector<2x32xf32>
    %c0_32 = arith.constant 0 : index
    %c2_33 = arith.constant 2 : index
    %c6 = arith.constant 6 : index
    %c0_34 = arith.constant 0 : index
    %114 = vector.load %arg11[%c0_32, %c2_33, %c6, %c0_34] : memref<2x11x11x32xf32, #tpu.memory_space<vmem>>, vector<2x1x1x32xf32>
    %115 = vector.shape_cast %114 : vector<2x1x1x32xf32> to vector<2x32xf32>
    %116 = vector.shape_cast %113 : vector<2x32xf32> to vector<2x1x1x32xf32>
    tpu.vector_store %arg11[%c0_32, %c2_33, %c6, %c0_34], %116 {strides = array<i32>} : memref<2x11x11x32xf32, #tpu.memory_space<vmem>>, vector<2x1x1x32xf32>,
    %117 = vector.broadcast %86 : vector<1x32xf32> to vector<2x32xf32>
    %118 = arith.mulf %11, %117 : vector<2x32xf32>
    %119 = vector.broadcast %89 : vector<1x32xf32> to vector<2x32xf32>
    %120 = arith.addf %118, %119 : vector<2x32xf32>
    %cst_35 = arith.constant 0.000000e+00 : f32
    %121 = vector.broadcast %cst_35 : f32 to vector<2x32xf32>
    %122 = arith.maximumf %120, %121 : vector<2x32xf32>
    %c0_36 = arith.constant 0 : index
    %c2_37 = arith.constant 2 : index
    %c8 = arith.constant 8 : index
    %c0_38 = arith.constant 0 : index
    %123 = vector.load %arg11[%c0_36, %c2_37, %c8, %c0_38] : memref<2x11x11x32xf32, #tpu.memory_space<vmem>>, vector<2x1x1x32xf32>
    %124 = vector.shape_cast %123 : vector<2x1x1x32xf32> to vector<2x32xf32>
    %125 = vector.shape_cast %122 : vector<2x32xf32> to vector<2x1x1x32xf32>
    tpu.vector_store %arg11[%c0_36, %c2_37, %c8, %c0_38], %125 {strides = array<i32>} : memref<2x11x11x32xf32, #tpu.memory_space<vmem>>, vector<2x1x1x32xf32>,
    %126 = vector.broadcast %86 : vector<1x32xf32> to vector<2x32xf32>
    %127 = arith.mulf %12, %126 : vector<2x32xf32>
    %128 = vector.broadcast %89 : vector<1x32xf32> to vector<2x32xf32>
    %129 = arith.addf %127, %128 : vector<2x32xf32>
    %cst_39 = arith.constant 0.000000e+00 : f32
    %130 = vector.broadcast %cst_39 : f32 to vector<2x32xf32>
    %131 = arith.maximumf %129, %130 : vector<2x32xf32>
    %c0_40 = arith.constant 0 : index
    %c4_41 = arith.constant 4 : index
    %c2_42 = arith.constant 2 : index
    %c0_43 = arith.constant 0 : index
    %132 = vector.load %arg11[%c0_40, %c4_41, %c2_42, %c0_43] : memref<2x11x11x32xf32, #tpu.memory_space<vmem>>, vector<2x1x1x32xf32>
    %133 = vector.shape_cast %132 : vector<2x1x1x32xf32> to vector<2x32xf32>
    %134 = vector.shape_cast %131 : vector<2x32xf32> to vector<2x1x1x32xf32>
    tpu.vector_store %arg11[%c0_40, %c4_41, %c2_42, %c0_43], %134 {strides = array<i32>} : memref<2x11x11x32xf32, #tpu.memory_space<vmem>>, vector<2x1x1x32xf32>,
    %135 = vector.broadcast %86 : vector<1x32xf32> to vector<2x32xf32>
    %136 = arith.mulf %13, %135 : vector<2x32xf32>
    %137 = vector.broadcast %89 : vector<1x32xf32> to vector<2x32xf32>
    %138 = arith.addf %136, %137 : vector<2x32xf32>
    %cst_44 = arith.constant 0.000000e+00 : f32
    %139 = vector.broadcast %cst_44 : f32 to vector<2x32xf32>
    %140 = arith.maximumf %138, %139 : vector<2x32xf32>
    %c0_45 = arith.constant 0 : index
    %c4_46 = arith.constant 4 : index
    %c4_47 = arith.constant 4 : index
    %c0_48 = arith.constant 0 : index
    %141 = vector.load %arg11[%c0_45, %c4_46, %c4_47, %c0_48] : memref<2x11x11x32xf32, #tpu.memory_space<vmem>>, vector<2x1x1x32xf32>
    %142 = vector.shape_cast %141 : vector<2x1x1x32xf32> to vector<2x32xf32>
    %143 = vector.shape_cast %140 : vector<2x32xf32> to vector<2x1x1x32xf32>
    tpu.vector_store %arg11[%c0_45, %c4_46, %c4_47, %c0_48], %143 {strides = array<i32>} : memref<2x11x11x32xf32, #tpu.memory_space<vmem>>, vector<2x1x1x32xf32>,
    %144 = vector.broadcast %86 : vector<1x32xf32> to vector<2x32xf32>
    %145 = arith.mulf %14, %144 : vector<2x32xf32>
    %146 = vector.broadcast %89 : vector<1x32xf32> to vector<2x32xf32>
    %147 = arith.addf %145, %146 : vector<2x32xf32>
    %cst_49 = arith.constant 0.000000e+00 : f32
    %148 = vector.broadcast %cst_49 : f32 to vector<2x32xf32>
    %149 = arith.maximumf %147, %148 : vector<2x32xf32>
    %c0_50 = arith.constant 0 : index
    %c4_51 = arith.constant 4 : index
    %c6_52 = arith.constant 6 : index
    %c0_53 = arith.constant 0 : index
    %150 = vector.load %arg11[%c0_50, %c4_51, %c6_52, %c0_53] : memref<2x11x11x32xf32, #tpu.memory_space<vmem>>, vector<2x1x1x32xf32>
    %151 = vector.shape_cast %150 : vector<2x1x1x32xf32> to vector<2x32xf32>
    %152 = vector.shape_cast %149 : vector<2x32xf32> to vector<2x1x1x32xf32>
    tpu.vector_store %arg11[%c0_50, %c4_51, %c6_52, %c0_53], %152 {strides = array<i32>} : memref<2x11x11x32xf32, #tpu.memory_space<vmem>>, vector<2x1x1x32xf32>,
    %153 = vector.broadcast %86 : vector<1x32xf32> to vector<2x32xf32>
    %154 = arith.mulf %15, %153 : vector<2x32xf32>
    %155 = vector.broadcast %89 : vector<1x32xf32> to vector<2x32xf32>
    %156 = arith.addf %154, %155 : vector<2x32xf32>
    %cst_54 = arith.constant 0.000000e+00 : f32
    %157 = vector.broadcast %cst_54 : f32 to vector<2x32xf32>
    %158 = arith.maximumf %156, %157 : vector<2x32xf32>
    %c0_55 = arith.constant 0 : index
    %c4_56 = arith.constant 4 : index
    %c8_57 = arith.constant 8 : index
    %c0_58 = arith.constant 0 : index
    %159 = vector.load %arg11[%c0_55, %c4_56, %c8_57, %c0_58] : memref<2x11x11x32xf32, #tpu.memory_space<vmem>>, vector<2x1x1x32xf32>
    %160 = vector.shape_cast %159 : vector<2x1x1x32xf32> to vector<2x32xf32>
    %161 = vector.shape_cast %158 : vector<2x32xf32> to vector<2x1x1x32xf32>
    tpu.vector_store %arg11[%c0_55, %c4_56, %c8_57, %c0_58], %161 {strides = array<i32>} : memref<2x11x11x32xf32, #tpu.memory_space<vmem>>, vector<2x1x1x32xf32>,
    %162 = vector.broadcast %86 : vector<1x32xf32> to vector<2x32xf32>
    %163 = arith.mulf %16, %162 : vector<2x32xf32>
    %164 = vector.broadcast %89 : vector<1x32xf32> to vector<2x32xf32>
    %165 = arith.addf %163, %164 : vector<2x32xf32>
    %cst_59 = arith.constant 0.000000e+00 : f32
    %166 = vector.broadcast %cst_59 : f32 to vector<2x32xf32>
    %167 = arith.maximumf %165, %166 : vector<2x32xf32>
    %c0_60 = arith.constant 0 : index
    %c6_61 = arith.constant 6 : index
    %c2_62 = arith.constant 2 : index
    %c0_63 = arith.constant 0 : index
    %168 = vector.load %arg11[%c0_60, %c6_61, %c2_62, %c0_63] : memref<2x11x11x32xf32, #tpu.memory_space<vmem>>, vector<2x1x1x32xf32>
    %169 = vector.shape_cast %168 : vector<2x1x1x32xf32> to vector<2x32xf32>
    %170 = vector.shape_cast %167 : vector<2x32xf32> to vector<2x1x1x32xf32>
    tpu.vector_store %arg11[%c0_60, %c6_61, %c2_62, %c0_63], %170 {strides = array<i32>} : memref<2x11x11x32xf32, #tpu.memory_space<vmem>>, vector<2x1x1x32xf32>,
    %171 = vector.broadcast %86 : vector<1x32xf32> to vector<2x32xf32>
    %172 = arith.mulf %17, %171 : vector<2x32xf32>
    %173 = vector.broadcast %89 : vector<1x32xf32> to vector<2x32xf32>
    %174 = arith.addf %172, %173 : vector<2x32xf32>
    %cst_64 = arith.constant 0.000000e+00 : f32
    %175 = vector.broadcast %cst_64 : f32 to vector<2x32xf32>
    %176 = arith.maximumf %174, %175 : vector<2x32xf32>
    %c0_65 = arith.constant 0 : index
    %c6_66 = arith.constant 6 : index
    %c4_67 = arith.constant 4 : index
    %c0_68 = arith.constant 0 : index
    %177 = vector.load %arg11[%c0_65, %c6_66, %c4_67, %c0_68] : memref<2x11x11x32xf32, #tpu.memory_space<vmem>>, vector<2x1x1x32xf32>
    %178 = vector.shape_cast %177 : vector<2x1x1x32xf32> to vector<2x32xf32>
    %179 = vector.shape_cast %176 : vector<2x32xf32> to vector<2x1x1x32xf32>
    tpu.vector_store %arg11[%c0_65, %c6_66, %c4_67, %c0_68], %179 {strides = array<i32>} : memref<2x11x11x32xf32, #tpu.memory_space<vmem>>, vector<2x1x1x32xf32>,
    %180 = vector.broadcast %86 : vector<1x32xf32> to vector<2x32xf32>
    %181 = arith.mulf %18, %180 : vector<2x32xf32>
    %182 = vector.broadcast %89 : vector<1x32xf32> to vector<2x32xf32>
    %183 = arith.addf %181, %182 : vector<2x32xf32>
    %cst_69 = arith.constant 0.000000e+00 : f32
    %184 = vector.broadcast %cst_69 : f32 to vector<2x32xf32>
    %185 = arith.maximumf %183, %184 : vector<2x32xf32>
    %c0_70 = arith.constant 0 : index
    %c6_71 = arith.constant 6 : index
    %c6_72 = arith.constant 6 : index
    %c0_73 = arith.constant 0 : index
    %186 = vector.load %arg11[%c0_70, %c6_71, %c6_72, %c0_73] : memref<2x11x11x32xf32, #tpu.memory_space<vmem>>, vector<2x1x1x32xf32>
    %187 = vector.shape_cast %186 : vector<2x1x1x32xf32> to vector<2x32xf32>
    %188 = vector.shape_cast %185 : vector<2x32xf32> to vector<2x1x1x32xf32>
    tpu.vector_store %arg11[%c0_70, %c6_71, %c6_72, %c0_73], %188 {strides = array<i32>} : memref<2x11x11x32xf32, #tpu.memory_space<vmem>>, vector<2x1x1x32xf32>,
    %189 = vector.broadcast %86 : vector<1x32xf32> to vector<2x32xf32>
    %190 = arith.mulf %19, %189 : vector<2x32xf32>
    %191 = vector.broadcast %89 : vector<1x32xf32> to vector<2x32xf32>
    %192 = arith.addf %190, %191 : vector<2x32xf32>
    %cst_74 = arith.constant 0.000000e+00 : f32
    %193 = vector.broadcast %cst_74 : f32 to vector<2x32xf32>
    %194 = arith.maximumf %192, %193 : vector<2x32xf32>
    %c0_75 = arith.constant 0 : index
    %c6_76 = arith.constant 6 : index
    %c8_77 = arith.constant 8 : index
    %c0_78 = arith.constant 0 : index
    %195 = vector.load %arg11[%c0_75, %c6_76, %c8_77, %c0_78] : memref<2x11x11x32xf32, #tpu.memory_space<vmem>>, vector<2x1x1x32xf32>
    %196 = vector.shape_cast %195 : vector<2x1x1x32xf32> to vector<2x32xf32>
    %197 = vector.shape_cast %194 : vector<2x32xf32> to vector<2x1x1x32xf32>
    tpu.vector_store %arg11[%c0_75, %c6_76, %c8_77, %c0_78], %197 {strides = array<i32>} : memref<2x11x11x32xf32, #tpu.memory_space<vmem>>, vector<2x1x1x32xf32>,
    %198 = vector.broadcast %86 : vector<1x32xf32> to vector<2x32xf32>
    %199 = arith.mulf %20, %198 : vector<2x32xf32>
    %200 = vector.broadcast %89 : vector<1x32xf32> to vector<2x32xf32>
    %201 = arith.addf %199, %200 : vector<2x32xf32>
    %cst_79 = arith.constant 0.000000e+00 : f32
    %202 = vector.broadcast %cst_79 : f32 to vector<2x32xf32>
    %203 = arith.maximumf %201, %202 : vector<2x32xf32>
    %c0_80 = arith.constant 0 : index
    %c8_81 = arith.constant 8 : index
    %c2_82 = arith.constant 2 : index
    %c0_83 = arith.constant 0 : index
    %204 = vector.load %arg11[%c0_80, %c8_81, %c2_82, %c0_83] : memref<2x11x11x32xf32, #tpu.memory_space<vmem>>, vector<2x1x1x32xf32>
    %205 = vector.shape_cast %204 : vector<2x1x1x32xf32> to vector<2x32xf32>
    %206 = vector.shape_cast %203 : vector<2x32xf32> to vector<2x1x1x32xf32>
    tpu.vector_store %arg11[%c0_80, %c8_81, %c2_82, %c0_83], %206 {strides = array<i32>} : memref<2x11x11x32xf32, #tpu.memory_space<vmem>>, vector<2x1x1x32xf32>,
    %207 = vector.broadcast %86 : vector<1x32xf32> to vector<2x32xf32>
    %208 = arith.mulf %21, %207 : vector<2x32xf32>
    %209 = vector.broadcast %89 : vector<1x32xf32> to vector<2x32xf32>
    %210 = arith.addf %208, %209 : vector<2x32xf32>
    %cst_84 = arith.constant 0.000000e+00 : f32
    %211 = vector.broadcast %cst_84 : f32 to vector<2x32xf32>
    %212 = arith.maximumf %210, %211 : vector<2x32xf32>
    %c0_85 = arith.constant 0 : index
    %c8_86 = arith.constant 8 : index
    %c4_87 = arith.constant 4 : index
    %c0_88 = arith.constant 0 : index
    %213 = vector.load %arg11[%c0_85, %c8_86, %c4_87, %c0_88] : memref<2x11x11x32xf32, #tpu.memory_space<vmem>>, vector<2x1x1x32xf32>
    %214 = vector.shape_cast %213 : vector<2x1x1x32xf32> to vector<2x32xf32>
    %215 = vector.shape_cast %212 : vector<2x32xf32> to vector<2x1x1x32xf32>
    tpu.vector_store %arg11[%c0_85, %c8_86, %c4_87, %c0_88], %215 {strides = array<i32>} : memref<2x11x11x32xf32, #tpu.memory_space<vmem>>, vector<2x1x1x32xf32>,
    %216 = vector.broadcast %86 : vector<1x32xf32> to vector<2x32xf32>
    %217 = arith.mulf %22, %216 : vector<2x32xf32>
    %218 = vector.broadcast %89 : vector<1x32xf32> to vector<2x32xf32>
    %219 = arith.addf %217, %218 : vector<2x32xf32>
    %cst_89 = arith.constant 0.000000e+00 : f32
    %220 = vector.broadcast %cst_89 : f32 to vector<2x32xf32>
    %221 = arith.maximumf %219, %220 : vector<2x32xf32>
    %c0_90 = arith.constant 0 : index
    %c8_91 = arith.constant 8 : index
    %c6_92 = arith.constant 6 : index
    %c0_93 = arith.constant 0 : index
    %222 = vector.load %arg11[%c0_90, %c8_91, %c6_92, %c0_93] : memref<2x11x11x32xf32, #tpu.memory_space<vmem>>, vector<2x1x1x32xf32>
    %223 = vector.shape_cast %222 : vector<2x1x1x32xf32> to vector<2x32xf32>
    %224 = vector.shape_cast %221 : vector<2x32xf32> to vector<2x1x1x32xf32>
    tpu.vector_store %arg11[%c0_90, %c8_91, %c6_92, %c0_93], %224 {strides = array<i32>} : memref<2x11x11x32xf32, #tpu.memory_space<vmem>>, vector<2x1x1x32xf32>,
    %225 = vector.broadcast %86 : vector<1x32xf32> to vector<2x32xf32>
    %226 = arith.mulf %23, %225 : vector<2x32xf32>
    %227 = vector.broadcast %89 : vector<1x32xf32> to vector<2x32xf32>
    %228 = arith.addf %226, %227 : vector<2x32xf32>
    %cst_94 = arith.constant 0.000000e+00 : f32
    %229 = vector.broadcast %cst_94 : f32 to vector<2x32xf32>
    %230 = arith.maximumf %228, %229 : vector<2x32xf32>
    %c0_95 = arith.constant 0 : index
    %c8_96 = arith.constant 8 : index
    %c8_97 = arith.constant 8 : index
    %c0_98 = arith.constant 0 : index
    %231 = vector.load %arg11[%c0_95, %c8_96, %c8_97, %c0_98] : memref<2x11x11x32xf32, #tpu.memory_space<vmem>>, vector<2x1x1x32xf32>
    %232 = vector.shape_cast %231 : vector<2x1x1x32xf32> to vector<2x32xf32>
    %233 = vector.shape_cast %230 : vector<2x32xf32> to vector<2x1x1x32xf32>
    tpu.vector_store %arg11[%c0_95, %c8_96, %c8_97, %c0_98], %233 {strides = array<i32>} : memref<2x11x11x32xf32, #tpu.memory_space<vmem>>, vector<2x1x1x32xf32>,
    %c0_99 = arith.constant 0 : index
    %c0_100 = arith.constant 0 : index
    %c0_101 = arith.constant 0 : index
    %c0_102 = arith.constant 0 : index
    %234 = vector.load %arg11[%c0_99, %c0_100, %c0_101, %c0_102] : memref<2x11x11x32xf32, #tpu.memory_space<vmem>>, vector<2x11x11x32xf32>
    %235 = vector.extract_strided_slice %234 {offsets = [0, 0, 0, 0], sizes = [2, 8, 8, 32], strides = [1, 1, 1, 1]} : vector<2x11x11x32xf32> to vector<2x8x8x32xf32>
    %236 = vector.shape_cast %235 : vector<2x8x8x32xf32> to vector<128x32xf32>
    %237 = vector.extract_strided_slice %234 {offsets = [0, 0, 1, 0], sizes = [2, 8, 8, 32], strides = [1, 1, 1, 1]} : vector<2x11x11x32xf32> to vector<2x8x8x32xf32>
    %238 = vector.shape_cast %237 : vector<2x8x8x32xf32> to vector<128x32xf32>
    %239 = vector.extract_strided_slice %234 {offsets = [0, 0, 2, 0], sizes = [2, 8, 8, 32], strides = [1, 1, 1, 1]} : vector<2x11x11x32xf32> to vector<2x8x8x32xf32>
    %240 = vector.shape_cast %239 : vector<2x8x8x32xf32> to vector<128x32xf32>
    %241 = vector.extract_strided_slice %234 {offsets = [0, 0, 3, 0], sizes = [2, 8, 8, 32], strides = [1, 1, 1, 1]} : vector<2x11x11x32xf32> to vector<2x8x8x32xf32>
    %242 = vector.shape_cast %241 : vector<2x8x8x32xf32> to vector<128x32xf32>
    %243 = vector.extract_strided_slice %234 {offsets = [0, 1, 0, 0], sizes = [2, 8, 8, 32], strides = [1, 1, 1, 1]} : vector<2x11x11x32xf32> to vector<2x8x8x32xf32>
    %244 = vector.shape_cast %243 : vector<2x8x8x32xf32> to vector<128x32xf32>
    %245 = vector.extract_strided_slice %234 {offsets = [0, 1, 1, 0], sizes = [2, 8, 8, 32], strides = [1, 1, 1, 1]} : vector<2x11x11x32xf32> to vector<2x8x8x32xf32>
    %246 = vector.shape_cast %245 : vector<2x8x8x32xf32> to vector<128x32xf32>
    %247 = vector.extract_strided_slice %234 {offsets = [0, 1, 2, 0], sizes = [2, 8, 8, 32], strides = [1, 1, 1, 1]} : vector<2x11x11x32xf32> to vector<2x8x8x32xf32>
    %248 = vector.shape_cast %247 : vector<2x8x8x32xf32> to vector<128x32xf32>
    %249 = vector.extract_strided_slice %234 {offsets = [0, 1, 3, 0], sizes = [2, 8, 8, 32], strides = [1, 1, 1, 1]} : vector<2x11x11x32xf32> to vector<2x8x8x32xf32>
    %250 = vector.shape_cast %249 : vector<2x8x8x32xf32> to vector<128x32xf32>
    %251 = vector.extract_strided_slice %234 {offsets = [0, 2, 0, 0], sizes = [2, 8, 8, 32], strides = [1, 1, 1, 1]} : vector<2x11x11x32xf32> to vector<2x8x8x32xf32>
    %252 = vector.shape_cast %251 : vector<2x8x8x32xf32> to vector<128x32xf32>
    %253 = vector.extract_strided_slice %234 {offsets = [0, 2, 1, 0], sizes = [2, 8, 8, 32], strides = [1, 1, 1, 1]} : vector<2x11x11x32xf32> to vector<2x8x8x32xf32>
    %254 = vector.shape_cast %253 : vector<2x8x8x32xf32> to vector<128x32xf32>
    %255 = vector.extract_strided_slice %234 {offsets = [0, 2, 2, 0], sizes = [2, 8, 8, 32], strides = [1, 1, 1, 1]} : vector<2x11x11x32xf32> to vector<2x8x8x32xf32>
    %256 = vector.shape_cast %255 : vector<2x8x8x32xf32> to vector<128x32xf32>
    %257 = vector.extract_strided_slice %234 {offsets = [0, 2, 3, 0], sizes = [2, 8, 8, 32], strides = [1, 1, 1, 1]} : vector<2x11x11x32xf32> to vector<2x8x8x32xf32>
    %258 = vector.shape_cast %257 : vector<2x8x8x32xf32> to vector<128x32xf32>
    %259 = vector.extract_strided_slice %234 {offsets = [0, 3, 0, 0], sizes = [2, 8, 8, 32], strides = [1, 1, 1, 1]} : vector<2x11x11x32xf32> to vector<2x8x8x32xf32>
    %260 = vector.shape_cast %259 : vector<2x8x8x32xf32> to vector<128x32xf32>
    %261 = vector.extract_strided_slice %234 {offsets = [0, 3, 1, 0], sizes = [2, 8, 8, 32], strides = [1, 1, 1, 1]} : vector<2x11x11x32xf32> to vector<2x8x8x32xf32>
    %262 = vector.shape_cast %261 : vector<2x8x8x32xf32> to vector<128x32xf32>
    %263 = vector.extract_strided_slice %234 {offsets = [0, 3, 2, 0], sizes = [2, 8, 8, 32], strides = [1, 1, 1, 1]} : vector<2x11x11x32xf32> to vector<2x8x8x32xf32>
    %264 = vector.shape_cast %263 : vector<2x8x8x32xf32> to vector<128x32xf32>
    %265 = vector.extract_strided_slice %234 {offsets = [0, 3, 3, 0], sizes = [2, 8, 8, 32], strides = [1, 1, 1, 1]} : vector<2x11x11x32xf32> to vector<2x8x8x32xf32>
    %266 = vector.shape_cast %265 : vector<2x8x8x32xf32> to vector<128x32xf32>
    %267 = tpu.concatenate %236, %238, %240, %242, %244, %246, %248, %250, %252, %254, %256, %258, %260, %262, %264, %266 in 1 : vector<128x32xf32>, vector<128x32xf32>, vector<128x32xf32>, vector<128x32xf32>, vector<128x32xf32>, vector<128x32xf32>, vector<128x32xf32>, vector<128x32xf32>, vector<128x32xf32>, vector<128x32xf32>, vector<128x32xf32>, vector<128x32xf32>, vector<128x32xf32>, vector<128x32xf32>, vector<128x32xf32>, vector<128x32xf32> -> vector<128x512xf32>
    %268 = arith.truncf %267 : vector<128x512xf32> to vector<128x512xbf16>
    %c0_103 = arith.constant 0 : index
    %c0_104 = arith.constant 0 : index
    %269 = vector.load %arg5[%c0_103, %c0_104] : memref<512x16xbf16, #tpu.memory_space<vmem>>, vector<512x16xbf16>
    %cst_105 = arith.constant dense<0.000000e+00> : vector<128x16xf32>
    %270 = tpu.matmul %268, %269, %cst_105 {dimension_numbers = #tpu.dot_dimension_numbers<[1], [0], [0], [1], [0, 0, 1, 1], [], []>} : vector<128x512xbf16>, vector<512x16xbf16>, vector<128x16xf32> -> vector<128x16xf32>
    %cst_106 = arith.constant dense<0.000000e+00> : vector<16xf32>
    %271 = vector.multi_reduction <add>, %270, %cst_106 [0] : vector<128x16xf32> to vector<16xf32>
    %272 = vector.shape_cast %271 : vector<16xf32> to vector<1x16xf32>
    %cst_107 = arith.constant 1.280000e+02 : f32
    %273 = vector.broadcast %cst_107 : f32 to vector<1x16xf32>
    %274 = arith.divf %272, %273 : vector<1x16xf32>
    %275 = arith.mulf %270, %270 : vector<128x16xf32>
    %cst_108 = arith.constant dense<0.000000e+00> : vector<16xf32>
    %276 = vector.multi_reduction <add>, %275, %cst_108 [0] : vector<128x16xf32> to vector<16xf32>
    %277 = vector.shape_cast %276 : vector<16xf32> to vector<1x16xf32>
    %cst_109 = arith.constant 1.280000e+02 : f32
    %278 = vector.broadcast %cst_109 : f32 to vector<1x16xf32>
    %279 = arith.divf %277, %278 : vector<1x16xf32>
    %280 = arith.mulf %274, %274 : vector<1x16xf32>
    %281 = arith.subf %279, %280 : vector<1x16xf32>
    %cst_110 = arith.constant 0.000000e+00 : f32
    %282 = vector.broadcast %cst_110 : f32 to vector<1x16xf32>
    %283 = arith.maximumf %281, %282 : vector<1x16xf32>
    %c0_111 = arith.constant 0 : index
    %c0_112 = arith.constant 0 : index
    %284 = vector.load %arg6[%c0_111, %c0_112] : memref<1x16xf32, #tpu.memory_space<vmem>>, vector<1x16xf32>
    %cst_113 = arith.constant 9.99999974E-6 : f32
    %285 = vector.broadcast %cst_113 : f32 to vector<1x16xf32>
    %286 = arith.addf %283, %285 : vector<1x16xf32>
    %287 = math.rsqrt %286 : vector<1x16xf32>
    %288 = arith.mulf %284, %287 : vector<1x16xf32>
    %c0_114 = arith.constant 0 : index
    %c0_115 = arith.constant 0 : index
    %289 = vector.load %arg7[%c0_114, %c0_115] : memref<1x16xf32, #tpu.memory_space<vmem>>, vector<1x16xf32>
    %290 = arith.mulf %274, %288 : vector<1x16xf32>
    %291 = arith.subf %289, %290 : vector<1x16xf32>
    %292 = vector.broadcast %288 : vector<1x16xf32> to vector<128x16xf32>
    %293 = arith.mulf %270, %292 : vector<128x16xf32>
    %294 = vector.broadcast %291 : vector<1x16xf32> to vector<128x16xf32>
    %295 = arith.addf %293, %294 : vector<128x16xf32>
    %cst_116 = arith.constant 0.000000e+00 : f32
    %296 = vector.broadcast %cst_116 : f32 to vector<128x16xf32>
    %297 = arith.maximumf %295, %296 : vector<128x16xf32>
    %298 = vector.shape_cast %297 : vector<128x16xf32> to vector<2x8x8x16xf32>
    %c0_117 = arith.constant 0 : index
    %c1 = arith.constant 1 : index
    %c1_118 = arith.constant 1 : index
    %c0_119 = arith.constant 0 : index
    %299 = vector.load %arg12[%c0_117, %c1, %c1_118, %c0_119] : memref<2x10x10x16xf32, #tpu.memory_space<vmem>>, vector<2x8x8x16xf32>
    tpu.vector_store %arg12[%c0_117, %c1, %c1_118, %c0_119], %298 {strides = array<i32>} : memref<2x10x10x16xf32, #tpu.memory_space<vmem>>, vector<2x8x8x16xf32>,
    %c0_120 = arith.constant 0 : index
    %c0_121 = arith.constant 0 : index
    %c0_122 = arith.constant 0 : index
    %c0_123 = arith.constant 0 : index
    %300 = vector.load %arg12[%c0_120, %c0_121, %c0_122, %c0_123] : memref<2x10x10x16xf32, #tpu.memory_space<vmem>>, vector<2x10x10x16xf32>
    %c0_124 = arith.constant 0 : index
    %c0_125 = arith.constant 0 : index
    %c0_126 = arith.constant 0 : index
    %301 = vector.load %arg8[%c0_124, %c0_125, %c0_126] : memref<4x64x3xbf16, #tpu.memory_space<vmem>>, vector<4x64x3xbf16>
    %c0_127 = arith.constant 0 : index
    %c0_128 = arith.constant 0 : index
    %302 = vector.load %arg9[%c0_127, %c0_128] : memref<1x3xf32, #tpu.memory_space<vmem>>, vector<1x3xf32>
    %303 = vector.extract_strided_slice %300 {offsets = [0, 0, 0, 0], sizes = [2, 8, 8, 16], strides = [1, 1, 1, 1]} : vector<2x10x10x16xf32> to vector<2x8x8x16xf32>
    %304 = vector.shape_cast %303 : vector<2x8x8x16xf32> to vector<128x16xf32>
    %305 = vector.extract_strided_slice %300 {offsets = [0, 0, 1, 0], sizes = [2, 8, 8, 16], strides = [1, 1, 1, 1]} : vector<2x10x10x16xf32> to vector<2x8x8x16xf32>
    %306 = vector.shape_cast %305 : vector<2x8x8x16xf32> to vector<128x16xf32>
    %307 = vector.extract_strided_slice %300 {offsets = [0, 0, 2, 0], sizes = [2, 8, 8, 16], strides = [1, 1, 1, 1]} : vector<2x10x10x16xf32> to vector<2x8x8x16xf32>
    %308 = vector.shape_cast %307 : vector<2x8x8x16xf32> to vector<128x16xf32>
    %309 = vector.extract_strided_slice %300 {offsets = [0, 1, 0, 0], sizes = [2, 8, 8, 16], strides = [1, 1, 1, 1]} : vector<2x10x10x16xf32> to vector<2x8x8x16xf32>
    %310 = vector.shape_cast %309 : vector<2x8x8x16xf32> to vector<128x16xf32>
    %311 = vector.extract_strided_slice %300 {offsets = [0, 1, 1, 0], sizes = [2, 8, 8, 16], strides = [1, 1, 1, 1]} : vector<2x10x10x16xf32> to vector<2x8x8x16xf32>
    %312 = vector.shape_cast %311 : vector<2x8x8x16xf32> to vector<128x16xf32>
    %313 = vector.extract_strided_slice %300 {offsets = [0, 1, 2, 0], sizes = [2, 8, 8, 16], strides = [1, 1, 1, 1]} : vector<2x10x10x16xf32> to vector<2x8x8x16xf32>
    %314 = vector.shape_cast %313 : vector<2x8x8x16xf32> to vector<128x16xf32>
    %315 = vector.extract_strided_slice %300 {offsets = [0, 2, 0, 0], sizes = [2, 8, 8, 16], strides = [1, 1, 1, 1]} : vector<2x10x10x16xf32> to vector<2x8x8x16xf32>
    %316 = vector.shape_cast %315 : vector<2x8x8x16xf32> to vector<128x16xf32>
    %317 = vector.extract_strided_slice %300 {offsets = [0, 2, 1, 0], sizes = [2, 8, 8, 16], strides = [1, 1, 1, 1]} : vector<2x10x10x16xf32> to vector<2x8x8x16xf32>
    %318 = vector.shape_cast %317 : vector<2x8x8x16xf32> to vector<128x16xf32>
    %319 = vector.extract_strided_slice %300 {offsets = [0, 2, 2, 0], sizes = [2, 8, 8, 16], strides = [1, 1, 1, 1]} : vector<2x10x10x16xf32> to vector<2x8x8x16xf32>
    %320 = vector.shape_cast %319 : vector<2x8x8x16xf32> to vector<128x16xf32>
    %321 = tpu.concatenate %304, %306, %310, %312 in 1 : vector<128x16xf32>, vector<128x16xf32>, vector<128x16xf32>, vector<128x16xf32> -> vector<128x64xf32>
    %322 = arith.truncf %321 : vector<128x64xf32> to vector<128x64xbf16>
    %323 = vector.extract_strided_slice %301 {offsets = [0, 0, 0], sizes = [1, 64, 3], strides = [1, 1, 1]} : vector<4x64x3xbf16> to vector<1x64x3xbf16>
    %324 = vector.shape_cast %323 : vector<1x64x3xbf16> to vector<64x3xbf16>
    %cst_129 = arith.constant dense<0.000000e+00> : vector<128x3xf32>
    %325 = tpu.matmul %322, %324, %cst_129 {dimension_numbers = #tpu.dot_dimension_numbers<[1], [0], [0], [1], [0, 0, 1, 1], [], []>} : vector<128x64xbf16>, vector<64x3xbf16>, vector<128x3xf32> -> vector<128x3xf32>
    %326 = vector.broadcast %302 : vector<1x3xf32> to vector<128x3xf32>
    %327 = arith.addf %325, %326 : vector<128x3xf32>
    %328 = math.tanh %327 : vector<128x3xf32>
    %329 = tpu.concatenate %306, %308, %312, %314 in 1 : vector<128x16xf32>, vector<128x16xf32>, vector<128x16xf32>, vector<128x16xf32> -> vector<128x64xf32>
    %330 = arith.truncf %329 : vector<128x64xf32> to vector<128x64xbf16>
    %331 = vector.extract_strided_slice %301 {offsets = [1, 0, 0], sizes = [1, 64, 3], strides = [1, 1, 1]} : vector<4x64x3xbf16> to vector<1x64x3xbf16>
    %332 = vector.shape_cast %331 : vector<1x64x3xbf16> to vector<64x3xbf16>
    %cst_130 = arith.constant dense<0.000000e+00> : vector<128x3xf32>
    %333 = tpu.matmul %330, %332, %cst_130 {dimension_numbers = #tpu.dot_dimension_numbers<[1], [0], [0], [1], [0, 0, 1, 1], [], []>} : vector<128x64xbf16>, vector<64x3xbf16>, vector<128x3xf32> -> vector<128x3xf32>
    %334 = vector.broadcast %302 : vector<1x3xf32> to vector<128x3xf32>
    %335 = arith.addf %333, %334 : vector<128x3xf32>
    %336 = math.tanh %335 : vector<128x3xf32>
    %337 = tpu.concatenate %310, %312, %316, %318 in 1 : vector<128x16xf32>, vector<128x16xf32>, vector<128x16xf32>, vector<128x16xf32> -> vector<128x64xf32>
    %338 = arith.truncf %337 : vector<128x64xf32> to vector<128x64xbf16>
    %339 = vector.extract_strided_slice %301 {offsets = [2, 0, 0], sizes = [1, 64, 3], strides = [1, 1, 1]} : vector<4x64x3xbf16> to vector<1x64x3xbf16>
    %340 = vector.shape_cast %339 : vector<1x64x3xbf16> to vector<64x3xbf16>
    %cst_131 = arith.constant dense<0.000000e+00> : vector<128x3xf32>
    %341 = tpu.matmul %338, %340, %cst_131 {dimension_numbers = #tpu.dot_dimension_numbers<[1], [0], [0], [1], [0, 0, 1, 1], [], []>} : vector<128x64xbf16>, vector<64x3xbf16>, vector<128x3xf32> -> vector<128x3xf32>
    %342 = vector.broadcast %302 : vector<1x3xf32> to vector<128x3xf32>
    %343 = arith.addf %341, %342 : vector<128x3xf32>
    %344 = math.tanh %343 : vector<128x3xf32>
    %345 = tpu.concatenate %312, %314, %318, %320 in 1 : vector<128x16xf32>, vector<128x16xf32>, vector<128x16xf32>, vector<128x16xf32> -> vector<128x64xf32>
    %346 = arith.truncf %345 : vector<128x64xf32> to vector<128x64xbf16>
    %347 = vector.extract_strided_slice %301 {offsets = [3, 0, 0], sizes = [1, 64, 3], strides = [1, 1, 1]} : vector<4x64x3xbf16> to vector<1x64x3xbf16>
    %348 = vector.shape_cast %347 : vector<1x64x3xbf16> to vector<64x3xbf16>
    %cst_132 = arith.constant dense<0.000000e+00> : vector<128x3xf32>
    %349 = tpu.matmul %346, %348, %cst_132 {dimension_numbers = #tpu.dot_dimension_numbers<[1], [0], [0], [1], [0, 0, 1, 1], [], []>} : vector<128x64xbf16>, vector<64x3xbf16>, vector<128x3xf32> -> vector<128x3xf32>
    %350 = vector.broadcast %302 : vector<1x3xf32> to vector<128x3xf32>
    %351 = arith.addf %349, %350 : vector<128x3xf32>
    %352 = math.tanh %351 : vector<128x3xf32>
    %353 = tpu.concatenate %328, %336, %344, %352 in 1 : vector<128x3xf32>, vector<128x3xf32>, vector<128x3xf32>, vector<128x3xf32> -> vector<128x12xf32>
    %c0_133 = arith.constant 0 : index
    %c0_134 = arith.constant 0 : index
    %354 = vector.load %arg10[%c0_133, %c0_134] : memref<128x12xf32, #tpu.memory_space<vmem>>, vector<128x12xf32>
    tpu.vector_store %arg10[%c0_133, %c0_134], %353 {strides = array<i32>} : memref<128x12xf32, #tpu.memory_space<vmem>>, vector<128x12xf32>,
    return
  }
  func.func @transform_0(%arg0: i32) -> (i32, i32) {
    %c0_i32 = arith.constant 0 : i32
    %c0_i32_0 = arith.constant 0 : i32
    %c0_i32_1 = arith.constant 0 : i32
    return %c0_i32, %c0_i32_0 : i32, i32
  }
  func.func @transform_1(%arg0: i32) -> (i32, i32) {
    %c0_i32 = arith.constant 0 : i32
    %c0_i32_0 = arith.constant 0 : i32
    %c0_i32_1 = arith.constant 0 : i32
    return %c0_i32, %c0_i32_0 : i32, i32
  }
  func.func @transform_2(%arg0: i32) -> (i32, i32) {
    %c0_i32 = arith.constant 0 : i32
    %c0_i32_0 = arith.constant 0 : i32
    %c0_i32_1 = arith.constant 0 : i32
    return %c0_i32, %c0_i32_0 : i32, i32
  }
  func.func @transform_3(%arg0: i32) -> (i32, i32) {
    %c0_i32 = arith.constant 0 : i32
    %c0_i32_0 = arith.constant 0 : i32
    %c0_i32_1 = arith.constant 0 : i32
    return %c0_i32, %c0_i32_0 : i32, i32
  }
  func.func @transform_4(%arg0: i32) -> (i32, i32) {
    %c0_i32 = arith.constant 0 : i32
    %c0_i32_0 = arith.constant 0 : i32
    %c0_i32_1 = arith.constant 0 : i32
    return %c0_i32, %c0_i32_0 : i32, i32
  }
  func.func @transform_5(%arg0: i32) -> (i32, i32) {
    %c0_i32 = arith.constant 0 : i32
    %c0_i32_0 = arith.constant 0 : i32
    %c0_i32_1 = arith.constant 0 : i32
    return %c0_i32, %c0_i32_0 : i32, i32
  }
  func.func @transform_6(%arg0: i32) -> (i32, i32) {
    %c0_i32 = arith.constant 0 : i32
    %c0_i32_0 = arith.constant 0 : i32
    %c0_i32_1 = arith.constant 0 : i32
    return %c0_i32, %c0_i32_0 : i32, i32
  }
  func.func @transform_7(%arg0: i32) -> (i32, i32, i32) {
    %c0_i32 = arith.constant 0 : i32
    %c0_i32_0 = arith.constant 0 : i32
    %c0_i32_1 = arith.constant 0 : i32
    %c0_i32_2 = arith.constant 0 : i32
    return %c0_i32, %c0_i32_0, %c0_i32_1 : i32, i32, i32
  }
  func.func @transform_8(%arg0: i32) -> (i32, i32) {
    %c0_i32 = arith.constant 0 : i32
    %c0_i32_0 = arith.constant 0 : i32
    %c0_i32_1 = arith.constant 0 : i32
    return %c0_i32, %c0_i32_0 : i32, i32
  }
  func.func @transform_9(%arg0: i32) -> (i32, i32) {
    %c0_i32 = arith.constant 0 : i32
    %c0_i32_0 = arith.constant 0 : i32
    %c0_i32_1 = arith.constant 0 : i32
    return %c0_i32, %c0_i32_0 : i32, i32
  }
}

</mosaic_0001>

<bundles_post_ra>
// kernel: a_call__.1
= control target key start
LH: loop header
LB: loop body
LE: loop exit
PB: predicated region body
PF: predicated region fallthrough
CT: control target
= control target key end

     0   :  { %14 = vsyncpa [#allocation5], 0  ;;  %s6304_s0 = inlined_call_operand.hbm [shape: f32[2,8], index: 0, kind: input, shape index: {}]   ;;  %s6305_s1 = inlined_call_operand.hbm [shape: bf16[8,512], index: 1, kind: input, shape index: {}]   ;;  %s6306_s2 = inlined_call_operand.hbm [shape: f32[1,32], index: 2, kind: input, shape index: {}]   ;;  %s6307_s3 = inlined_call_operand.hbm [shape: f32[1,32], index: 3, kind: input, shape index: {}]   ;;  %s6308_s4 = inlined_call_operand.hbm [shape: bf16[512,16], index: 4, kind: input, shape index: {}]   ;;  %s6309_s5 = inlined_call_operand.vmem [shape: f32[1,16], index: 5, kind: input, shape index: {}]   ;;  %s6310_s6 = inlined_call_operand.vmem [shape: f32[1,16], index: 6, kind: input, shape index: {}]   ;;  %s6311_s7 = inlined_call_operand.hbm [shape: bf16[4,64,3], index: 7, kind: input, shape index: {}]   ;;  %s6312_s8 = inlined_call_operand.vmem [shape: f32[1,3], index: 8, kind: input, shape index: {}]   ;;  %s6313_s9 = inlined_call_operand.vmem [shape: f32[128,12], index: 9, kind: output, shape index: {}]  }
   0x1   :  { %15 = vsyncpa [#allocation7], 0 }
   0x2   :  { %16 = vsyncpa [#allocation10], 0  ;;  %s34_s11 = sshll.u32 %s6305_s1, 4  ;;  %s35_s11 = int_to_ptr.hbm [resolvable:$true] %s34_s11 }
   0x3   :  { %17 = vsyncpa [#allocation13], 0  ;;  %s4362_s12 = smov [#allocation6]   ;;  %s56_s16 = sshll.u32 %s6307_s3, 4  ;;  %s57_s16 = int_to_ptr.hbm [resolvable:$true] %s56_s16 }
   0x4   :  { %s36_s13 = sshll.u32 %s4362_s12, 4  ;;  %s4363_s17 = smov [#allocation9]   ;;  %s37_s13 = int_to_ptr.vmem [resolvable:$true] %s36_s13 }
   0x5   :  { %39 = dma.hbm_to_vmem [thread:$0]  %s35_s11, 256, %s37_s13, [#allocation7]  }
   0x6   :  { %s58_s18 = sshll.u32 %s4363_s17, 4  ;;  %s23_s21 = sshll.u32 %s6304_s0, 4  ;;  %s59_s18 = int_to_ptr.vmem [resolvable:$true] %s58_s18  ;;  %s24_s21 = int_to_ptr.hbm [resolvable:$true] %s23_s21 }
   0x7   :  { %61 = dma.hbm_to_vmem [thread:$0]  %s57_s16, 16, %s59_s18, [#allocation10]  }
   0x8   :  { %s45_s23 = sshll.u32 %s6306_s2, 4  ;;  %s4364_s24 = smov [#allocation4]   ;;  %s46_s23 = int_to_ptr.hbm [resolvable:$true] %s45_s23 }
   0x9   :  { %s25_s25 = sshll.u32 %s4364_s24, 4  ;;  %s4365_s3 = smov [#allocation8]   ;;  %s26_s25 = int_to_ptr.vmem [resolvable:$true] %s25_s25 }
   0xa   :  { %28 = dma.hbm_to_vmem [thread:$0]  %s24_s21, 32, %s26_s25, [#allocation5]  }
   0xb   :  { %s47_s26 = sshll.u32 %s4365_s3, 4  ;;  %s66_s29 = sshll.u32 %s6308_s4, 4  ;;  %s48_s26 = int_to_ptr.vmem [resolvable:$true] %s47_s26  ;;  %s67_s29 = int_to_ptr.hbm [resolvable:$true] %s66_s29 }
   0xc   :  { %50 = dma.hbm_to_vmem [thread:$0]  %s46_s23, 16, %s48_s26, [#allocation7]  }
   0xd   :  { %s4366_s0 = smov [#allocation11]   ;;  %s83_s2 = sshll.u32 %s6311_s7, 4  ;;  %s84_s2 = int_to_ptr.hbm [resolvable:$true] %s83_s2 }
   0xe   :  { %s68_s30 = sshll.u32 %s4366_s0, 4  ;;  %s4367_s12 = smov 64   ;;  %s69_s30 = int_to_ptr.vmem [resolvable:$true] %s68_s30 }
   0xf   :  { %s4368_s13 = smov 4   ;;  %s4369_s14 = smov [#allocation12]  }
  0x10   :  { %74 = dma.hbm_to_vmem [thread:$0]  %s67_s29, 4096, %s69_s30, [#allocation10], %s4367_s12, %s4367_s12, %s4368_s13  }
  0x11   :  { %s85_s15 = sshll.u32 %s4369_s14, 4  ;;  %s86_s15 = int_to_ptr.vmem [resolvable:$true] %s85_s15 }
  0x12   :  { %91 = dma.hbm_to_vmem [thread:$0]  %s84_s2, 2048, %s86_s15, [#allocation13], %s4367_s12, %s4367_s12, %s4368_s13  }
  0x13   :  { %4354 = dma.done.wait [#allocation5], 32  }
  0x14   :  { %4355 = vsyncadd [#allocation5], 4294967264 }
  0x15   :  { %4356 = dma.done.wait [#allocation7], 272  }
  0x16   :  { %4357 = vsyncadd [#allocation7], 4294967024 }
  0x17   :  { %4358 = dma.done.wait [#allocation10], 4112  }
  0x18   :  { %4359 = vsyncadd [#allocation10], 4294963184 }
  0x19   :  { %4360 = dma.done.wait [#allocation13], 2048  }
  0x1a   :  { %4361 = vsyncadd [#allocation13], 4294965248  ;;  %v209_v0 = vld [vmem:[#allocation6] sm:$0xff]  ;;  %v210_v1 = vld [vmem:[#allocation6 + $0x8] sm:$0xff]  ;;  %vm225_vm0 = vcmask 1043456   ;;  %vm221_vm1 = vcmask 64512  }
  0x1b   :  { %v213_v2 = vunpack.c.l.b16 %v209_v0  ;;  %v214_v3 = vunpack.c.h.b16 %v209_v0  ;;  %v215_v4 = vunpack.c.l.b16 %v210_v1  ;;  %v207_v5 = vld [vmem:[#allocation4] sm:$0x3]  ;;  %v216_v6 = vunpack.c.h.b16 %v210_v1  ;;  %s4370_s4 = smov 32   ;;  %s4371_s7 = smov 96  }
  0x1c   :  { %v208_v13 = vpack.c.bf16 %v207_v5, %v207_v5  ;;  %v4372_v0 = vmov 32.0   ;;  %vm404_vm2 = vcmask 254976   ;;  %vm119_vm4 = vcmask 261120   ;;  %s4377_s1 = smov 6   ;;  %s4379_s22 = smov 3  }
  0x1d   :  { %v217_v7 = vpack.c.b16 %v213_v2, %v213_v2  ;;  %v218_v8 = vpack.c.b16 %v214_v3, %v214_v3  ;;  %v219_v9 = vpack.c.b16 %v215_v4, %v215_v4  ;;  %v220_v10 = vpack.c.b16 %v216_v6, %v216_v6 }
  0x1e   :  { %4073 = vrcp.f32 %v4372_v0  ;;  %vm460_vm8 = vcmask 253952   ;;  %vm121_vm9 = vcmask 256000   ;;  %vm764_vm10 = vcmask 1046528  }
  0x1f   :  { %v227_v11 = vsel %vm225_vm0, %v217_v7, 0  ;;  %v230_v12 = vsel %vm225_vm0, %v218_v8, 0  ;;  %v233_v14 = vsel %vm225_vm0, %v219_v9, 0  ;;  %v236_v15 = vsel %vm225_vm0, %v220_v10, 0 }
  0x20   :  { %245 = vmatpush.bf16.msra.mxu0 %v227_v11  ;;  %258 = vmatpush.bf16.msra.mxu1 %v230_v12  ;;  %vm813_vm11 = vcmask 1045504   ;;  %vm862_vm12 = vcmask 1044480   ;;  %vm1191_vm13 = vcmask 523264   ;;  %vm1208_vm14 = vcmask 785408  }
  0x21   :  { %271 = vmatpush.bf16.msra.mxu2 %v233_v14  ;;  %284 = vmatpush.bf16.msra.mxu3 %v236_v15  ;;  %vm165_vm15 = vcmask 130048   ;;  %vm167_vm0 = vcmask 123904  }
  0x23   :  { %3343 = vmatmul.msk.bf16.vlgmr.msra.gmra.mxu0 %vm221_vm1, %v208_v13  ;;  %3344 = vmatmul.msk.bf16.vlgmr.msra.gmra.mxu1 %vm221_vm1, %v208_v13 }
  0x24   :  { %3345 = vmatmul.msk.bf16.vlgmr.msra.gmra.mxu2 %vm221_vm1, %v208_v13  ;;  %3346 = vmatmul.msk.bf16.vlgmr.msra.gmra.mxu3 %vm221_vm1, %v208_v13  ;;  %v4074_v7 = vpop.eup %4073 }
  0x25   :  { %v413_v11 = vmul.f32 32.0, %v4074_v7  ;;  %vm417_vm3 = vweird.f32 %v4074_v7 }
  0xa0   :  { %v4452_v16 = vpop.f32.mrf.mxu0  ;;  %v4454_v17 = vpop.f32.mrf.mxu1 }
  0xa1   :  { %309 = vrot.lane.b32.xlu2 %v4452_v16, %s4370_s4  ;;  %301 = vrot.lane.b32.xlu1 %v4452_v16, %s4367_s12  ;;  %v290_v22 = vmul.f32 %v4452_v16, %v4452_v16  ;;  %v318_v25 = vmul.f32 %v4454_v17, %v4454_v17 }
  0xa2   :  { %292 = vrot.lane.b32.xlu0 %v4452_v16, %s4371_s7 }
  0xa7   :  { %v4462_v18 = vpop.f32.mrf.mxu2  ;;  %v4464_v19 = vpop.f32.mrf.mxu3 }
  0xa8   :  { %v249_v20 = vpop.f32.mrf.mxu0  ;;  %v262_v21 = vpop.f32.mrf.mxu1  ;;  %v347_v26 = vmul.f32 %v4462_v18, %v4462_v18  ;;  %v376_v27 = vmul.f32 %v4464_v19, %v4464_v19 }
  0xa9   :  { %330 = vrot.lane.b32.xlu2 %v4454_v17, %s4367_s12  ;;  %338 = vrot.lane.b32.xlu1 %v4454_v17, %s4370_s4  ;;  %v414_v20 = vsub.f32 1.0, %v413_v11 }
  0xaa   :  { %321 = vrot.lane.b32.xlu0 %v4454_v17, %s4371_s7 }
  0xaf   :  { %v275_v23 = vpop.f32.mrf.mxu2  ;;  %v288_v24 = vpop.f32.mrf.mxu3 }
  0xb1   :  { %313 = vrot.lane.b32.xlu2 %v290_v22, %s4370_s4  ;;  %305 = vrot.lane.b32.xlu1 %v290_v22, %s4367_s12 }
  0xb2   :  { %297 = vrot.lane.b32.xlu0 %v290_v22, %s4371_s7 }
  0xb9   :  { %342 = vrot.lane.b32.xlu2 %v318_v25, %s4370_s4  ;;  %326 = vrot.lane.b32.xlu1 %v318_v25, %s4371_s7 }
  0xba   :  { %334 = vrot.lane.b32.xlu0 %v318_v25, %s4367_s12 }
  0xc1   :  { %359 = vrot.lane.b32.xlu2 %v4462_v18, %s4367_s12  ;;  %367 = vrot.lane.b32.xlu1 %v4462_v18, %s4370_s4 }
  0xc2   :  { %350 = vrot.lane.b32.xlu0 %v4462_v18, %s4371_s7 }
  0xc9   :  { %388 = vrot.lane.b32.xlu2 %v4464_v19, %s4367_s12  ;;  %355 = vrot.lane.b32.xlu1 %v347_v26, %s4371_s7 }
  0xca   :  { %379 = vrot.lane.b32.xlu0 %v4464_v19, %s4371_s7 }
  0xd1   :  { %371 = vrot.lane.b32.xlu2 %v347_v26, %s4370_s4  ;;  %384 = vrot.lane.b32.xlu1 %v376_v27, %s4371_s7 }
  0xd2   :  { %363 = vrot.lane.b32.xlu0 %v347_v26, %s4367_s12 }
  0xd9   :  { %400 = vrot.lane.b32.xlu2 %v376_v27, %s4370_s4  ;;  %396 = vrot.lane.b32.xlu1 %v4464_v19, %s4370_s4 }
  0xda   :  { %392 = vrot.lane.b32.xlu0 %v376_v27, %s4367_s12 }
  0xfb   :  { %v310_v28 = vpop.permute.xlu2 %309 }
 0x103   :  { %v331_v29 = vpop.permute.xlu2 %330 }
 0x10b   :  { %v314_v34 = vpop.permute.xlu2 %313 }
 0x113   :  { %v302_v30 = vpop.permute.xlu1 %301  ;;  %v343_v42 = vpop.permute.xlu2 %342 }
 0x114   :  { %v293_v31 = vpop.permute.xlu0 %292 }
 0x115   :  { %v295_v32 = vadd.f32 %v293_v31, %v4452_v16 }
 0x117   :  { %v304_v35 = vadd.f32 %v302_v30, %v295_v32 }
 0x119   :  { %v312_v37 = vadd.f32 %v310_v28, %v304_v35 }
 0x11b   :  { %v339_v33 = vpop.permute.xlu1 %338  ;;  %v317_v39 = vadd.f32 %v312_v37, %v4454_v17  ;;  %v360_v49 = vpop.permute.xlu2 %359 }
 0x11c   :  { %v322_v36 = vpop.permute.xlu0 %321 }
 0x11d   :  { %v324_v43 = vadd.f32 %v322_v36, %v317_v39 }
 0x11f   :  { %v333_v46 = vadd.f32 %v331_v29, %v324_v43  ;;  %v415_v29 = vmul.f32 %v4074_v7, %v414_v20 }
 0x121   :  { %v341_v50 = vadd.f32 %v339_v33, %v333_v46 }
 0x123   :  { %v306_v38 = vpop.permute.xlu1 %305  ;;  %v346_v53 = vadd.f32 %v341_v50, %v4462_v18  ;;  %v389_v58 = vpop.permute.xlu2 %388 }
 0x124   :  { %v298_v40 = vpop.permute.xlu0 %297 }
 0x125   :  { %v300_v41 = vadd.f32 %v298_v40, %v290_v22 }
 0x127   :  { %v308_v44 = vadd.f32 %v306_v38, %v300_v41 }
 0x129   :  { %v316_v48 = vadd.f32 %v314_v34, %v308_v44  ;;  %v416_v34 = vadd.f32 %v4074_v7, %v415_v29 }
 0x12b   :  { %v327_v45 = vpop.permute.xlu1 %326  ;;  %v319_v51 = vadd.f32 %v318_v25, %v316_v48  ;;  %v372_v5 = vpop.permute.xlu2 %371  ;;  %v418_v38 = vsel %vm417_vm3, %v4074_v7, %v416_v34 }
 0x12c   :  { %v335_v47 = vpop.permute.xlu0 %334 }
 0x12d   :  { %v329_v55 = vadd.f32 %v327_v45, %v319_v51 }
 0x12f   :  { %v337_v57 = vadd.f32 %v335_v47, %v329_v55  ;;  %v431_v55 = vld [vmem:[#allocation8] sm:$0x1] }
 0x131   :  { %v345_v62 = vadd.f32 %v343_v42, %v337_v57 }
 0x133   :  { %v368_v52 = vpop.permute.xlu1 %367  ;;  %v348_v1 = vadd.f32 %v347_v26, %v345_v62  ;;  %v401_v24 = vpop.permute.xlu2 %400 }
 0x134   :  { %v351_v54 = vpop.permute.xlu0 %350 }
 0x135   :  { %v353_v56 = vadd.f32 %v351_v54, %v346_v53 }
 0x137   :  { %v362_v59 = vadd.f32 %v360_v49, %v353_v56  ;;  %v4373_v49 = vmov 0.0  }
 0x138   :  { %123 = vst.msk [vmem:[#allocation2 + $0x10] sm:$0xff] %vm119_vm4, %v4373_v49 }
 0x139   :  { %v370_v63 = vadd.f32 %v368_v52, %v362_v59  ;;  %131 = vst.msk [vmem:[#allocation2 + $0x50] sm:$0xff] %vm119_vm4, %v4373_v49  ;;  %v444_v59 = vld [vmem:[#allocation9] sm:$0x1] }
 0x13a   :  { %120 = vst.msk [vmem:[#allocation2] sm:$0xff] %vm119_vm4, %v4373_v49 }
 0x13b   :  { %v356_v60 = vpop.permute.xlu1 %355  ;;  %v375_v2 = vadd.f32 %v370_v63, %v4464_v19  ;;  %125 = vst.msk [vmem:[#allocation2 + $0x20] sm:$0xff] %vm119_vm4, %v4373_v49 }
 0x13c   :  { %v380_v61 = vpop.permute.xlu0 %379  ;;  %v358_v3 = vadd.f32 %v356_v60, %v348_v1  ;;  %127 = vst.msk [vmem:[#allocation2 + $0x30] sm:$0xff] %vm119_vm4, %v4373_v49 }
 0x13d   :  { %v382_v9 = vadd.f32 %v380_v61, %v375_v2  ;;  %129 = vst.msk [vmem:[#allocation2 + $0x40] sm:$0xff] %vm119_vm4, %v4373_v49 }
 0x13e   :  { %133 = vst.msk [vmem:[#allocation2 + $0x60] sm:$0xff] %vm119_vm4, %v4373_v49 }
 0x13f   :  { %v391_v13 = vadd.f32 %v389_v58, %v382_v9  ;;  %135 = vst.msk [vmem:[#allocation2 + $0x70] sm:$0xff] %vm119_vm4, %v4373_v49  ;;  %v4633_v34 = vld [vmem:[#allocation2 + $0x10] sm:$0xff] }
 0x140   :  { %137 = vst.msk [vmem:[#allocation2 + $0x80] sm:$0xff] %vm119_vm4, %v4373_v49 }
 0x141   :  { %139 = vst.msk [vmem:[#allocation2 + $0x90] sm:$0xff] %vm119_vm4, %v4373_v49 }
 0x142   :  { %141 = vst.msk [vmem:[#allocation2 + $0xa0] sm:$0xff] %vm119_vm4, %v4373_v49 }
 0x143   :  { %v385_v4 = vpop.permute.xlu1 %384  ;;  %143 = vst.msk [vmem:[#allocation2 + $0xb0] sm:$0xff] %vm119_vm4, %v4373_v49 }
 0x144   :  { %v364_v6 = vpop.permute.xlu0 %363  ;;  %145 = vst.msk [vmem:[#allocation2 + $0xc0] sm:$0xff] %vm119_vm4, %v4373_v49 }
 0x145   :  { %v366_v8 = vadd.f32 %v364_v6, %v358_v3  ;;  %147 = vst.msk [vmem:[#allocation2 + $0xd0] sm:$0xff] %vm119_vm4, %v4373_v49 }
 0x146   :  { %149 = vst.msk [vmem:[#allocation2 + $0xe0] sm:$0xff] %vm119_vm4, %v4373_v49 }
 0x147   :  { %v374_v10 = vadd.f32 %v372_v5, %v366_v8  ;;  %151 = vst.msk [vmem:[#allocation2 + $0xf0] sm:$0xff] %vm119_vm4, %v4373_v49 }
 0x148   :  { %153 = vst.msk [vmem:[#allocation2 + $0x100] sm:$0xff] %vm119_vm4, %v4373_v49 }
 0x149   :  { %v377_v12 = vadd.f32 %v376_v27, %v374_v10  ;;  %155 = vst.msk [vmem:[#allocation2 + $0x110] sm:$0xff] %vm119_vm4, %v4373_v49 }
 0x14a   :  { %157 = vst.msk [vmem:[#allocation2 + $0x120] sm:$0xff] %vm119_vm4, %v4373_v49 }
 0x14b   :  { %v397_v14 = vpop.permute.xlu1 %396  ;;  %v387_v15 = vadd.f32 %v385_v4, %v377_v12  ;;  %159 = vst.msk [vmem:[#allocation2 + $0x130] sm:$0xff] %vm119_vm4, %v4373_v49 }
 0x14c   :  { %v399_v21 = vadd.f32 %v397_v14, %v391_v13  ;;  %v393_v22 = vpop.permute.xlu0 %392  ;;  %161 = vst.msk [vmem:[#allocation2 + $0x140] sm:$0xff] %vm119_vm4, %v4373_v49 }
 0x14d   :  { %v395_v23 = vadd.f32 %v393_v22, %v387_v15  ;;  %163 = vst.msk [vmem:[#allocation2 + $0x150] sm:$0xff] %vm119_vm4, %v4373_v49 }
 0x14e   :  { %v405_v25 = vsel %vm404_vm2, %v399_v21, 0.0  ;;  %124 = vst.msk [vmem:[#allocation2 + $0x18] sm:$0x7] %vm121_vm9, %v4373_v49 }
 0x14f   :  { %v406_v26 = vrot.slane %v405_v25, 4  ;;  %v403_v28 = vadd.f32 %v401_v24, %v395_v23  ;;  %132 = vst.msk [vmem:[#allocation2 + $0x58] sm:$0x7] %vm121_vm9, %v4373_v49 }
 0x150   :  { %122 = vst.msk [vmem:[#allocation2 + $0x8] sm:$0x7] %vm121_vm9, %v4373_v49 }
 0x151   :  { %v407_v30 = vadd.f32 %v406_v26, %v405_v25  ;;  %v420_v31 = vsel %vm404_vm2, %v403_v28, 0.0  ;;  %126 = vst.msk [vmem:[#allocation2 + $0x28] sm:$0x7] %vm121_vm9, %v4373_v49 }
 0x152   :  { %v421_v32 = vrot.slane %v420_v31, 4  ;;  %128 = vst.msk [vmem:[#allocation2 + $0x38] sm:$0x7] %vm121_vm9, %v4373_v49 }
 0x153   :  { %v408_v33 = vrot.slane %v407_v30, 2  ;;  %130 = vst.msk [vmem:[#allocation2 + $0x48] sm:$0x7] %vm121_vm9, %v4373_v49 }
 0x154   :  { %v422_v35 = vadd.f32 %v421_v32, %v420_v31  ;;  %134 = vst.msk [vmem:[#allocation2 + $0x68] sm:$0x7] %vm121_vm9, %v4373_v49 }
 0x155   :  { %v409_v27 = vadd.f32 %v408_v33, %v407_v30  ;;  %136 = vst.msk [vmem:[#allocation2 + $0x78] sm:$0x7] %vm121_vm9, %v4373_v49 }
 0x156   :  { %v423_v36 = vrot.slane %v422_v35, 2  ;;  %138 = vst.msk [vmem:[#allocation2 + $0x88] sm:$0x7] %vm121_vm9, %v4373_v49 }
 0x157   :  { %v410_v37 = vrot.slane %v409_v27, 1  ;;  %140 = vst.msk [vmem:[#allocation2 + $0x98] sm:$0x7] %vm121_vm9, %v4373_v49 }
 0x158   :  { %v424_v39 = vadd.f32 %v423_v36, %v422_v35  ;;  %142 = vst.msk [vmem:[#allocation2 + $0xa8] sm:$0x7] %vm121_vm9, %v4373_v49  ;;  %v4636_v36 = vld [vmem:[#allocation2 + $0x18] sm:$0x7] }
 0x159   :  { %v411_v40 = vadd.f32 %v410_v37, %v409_v27  ;;  %144 = vst.msk [vmem:[#allocation2 + $0xb8] sm:$0x7] %vm121_vm9, %v4373_v49  ;;  %v4638_v37 = vld [vmem:[#allocation2 + $0x50] sm:$0xff] }
 0x15a   :  { %v425_v41 = vrot.slane %v424_v39, 1  ;;  %146 = vst.msk [vmem:[#allocation2 + $0xc8] sm:$0x7] %vm121_vm9, %v4373_v49 }
 0x15b   :  { %v419_v42 = vmul.f32 %v418_v38, %v411_v40  ;;  %148 = vst.msk [vmem:[#allocation2 + $0xd8] sm:$0x7] %vm121_vm9, %v4373_v49  ;;  %v769_v40 = vrot.slane %v4636_v36, 1 }
 0x15c   :  { %v426_v43 = vadd.f32 %v425_v41, %v424_v39  ;;  %150 = vst.msk [vmem:[#allocation2 + $0xe8] sm:$0x7] %vm121_vm9, %v4373_v49  ;;  %v768_v39 = vrot.slane %v4633_v34, 1  ;;  %v780_v41 = vrot.slane %v4638_v37, 1 }
 0x15d   :  { %v428_v44 = vmul.f32 %v419_v42, %v419_v42  ;;  %152 = vst.msk [vmem:[#allocation2 + $0xf8] sm:$0x7] %vm121_vm9, %v4373_v49 }
 0x15e   :  { %v427_v45 = vmul.f32 %v426_v43, %v418_v38  ;;  %154 = vst.msk [vmem:[#allocation2 + $0x108] sm:$0x7] %vm121_vm9, %v4373_v49  ;;  %v4640_v38 = vld [vmem:[#allocation2 + $0x58] sm:$0x7] }
 0x15f   :  { %156 = vst.msk [vmem:[#allocation2 + $0x118] sm:$0x7] %vm121_vm9, %v4373_v49 }
 0x160   :  { %v429_v46 = vsub.f32 %v427_v45, %v428_v44  ;;  %158 = vst.msk [vmem:[#allocation2 + $0x128] sm:$0x7] %vm121_vm9, %v4373_v49 }
 0x161   :  { %160 = vst.msk [vmem:[#allocation2 + $0x138] sm:$0x7] %vm121_vm9, %v4373_v49 }
 0x162   :  { %v430_v47 = vmax.f32 %v429_v46, 0.0  ;;  %162 = vst.msk [vmem:[#allocation2 + $0x148] sm:$0x7] %vm121_vm9, %v4373_v49 }
 0x163   :  { %164 = vst.msk [vmem:[#allocation2 + $0x158] sm:$0x7] %vm121_vm9, %v4373_v49  ;;  %vm3318_vm9 = vcmask 97280  }
 0x164   :  { %v432_v48 = vadd.f32 1e-05, %v430_v47  ;;  %v770_v47 = vsel %vm764_vm10, %v768_v39, %v769_v40  ;;  %166 = vst.msk [vmem:[#allocation3] sm:$0xff] %vm165_vm15, %v4373_v49 }
 0x165   :  { %169 = vst.msk [vmem:[#allocation3 + $0x10] sm:$0xff] %vm165_vm15, %v4373_v49 }
 0x166   :  { %4075 = vrsqrt.f32 %v432_v48  ;;  %vm439_vm6 = vweird.f32 %v432_v48  ;;  %171 = vst.msk [vmem:[#allocation3 + $0x20] sm:$0xff] %vm165_vm15, %v4373_v49 }
 0x167   :  { %173 = vst.msk [vmem:[#allocation3 + $0x30] sm:$0xff] %vm165_vm15, %v4373_v49 }
 0x168   :  { %175 = vst.msk [vmem:[#allocation3 + $0x40] sm:$0xff] %vm165_vm15, %v4373_v49 }
 0x169   :  { %177 = vst.msk [vmem:[#allocation3 + $0x50] sm:$0xff] %vm165_vm15, %v4373_v49 }
 0x16a   :  { %179 = vst.msk [vmem:[#allocation3 + $0x60] sm:$0xff] %vm165_vm15, %v4373_v49 }
 0x16b   :  { %181 = vst.msk [vmem:[#allocation3 + $0x70] sm:$0xff] %vm165_vm15, %v4373_v49 }
 0x16c   :  { %v4076_v50 = vpop.eup %4075  ;;  %183 = vst.msk [vmem:[#allocation3 + $0x80] sm:$0xff] %vm165_vm15, %v4373_v49 }
 0x16d   :  { %v434_v51 = vmul.f32 %v4076_v50, %v432_v48  ;;  %vm440_vm5 = vweird.f32 %v4076_v50  ;;  %185 = vst.msk [vmem:[#allocation3 + $0x90] sm:$0xff] %vm165_vm15, %v4373_v49 }
 0x16e   :  { %vm441_vm7 = vmor %vm439_vm6, %vm440_vm5  ;;  %187 = vst.msk [vmem:[#allocation3 + $0xa0] sm:$0xff] %vm165_vm15, %v4373_v49  ;;  %vm2331_vm6 = vcmask 392192  }
 0x16f   :  { %v435_v52 = vmul.f32 %v4076_v50, %v434_v51  ;;  %189 = vst.msk [vmem:[#allocation3 + $0xb0] sm:$0xff] %vm165_vm15, %v4373_v49 }
 0x170   :  { %191 = vst.msk [vmem:[#allocation3 + $0xc0] sm:$0xff] %vm165_vm15, %v4373_v49 }
 0x171   :  { %v436_v53 = vmul.f32 0.5, %v435_v52  ;;  %193 = vst.msk [vmem:[#allocation3 + $0xd0] sm:$0xff] %vm165_vm15, %v4373_v49 }
 0x172   :  { %195 = vst.msk [vmem:[#allocation3 + $0xe0] sm:$0xff] %vm165_vm15, %v4373_v49 }
 0x173   :  { %v437_v54 = vsub.f32 1.5, %v436_v53  ;;  %197 = vst.msk [vmem:[#allocation3 + $0xf0] sm:$0xff] %vm165_vm15, %v4373_v49 }
 0x174   :  { %199 = vst.msk [vmem:[#allocation3 + $0x100] sm:$0xff] %vm165_vm15, %v4373_v49 }
 0x175   :  { %v438_v56 = vmul.f32 %v4076_v50, %v437_v54  ;;  %201 = vst.msk [vmem:[#allocation3 + $0x110] sm:$0xff] %vm165_vm15, %v4373_v49 }
 0x176   :  { %203 = vst.msk [vmem:[#allocation3 + $0x120] sm:$0xff] %vm165_vm15, %v4373_v49 }
 0x177   :  { %v442_v57 = vsel %vm441_vm7, %v4076_v50, %v438_v56  ;;  %205 = vst.msk [vmem:[#allocation3 + $0x130] sm:$0xff] %vm165_vm15, %v4373_v49  ;;  %vm3267_vm7 = vcmask 23552  }
 0x178   :  { %v443_v58 = vmul.f32 %v442_v57, %v431_v55  ;;  %204 = vst.msk [vmem:[#allocation3 + $0x128] sm:$0x3] %vm167_vm0, %v4373_v49 }
 0x179   :  { %168 = vst.msk [vmem:[#allocation3 + $0x8] sm:$0x3] %vm167_vm0, %v4373_v49 }
 0x17a   :  { %v448_v60 = vperm.slane %v443_v58, 0  ;;  %v445_v61 = vmul.f32 %v443_v58, %v419_v42  ;;  %v781_v42 = vrot.slane %v4640_v38, 1  ;;  %170 = vst.msk [vmem:[#allocation3 + $0x18] sm:$0x3] %vm167_vm0, %v4373_v49 }
 0x17b   :  { %172 = vst.msk [vmem:[#allocation3 + $0x28] sm:$0x3] %vm167_vm0, %v4373_v49 }
 0x17c   :  { %505 = vrot.lane.b32.xlu2 %v448_v60, %s4371_s7  ;;  %484 = vrot.lane.b32.xlu1 %v448_v60, %s4367_s12  ;;  %v446_v62 = vsub.f32 %v444_v59, %v445_v61  ;;  %v450_v63 = vmul.f32 %v448_v60, %v4452_v16  ;;  %v526_v1 = vmul.f32 %v448_v60, %v4454_v17 }
 0x17d   :  { %463 = vrot.lane.b32.xlu0 %v448_v60, %s4370_s4  ;;  %v580_v2 = vmul.f32 %v448_v60, %v4462_v18  ;;  %v634_v3 = vmul.f32 %v448_v60, %v4464_v19  ;;  %v782_v48 = vsel %vm764_vm10, %v780_v41, %v781_v42  ;;  %174 = vst.msk [vmem:[#allocation3 + $0x38] sm:$0x3] %vm167_vm0, %v4373_v49 }
 0x17e   :  { %v452_v0 = vperm.slane %v446_v62, 0  ;;  %v3637_v54 = vpack.i.bf16 %v782_v48, %v770_v47  ;;  %176 = vst.msk [vmem:[#allocation3 + $0x48] sm:$0x3] %vm167_vm0, %v4373_v49 }
 0x17f   :  { %178 = vst.msk [vmem:[#allocation3 + $0x58] sm:$0x3] %vm167_vm0, %v4373_v49 }
 0x180   :  { %v454_v4 = vadd.f32 %v452_v0, %v450_v63  ;;  %v527_v5 = vadd.f32 %v526_v1, %v452_v0  ;;  %v581_v6 = vadd.f32 %v580_v2, %v452_v0  ;;  %v635_v7 = vadd.f32 %v634_v3, %v452_v0  ;;  %180 = vst.msk [vmem:[#allocation3 + $0x68] sm:$0x3] %vm167_vm0, %v4373_v49 }
 0x181   :  { %182 = vst.msk [vmem:[#allocation3 + $0x78] sm:$0x3] %vm167_vm0, %v4373_v49 }
 0x182   :  { %v455_v8 = vmax.f32 %v454_v4, 0.0  ;;  %v528_v9 = vmax.f32 %v527_v5, 0.0  ;;  %v582_v10 = vmax.f32 %v581_v6, 0.0  ;;  %v636_v11 = vmax.f32 %v635_v7, 0.0  ;;  %184 = vst.msk [vmem:[#allocation3 + $0x88] sm:$0x3] %vm167_vm0, %v4373_v49 }
 0x183   :  { %186 = vst.msk [vmem:[#allocation3 + $0x98] sm:$0x3] %vm167_vm0, %v4373_v49 }
 0x184   :  { %509 = vrot.lane.b32.xlu2 %v452_v0, %s4371_s7  ;;  %488 = vrot.lane.b32.xlu1 %v452_v0, %s4367_s12  ;;  %461 = vst.msk [vmem:[#allocation2 + $0x22] sm:$0x1] %vm460_vm8, %v455_v8  ;;  %v457_v12 = vrot.slane %v455_v8, 1  ;;  %v530_v13 = vrot.slane %v528_v9, 1  ;;  %v584_v14 = vrot.slane %v582_v10, 1  ;;  %v638_v15 = vrot.slane %v636_v11, 1 }
 0x185   :  { %467 = vrot.lane.b32.xlu0 %v452_v0, %s4370_s4  ;;  %533 = vst.msk [vmem:[#allocation2 + $0x42] sm:$0x1] %vm460_vm8, %v528_v9 }
 0x186   :  { %587 = vst.msk [vmem:[#allocation2 + $0x62] sm:$0x1] %vm460_vm8, %v582_v10  ;;  %v817_v10 = vrot.slane %v4633_v34, 2 }
 0x187   :  { %641 = vst.msk [vmem:[#allocation2 + $0x82] sm:$0x1] %vm460_vm8, %v636_v11  ;;  %v818_v11 = vrot.slane %v4636_v36, 2 }
 0x188   :  { %462 = vst.msk [vmem:[#allocation2 + $0xd2] sm:$0x1] %vm460_vm8, %v457_v12  ;;  %v829_v12 = vrot.slane %v4638_v37, 2 }
 0x189   :  { %534 = vst.msk [vmem:[#allocation2 + $0xf2] sm:$0x1] %vm460_vm8, %v530_v13  ;;  %v830_v13 = vrot.slane %v4640_v38, 2 }
 0x18a   :  { %588 = vst.msk [vmem:[#allocation2 + $0x112] sm:$0x1] %vm460_vm8, %v584_v14 }
 0x18b   :  { %642 = vst.msk [vmem:[#allocation2 + $0x132] sm:$0x1] %vm460_vm8, %v638_v15 }
 0x18c   :  { %188 = vst.msk [vmem:[#allocation3 + $0xa8] sm:$0x3] %vm167_vm0, %v4373_v49 }
 0x18d   :  { %190 = vst.msk [vmem:[#allocation3 + $0xb8] sm:$0x3] %vm167_vm0, %v4373_v49 }
 0x18e   :  { %192 = vst.msk [vmem:[#allocation3 + $0xc8] sm:$0x3] %vm167_vm0, %v4373_v49 }
 0x18f   :  { %194 = vst.msk [vmem:[#allocation3 + $0xd8] sm:$0x3] %vm167_vm0, %v4373_v49 }
 0x190   :  { %196 = vst.msk [vmem:[#allocation3 + $0xe8] sm:$0x3] %vm167_vm0, %v4373_v49 }
 0x191   :  { %198 = vst.msk [vmem:[#allocation3 + $0xf8] sm:$0x3] %vm167_vm0, %v4373_v49 }
 0x192   :  { %200 = vst.msk [vmem:[#allocation3 + $0x108] sm:$0x3] %vm167_vm0, %v4373_v49 }
 0x193   :  { %202 = vst.msk [vmem:[#allocation3 + $0x118] sm:$0x3] %vm167_vm0, %v4373_v49 }
 0x194   :  { %206 = vst.msk [vmem:[#allocation3 + $0x138] sm:$0x3] %vm167_vm0, %v4373_v49 }
 0x1d6   :  { %v506_v20 = vpop.permute.xlu2 %505 }
 0x1d7   :  { %v508_v21 = vmul.f32 %v506_v20, %v4452_v16  ;;  %v565_v25 = vmul.f32 %v506_v20, %v4454_v17  ;;  %v619_v30 = vmul.f32 %v506_v20, %v4462_v18  ;;  %v673_v56 = vmul.f32 %v506_v20, %v4464_v19 }
 0x1de   :  { %v510_v22 = vpop.permute.xlu2 %509 }
 0x1df   :  { %v4597_v23 = vadd.f32 %v510_v22, %v508_v21  ;;  %v4611_v28 = vadd.f32 %v565_v25, %v510_v22  ;;  %v4628_v32 = vadd.f32 %v619_v30, %v510_v22  ;;  %v819_v21 = vsel %vm813_vm11, %v817_v10, %v818_v11  ;;  %v4740_v11 = vld [vmem:[#allocation2] sm:$0xff] }
 0x1e1   :  { %v513_v24 = vmax.f32 %v4597_v23, 0.0  ;;  %v567_v29 = vmax.f32 %v4611_v28, 0.0  ;;  %v621_v27 = vmax.f32 %v4628_v32, 0.0 }
 0x1e3   :  { %v516_v26 = vperm.slane %v513_v24, 0  ;;  %v570_v31 = vperm.slane %v567_v29, 0  ;;  %v624_v43 = vperm.slane %v621_v27, 0 }
 0x1e5   :  { %518 = vrot.lane.b32.xlu2 %v516_v26, %s4370_s4 }
 0x1ed   :  { %572 = vrot.lane.b32.xlu2 %v570_v31, %s4370_s4 }
 0x1ee   :  { %v4631_v33 = vpop.permute.xlu1 %484 }
 0x1ef   :  { %v464_v35 = vpop.permute.xlu0 %463  ;;  %v487_v44 = vmul.f32 %v4631_v33, %v4452_v16  ;;  %v550_v55 = vmul.f32 %v4631_v33, %v4454_v17  ;;  %v604_v1 = vmul.f32 %v4631_v33, %v4462_v18  ;;  %v658_v30 = vmul.f32 %v4631_v33, %v4464_v19 }
 0x1f0   :  { %v466_v46 = vmul.f32 %v464_v35, %v4452_v16  ;;  %v535_v58 = vmul.f32 %v464_v35, %v4454_v17  ;;  %v4660_v16 = vadd.f32 %v673_v56, %v510_v22  ;;  %v589_v2 = vmul.f32 %v464_v35, %v4462_v18  ;;  %v4733_v56 = vld [vmem:[#allocation2 + $0x30] sm:$0xff] }
 0x1f1   :  { %v643_v9 = vmul.f32 %v464_v35, %v4464_v19  ;;  %v831_v22 = vsel %vm813_vm11, %v829_v12, %v830_v13  ;;  %v866_v33 = vrot.slane %v4633_v34, 3 }
 0x1f2   :  { %v675_v0 = vmax.f32 %v4660_v16, 0.0  ;;  %v3642_v26 = vpack.i.bf16 %v831_v22, %v819_v21  ;;  %v689_v21 = vld [vmem:[#allocation2 + $0x8] sm:$0x7] }
 0x1f3   :  { %v3577_v16 = vld [vmem:[#allocation11 + $0x30] sm:$0xff] }
 0x1f4   :  { %v678_v4 = vperm.slane %v675_v0, 0 }
 0x1f5   :  { %626 = vrot.lane.b32.xlu2 %v624_v43, %s4370_s4  ;;  %v867_v43 = vrot.slane %v4636_v36, 3 }
 0x1f6   :  { %v489_v45 = vpop.permute.xlu1 %488 }
 0x1f7   :  { %v468_v50 = vpop.permute.xlu0 %467  ;;  %v491_v51 = vadd.f32 %v489_v45, %v487_v44  ;;  %v4658_v60 = vadd.f32 %v550_v55, %v489_v45  ;;  %v4677_v5 = vadd.f32 %v604_v1, %v489_v45  ;;  %v4706_v31 = vadd.f32 %v658_v30, %v489_v45 }
 0x1f8   :  { %v470_v52 = vadd.f32 %v468_v50, %v466_v46  ;;  %v4662_v62 = vadd.f32 %v535_v58, %v468_v50  ;;  %v4681_v7 = vadd.f32 %v589_v2, %v468_v50  ;;  %v4697_v20 = vadd.f32 %v643_v9, %v468_v50 }
 0x1f9   :  { %v492_v53 = vmax.f32 %v491_v51, 0.0  ;;  %v552_v63 = vmax.f32 %v4658_v60, 0.0  ;;  %v606_v18 = vmax.f32 %v4677_v5, 0.0  ;;  %v660_v39 = vmax.f32 %v4706_v31, 0.0 }
 0x1fa   :  { %v471_v57 = vmax.f32 %v470_v52, 0.0  ;;  %v537_v17 = vmax.f32 %v4662_v62, 0.0  ;;  %v591_v8 = vmax.f32 %v4681_v7, 0.0  ;;  %v645_v25 = vmax.f32 %v4697_v20, 0.0  ;;  %v3591_v20 = vld [vmem:[#allocation11 + $0xa0] sm:$0xff] }
 0x1fb   :  { %v495_v59 = vperm.slane %v492_v53, 0  ;;  %v555_v3 = vperm.slane %v552_v63, 0  ;;  %v609_v14 = vperm.slane %v606_v18, 0  ;;  %v663_v41 = vperm.slane %v660_v39, 0 }
 0x1fc   :  { %v474_v61 = vperm.slane %v471_v57, 0  ;;  %v540_v6 = vperm.slane %v537_v17, 0  ;;  %v594_v15 = vperm.slane %v591_v8, 0  ;;  %v648_v35 = vperm.slane %v645_v25, 0 }
 0x1fd   :  { %497 = vrot.lane.b32.xlu1 %v495_v59, %s4367_s12  ;;  %3638 = vrot.lane.b32.xlu2 %v3637_v54, %s4370_s4  ;;  %v473_v40 = vrot.slane %v471_v57, 1  ;;  %v494_v19 = vrot.slane %v492_v53, 1  ;;  %v878_v44 = vrot.slane %v4638_v37, 3  ;;  %v879_v45 = vrot.slane %v4640_v38, 3  ;;  %v695_v57 = vld [vmem:[#allocation2 + $0x38] sm:$0x7] }
 0x1fe   :  { %476 = vrot.lane.b32.xlu0 %v474_v61, %s4371_s7  ;;  %v868_v46 = vsel %vm862_vm12, %v866_v33, %v867_v43  ;;  %v774_v59 = vrot.slane %v4733_v56, 1  ;;  %v775_v61 = vrot.slane %v695_v57, 1  ;;  %v823_v1 = vrot.slane %v4733_v56, 2 }
 0x1ff   :  { %v475_v42 = vperm.slane %v473_v40, 0  ;;  %v880_v47 = vsel %vm862_vm12, %v878_v44, %v879_v45  ;;  %v496_v50 = vperm.slane %v494_v19, 0  ;;  %v824_v2 = vrot.slane %v695_v57, 2 }
 0x200   :  { %v3647_v48 = vpack.i.bf16 %v880_v47, %v868_v46  ;;  %v776_v13 = vsel %vm764_vm10, %v774_v59, %v775_v61  ;;  %v872_v30 = vrot.slane %v4733_v56, 3  ;;  %v815_v19 = vrot.slane %v689_v21, 2 }
 0x201   :  { %v765_v44 = vrot.slane %v4740_v11, 1  ;;  %v766_v45 = vrot.slane %v689_v21, 1  ;;  %v647_v31 = vrot.slane %v645_v25, 1  ;;  %v3601_v25 = vld [vmem:[#allocation11 + $0xf0] sm:$0xff] }
 0x205   :  { %557 = vrot.lane.b32.xlu1 %v555_v3, %s4367_s12  ;;  %680 = vrot.lane.b32.xlu2 %v678_v4, %s4370_s4 }
 0x206   :  { %542 = vrot.lane.b32.xlu0 %v540_v6, %s4371_s7 }
 0x20d   :  { %611 = vrot.lane.b32.xlu1 %v609_v14, %s4367_s12  ;;  %3648 = vrot.lane.b32.xlu2 %v3647_v48, %s4371_s7 }
 0x20e   :  { %596 = vrot.lane.b32.xlu0 %v594_v15, %s4371_s7  ;;  %v825_v15 = vsel %vm813_vm11, %v823_v1, %v824_v2 }
 0x215   :  { %3643 = vrot.lane.b32.xlu1 %v3642_v26, %s4367_s12 }
 0x216   :  { %650 = vrot.lane.b32.xlu0 %v648_v35, %s4371_s7  ;;  %v873_v35 = vrot.slane %v695_v57, 3  ;;  %v767_v57 = vsel %vm764_vm10, %v765_v44, %v766_v45  ;;  %v539_v45 = vrot.slane %v537_v17, 1 }
 0x21d   :  { %665 = vrot.lane.b32.xlu1 %v663_v41, %s4367_s12 }
 0x21e   :  { %478 = vrot.lane.b32.xlu0 %v475_v42, %s4371_s7  ;;  %v814_v42 = vrot.slane %v4740_v11, 2 }
 0x225   :  { %499 = vrot.lane.b32.xlu1 %v496_v50, %s4367_s12  ;;  %v874_v50 = vsel %vm862_vm12, %v872_v30, %v873_v35  ;;  %v4783_v35 = vld [vmem:[#allocation2 + $0x70] sm:$0xff] }
 0x226   :  { %v884_v17 = vrot.slane %v4783_v35, 3 }
 0x23f   :  { %v519_v51 = vpop.permute.xlu2 %518 }
 0x240   :  { %524 = vst.msk [vmem:[#allocation2 + $0x28] sm:$0x1] %vm460_vm8, %v519_v51 }
 0x247   :  { %v573_v52 = vpop.permute.xlu2 %572  ;;  %v693_v58 = vld [vmem:[#allocation2 + $0x28] sm:$0x7] }
 0x248   :  { %578 = vst.msk [vmem:[#allocation2 + $0x48] sm:$0x1] %vm460_vm8, %v573_v52  ;;  %v772_v9 = vrot.slane %v693_v58, 1  ;;  %v821_v10 = vrot.slane %v693_v58, 2  ;;  %v870_v47 = vrot.slane %v693_v58, 3  ;;  %v816_v52 = vsel %vm813_vm11, %v814_v42, %v815_v19 }
 0x24f   :  { %v627_v36 = vpop.permute.xlu2 %626  ;;  %v697_v43 = vld [vmem:[#allocation2 + $0x48] sm:$0x7] }
 0x250   :  { %632 = vst.msk [vmem:[#allocation2 + $0x68] sm:$0x1] %vm460_vm8, %v627_v36  ;;  %v827_v36 = vrot.slane %v697_v43, 2 }
 0x257   :  { %v4728_v38 = vpop.permute.xlu2 %3638  ;;  %v701_v19 = vld [vmem:[#allocation2 + $0x68] sm:$0x7] }
 0x25f   :  { %v681_v53 = vpop.permute.xlu2 %680 }
 0x260   :  { %686 = vst.msk [vmem:[#allocation2 + $0x88] sm:$0x1] %vm460_vm8, %v681_v53  ;;  %v778_v53 = vrot.slane %v697_v43, 1 }
 0x267   :  { %v705_v5 = vld [vmem:[#allocation2 + $0x88] sm:$0x7] }
 0x268   :  { %v916_v32 = vrot.slane %v705_v5, 1 }
 0x26f   :  { %v498_v54 = vpop.permute.xlu1 %497 }
 0x270   :  { %503 = vst.msk [vmem:[#allocation2 + $0x26] sm:$0x1] %vm460_vm8, %v498_v54  ;;  %v477_v55 = vpop.permute.xlu0 %476 }
 0x271   :  { %482 = vst.msk [vmem:[#allocation2 + $0x24] sm:$0x1] %vm460_vm8, %v477_v55 }
 0x277   :  { %v558_v3 = vpop.permute.xlu1 %557 }
 0x278   :  { %563 = vst.msk [vmem:[#allocation2 + $0x46] sm:$0x1] %vm460_vm8, %v558_v3  ;;  %v543_v4 = vpop.permute.xlu0 %542  ;;  %v4738_v6 = vld [vmem:[#allocation2 + $0x20] sm:$0xff] }
 0x279   :  { %548 = vst.msk [vmem:[#allocation2 + $0x44] sm:$0x1] %vm460_vm8, %v543_v4  ;;  %v771_v12 = vrot.slane %v4738_v6, 1  ;;  %v820_v14 = vrot.slane %v4738_v6, 2  ;;  %v869_v33 = vrot.slane %v4738_v6, 3  ;;  %v863_v4 = vrot.slane %v4740_v11, 3 }
 0x27b   :  { %v773_v22 = vsel %vm764_vm10, %v771_v12, %v772_v9  ;;  %v822_v26 = vsel %vm813_vm11, %v820_v14, %v821_v10  ;;  %v871_v54 = vsel %vm862_vm12, %v869_v33, %v870_v47  ;;  %v864_v9 = vrot.slane %v689_v21, 3 }
 0x27c   :  { %v3652_v40 = vpack.i.bf16 %v776_v13, %v773_v22  ;;  %v3657_v41 = vpack.i.bf16 %v825_v15, %v822_v26  ;;  %v3667_v1 = vpack.i.bf16 %v874_v50, %v871_v54  ;;  %v876_v13 = vrot.slane %v697_v43, 3 }
 0x27d   :  { %v554_v15 = vrot.slane %v552_v63, 1  ;;  %v865_v22 = vsel %vm862_vm12, %v863_v4, %v864_v9  ;;  %v515_v26 = vrot.slane %v513_v24, 1  ;;  %v835_v63 = vrot.slane %v4783_v35, 2 }
 0x27e   :  { %3653 = vrot.lane.b32.xlu0 %v3652_v40, %s4370_s4  ;;  %3658 = vrot.lane.b32.xlu1 %v3657_v41, %s4367_s12  ;;  %v703_v40 = vld [vmem:[#allocation2 + $0x78] sm:$0x7]  ;;  %v833_v24 = vrot.slane %v701_v19, 2  ;;  %v541_v50 = vperm.slane %v539_v45, 0  ;;  %v786_v54 = vrot.slane %v4783_v35, 1 }
 0x27f   :  { %v612_v46 = vpop.permute.xlu1 %611  ;;  %v556_v42 = vperm.slane %v554_v15, 0  ;;  %v517_v33 = vperm.slane %v515_v26, 0  ;;  %v836_v43 = vrot.slane %v703_v40, 2 }
 0x280   :  { %617 = vst.msk [vmem:[#allocation2 + $0x66] sm:$0x1] %vm460_vm8, %v612_v46  ;;  %v597_v48 = vpop.permute.xlu0 %596  ;;  %v4757_v51 = vld [vmem:[#allocation2 + $0x40] sm:$0xff] }
 0x281   :  { %602 = vst.msk [vmem:[#allocation2 + $0x64] sm:$0x1] %vm460_vm8, %v597_v48  ;;  %v826_v55 = vrot.slane %v4757_v51, 2  ;;  %v777_v58 = vrot.slane %v4757_v51, 1  ;;  %v875_v10 = vrot.slane %v4757_v51, 3  ;;  %v837_v47 = vsel %vm813_vm11, %v835_v63, %v836_v43 }
 0x282   :  { %v569_v48 = vrot.slane %v567_v29, 1  ;;  %v784_v29 = vrot.slane %v701_v19, 1 }
 0x283   :  { %v828_v59 = vsel %vm813_vm11, %v826_v55, %v827_v36  ;;  %v779_v61 = vsel %vm764_vm10, %v777_v58, %v778_v53  ;;  %v877_v21 = vsel %vm862_vm12, %v875_v10, %v876_v13  ;;  %v787_v55 = vrot.slane %v703_v40, 1  ;;  %v3586_v58 = vld [vmem:[#allocation11 + $0x78] sm:$0xff] }
 0x284   :  { %v3672_v2 = vpack.i.bf16 %v816_v52, %v828_v59  ;;  %v3662_v3 = vpack.i.bf16 %v767_v57, %v779_v61  ;;  %v3677_v41 = vpack.i.bf16 %v865_v22, %v877_v21  ;;  %v571_v36 = vperm.slane %v569_v48, 0  ;;  %v3594_v59 = vld [vmem:[#allocation11 + $0xb8] sm:$0xff]  ;;  %1568 = vmatpush.bf16.msrb.mxu1 %v3586_v58  ;;  %v3584_v58 = vld [vmem:[#allocation11 + $0x68] sm:$0xff] }
 0x285   :  { %v885_v57 = vrot.slane %v703_v40, 3  ;;  %v608_v61 = vrot.slane %v606_v18, 1  ;;  %1617 = vmatpush.bf16.msrb.mxu2 %v3594_v59  ;;  %v4814_v13 = vld [vmem:[#allocation2 + $0x90] sm:$0xff]  ;;  %v3592_v59 = vld [vmem:[#allocation11 + $0xa8] sm:$0xff] }
 0x286   :  { %3668 = vrot.lane.b32.xlu0 %v3667_v1, %s4371_s7  ;;  %3673 = vrot.lane.b32.xlu1 %v3672_v2, %s4367_s12  ;;  %v882_v1 = vrot.slane %v701_v19, 3  ;;  %v943_v26 = vrot.slane %v4814_v13, 2 }
 0x287   :  { %3663 = vrot.lane.b32.xlu2 %v3662_v3, %s4370_s4  ;;  %v4772_v12 = vpop.permute.xlu1 %3643  ;;  %v788_v3 = vsel %vm764_vm10, %v786_v54, %v787_v55  ;;  %v886_v9 = vsel %vm862_vm12, %v884_v17, %v885_v57  ;;  %v610_v22 = vperm.slane %v608_v61, 0  ;;  %v3585_v57 = vld [vmem:[#allocation11 + $0x70] sm:$0xff]  ;;  %v3602_v61 = vld [vmem:[#allocation11 + $0xf8] sm:$0xff] }
 0x288   :  { %v651_v14 = vpop.permute.xlu0 %650  ;;  %v4781_v30 = vld [vmem:[#allocation2 + $0x60] sm:$0xff]  ;;  %1569 = vmatpush.bf16.msrb.mxu1 %v3585_v57  ;;  %1666 = vmatpush.bf16.msrb.mxu3 %v3602_v61 }
 0x289   :  { %656 = vst.msk [vmem:[#allocation2 + $0x84] sm:$0x1] %vm460_vm8, %v651_v14  ;;  %v832_v60 = vrot.slane %v4781_v30, 2  ;;  %v783_v53 = vrot.slane %v4781_v30, 1  ;;  %v881_v62 = vrot.slane %v4781_v30, 3 }
 0x28a   :  { %v707_v14 = vld [vmem:[#allocation2 + $0x98] sm:$0x7] }
 0x28b   :  { %v834_v46 = vsel %vm813_vm11, %v832_v60, %v833_v24  ;;  %v785_v2 = vsel %vm764_vm10, %v783_v53, %v784_v29  ;;  %v883_v4 = vsel %vm862_vm12, %v881_v62, %v882_v1  ;;  %v944_v40 = vrot.slane %v707_v14, 2  ;;  %v3578_v29 = vld [vmem:[#allocation11 + $0x38] sm:$0xff]  ;;  %v3576_v1 = vld [vmem:[#allocation11 + $0x28] sm:$0xff] }
 0x28c   :  { %v3687_v52 = vpack.i.bf16 %v837_v47, %v834_v46  ;;  %v3682_v15 = vpack.i.bf16 %v788_v3, %v785_v2  ;;  %v3692_v18 = vpack.i.bf16 %v886_v9, %v883_v4  ;;  %v623_v60 = vrot.slane %v621_v27, 1  ;;  %1519 = vmatpush.bf16.msrb.mxu0 %v3578_v29  ;;  %1570 = vmatpush.bf16.msrb.mxu1 %v3584_v58  ;;  %v3582_v2 = vld [vmem:[#allocation11 + $0x58] sm:$0xff]  ;;  %v3600_v4 = vld [vmem:[#allocation11 + $0xe8] sm:$0xff]  ;;  %v3575_v9 = vld [vmem:[#allocation11 + $0x20] sm:$0xff] }
 0x28d   :  { %v938_v45 = vrot.slane %v707_v14, 1  ;;  %v950_v46 = vrot.slane %v707_v14, 3  ;;  %v662_v27 = vrot.slane %v660_v39, 1  ;;  %v928_v47 = vrot.slane %v705_v5, 3  ;;  %v3590_v3 = vld [vmem:[#allocation11 + $0x98] sm:$0xff]  ;;  %1667 = vmatpush.bf16.msrb.mxu3 %v3601_v25  ;;  %v3581_v14 = vld [vmem:[#allocation11 + $0x50] sm:$0xff] }
 0x28e   :  { %3678 = vrot.lane.b32.xlu0 %v3677_v41, %s4371_s7  ;;  %559 = vrot.lane.b32.xlu1 %v556_v42, %s4367_s12  ;;  %v922_v41 = vrot.slane %v705_v5, 2  ;;  %v593_v42 = vrot.slane %v591_v8, 1  ;;  %v949_v8 = vrot.slane %v4814_v13, 3  ;;  %v677_v39 = vrot.slane %v675_v0, 1  ;;  %v3583_v0 = vld [vmem:[#allocation11 + $0x60] sm:$0xff]  ;;  %v3574_v5 = vld [vmem:[#allocation11 + $0x18] sm:$0xff] }
 0x28f   :  { %520 = vrot.lane.b32.xlu2 %v517_v33, %s4370_s4  ;;  %v666_v23 = vpop.permute.xlu1 %665  ;;  %v945_v33 = vsel %vm813_vm11, %v943_v26, %v944_v40  ;;  %v664_v54 = vperm.slane %v662_v27, 0  ;;  %v649_v62 = vperm.slane %v647_v31, 0  ;;  %v3598_v26 = vld [vmem:[#allocation11 + $0xd8] sm:$0xff]  ;;  %v4849_v40 = vpop.permute.xlu2 %3648 }
 0x290   :  { %v479_v44 = vpop.permute.xlu0 %478  ;;  %671 = vst.msk [vmem:[#allocation2 + $0x86] sm:$0x1] %vm460_vm8, %v666_v23  ;;  %v595_v63 = vperm.slane %v593_v42, 0  ;;  %v625_v23 = vperm.slane %v623_v60, 0  ;;  %v679_v17 = vperm.slane %v677_v39, 0  ;;  %1520 = vmatpush.bf16.msrb.mxu0 %v3577_v16  ;;  %1571 = vmatpush.bf16.msrb.mxu1 %v3583_v0  ;;  %v3579_v42 = vld [vmem:[#allocation11 + $0x40] sm:$0xff] }
 0x291   :  { %483 = vst.msk [vmem:[#allocation2 + $0xd4] sm:$0x1] %vm460_vm8, %v479_v44  ;;  %v937_v44 = vrot.slane %v4814_v13, 1  ;;  %1668 = vmatpush.bf16.msrb.mxu3 %v3600_v4  ;;  %v3572_v60 = vld [vmem:[#allocation11 + $0x8] sm:$0xff] }
 0x294   :  { %1521 = vmatpush.bf16.msrb.mxu0 %v3576_v1  ;;  %1572 = vmatpush.bf16.msrb.mxu1 %v3582_v2 }
 0x296   :  { %544 = vrot.lane.b32.xlu0 %v541_v50, %s4371_s7  ;;  %3688 = vrot.lane.b32.xlu1 %v3687_v52, %s4367_s12  ;;  %v939_v50 = vsel %vm764_vm10, %v937_v44, %v938_v45  ;;  %v4854_v45 = vld [vmem:[#allocation2 + $0xa0] sm:$0xff] }
 0x297   :  { %574 = vrot.lane.b32.xlu2 %v571_v36, %s4370_s4  ;;  %v500_v28 = vpop.permute.xlu1 %499  ;;  %v4812_v10 = vld [vmem:[#allocation2 + $0x80] sm:$0xff]  ;;  %v951_v36 = vsel %vm862_vm12, %v949_v8, %v950_v46  ;;  %v971_v8 = vrot.slane %v4854_v45, 3  ;;  %v965_v27 = vrot.slane %v4854_v45, 2 }
 0x298   :  { %504 = vst.msk [vmem:[#allocation2 + $0xd6] sm:$0x1] %vm460_vm8, %v500_v28  ;;  %v921_v21 = vrot.slane %v4812_v10, 2  ;;  %v915_v24 = vrot.slane %v4812_v10, 1  ;;  %v927_v7 = vrot.slane %v4812_v10, 3  ;;  %v3593_v28 = vld [vmem:[#allocation11 + $0xb0] sm:$0xff]  ;;  %1522 = vmatpush.bf16.msrb.mxu0 %v3575_v9  ;;  %1573 = vmatpush.bf16.msrb.mxu1 %v3581_v14 }
 0x299   :  { %1618 = vmatpush.bf16.msrb.mxu2 %v3593_v28 }
 0x29a   :  { %v923_v19 = vsel %vm813_vm11, %v921_v21, %v922_v41  ;;  %v917_v48 = vsel %vm764_vm10, %v915_v24, %v916_v32  ;;  %v929_v52 = vsel %vm862_vm12, %v927_v7, %v928_v47  ;;  %v3588_v21 = vld [vmem:[#allocation11 + $0x88] sm:$0xff]  ;;  %v3573_v41 = vld [vmem:[#allocation11 + $0x10] sm:$0xff]  ;;  %v3595_v24 = vld [vmem:[#allocation11 + $0xc0] sm:$0xff] }
 0x29b   :  { %v3702_v43 = vpack.i.bf16 %v945_v33, %v923_v19  ;;  %v3697_v53 = vpack.i.bf16 %v939_v50, %v917_v48  ;;  %v3707_v55 = vpack.i.bf16 %v951_v36, %v929_v52  ;;  %v3587_v19 = vld [vmem:[#allocation11 + $0x80] sm:$0xff]  ;;  %v3597_v33 = vld [vmem:[#allocation11 + $0xd0] sm:$0xff]  ;;  %v959_v48 = vrot.slane %v4854_v45, 1 }
 0x29c   :  { %1523 = vmatpush.bf16.msrb.mxu0 %v3574_v5  ;;  %v709_v7 = vld [vmem:[#allocation2 + $0xa8] sm:$0x7]  ;;  %v3640_v52 = vunpack.i.l.bf16 %v4728_v38 }
 0x29d   :  { %1619 = vmatpush.bf16.msrb.mxu2 %v3592_v59  ;;  %v972_v46 = vrot.slane %v709_v7, 3  ;;  %v966_v47 = vrot.slane %v709_v7, 2  ;;  %v960_v50 = vrot.slane %v709_v7, 1 }
 0x29e   :  { %3683 = vrot.lane.b32.xlu0 %v3682_v15, %s4370_s4  ;;  %613 = vrot.lane.b32.xlu1 %v610_v22, %s4367_s12  ;;  %v3589_v15 = vld [vmem:[#allocation11 + $0x90] sm:$0xff]  ;;  %v3599_v22 = vld [vmem:[#allocation11 + $0xe0] sm:$0xff]  ;;  %v1176_v0 = vsel %vm119_vm4, %v4633_v34, %v3640_v52 }
 0x29f   :  { %3693 = vrot.lane.b32.xlu2 %v3692_v18, %s4371_s7  ;;  %1669 = vmatpush.bf16.msrb.mxu3 %v3599_v22  ;;  %v3580_v18 = vld [vmem:[#allocation11 + $0x48] sm:$0xff]  ;;  %v4857_v32 = vld [vmem:[#allocation2 + $0xd0] sm:$0xff]  ;;  %v973_v39 = vsel %vm862_vm12, %v971_v8, %v972_v46  ;;  %v967_v28 = vsel %vm813_vm11, %v965_v27, %v966_v47  ;;  %v961_v16 = vsel %vm764_vm10, %v959_v48, %v960_v50  ;;  %v3650_v22 = vunpack.i.l.bf16 %v4849_v40 }
 0x2a0   :  { %1574 = vmatpush.bf16.msrb.mxu1 %v3580_v18  ;;  %1524 = vmatpush.bf16.msrb.mxu0 %v3573_v41  ;;  %v893_v31 = vrot.slane %v4857_v32, 3  ;;  %v795_v61 = vrot.slane %v4857_v32, 1  ;;  %v3641_v27 = vunpack.i.h.bf16 %v4728_v38 }
 0x2a1   :  { %1620 = vmatpush.bf16.msrb.mxu2 %v3591_v20  ;;  %v3645_v20 = vunpack.i.l.bf16 %v4772_v12 }
 0x2a3   :  { %1670 = vmatpush.bf16.msrb.mxu3 %v3598_v26  ;;  %v1193_v26 = vsel %vm1191_vm13, %v1176_v0, %v3645_v20 }
 0x2a4   :  { %1575 = vmatpush.bf16.msrb.mxu1 %v3579_v42  ;;  %1525 = vmatpush.bf16.msrb.mxu0 %v3572_v60 }
 0x2a5   :  { %1621 = vmatpush.bf16.msrb.mxu2 %v3590_v3 }
 0x2a6   :  { %598 = vrot.lane.b32.xlu0 %v595_v63, %s4371_s7  ;;  %3703 = vrot.lane.b32.xlu1 %v3702_v43, %s4367_s12  ;;  %v3596_v63 = vld [vmem:[#allocation11 + $0xc8] sm:$0xff] }
 0x2a7   :  { %628 = vrot.lane.b32.xlu2 %v625_v23, %s4370_s4  ;;  %1671 = vmatpush.bf16.msrb.mxu3 %v3597_v33  ;;  %v3571_v23 = vld [vmem:[#allocation11] sm:$0xff] }
 0x2a8   :  { %1526 = vmatpush.bf16.msrb.mxu0 %v3571_v23 }
 0x2a9   :  { %1622 = vmatpush.bf16.msrb.mxu2 %v3589_v15 }
 0x2ab   :  { %1672 = vmatpush.bf16.msrb.mxu3 %v3596_v63 }
 0x2ad   :  { %1623 = vmatpush.bf16.msrb.mxu2 %v3588_v21 }
 0x2ae   :  { %3698 = vrot.lane.b32.xlu0 %v3697_v53, %s4370_s4  ;;  %667 = vrot.lane.b32.xlu1 %v664_v54, %s4367_s12 }
 0x2af   :  { %3708 = vrot.lane.b32.xlu2 %v3707_v55, %s4371_s7  ;;  %1673 = vmatpush.bf16.msrb.mxu3 %v3595_v24 }
 0x2b1   :  { %1624 = vmatpush.bf16.msrb.mxu2 %v3587_v19 }
 0x2b6   :  { %652 = vrot.lane.b32.xlu0 %v649_v62, %s4371_s7  ;;  %v844_v62 = vrot.slane %v4857_v32, 2 }
 0x2b7   :  { %682 = vrot.lane.b32.xlu2 %v679_v17, %s4370_s4 }
 0x2e1   :  { %v4851_v43 = vpop.permute.xlu2 %3663 }
 0x2e2   :  { %v3665_v7 = vunpack.i.l.bf16 %v4851_v43 }
 0x2e4   :  { %v1179_v52 = vsel %vm119_vm4, %v4757_v51, %v3665_v7  ;;  %v1180_v51 = vsel %vm119_vm4, %v4638_v37, %v3641_v27 }
 0x2e9   :  { %v521_v44 = vpop.permute.xlu2 %520 }
 0x2ea   :  { %525 = vst.msk [vmem:[#allocation2 + $0xd8] sm:$0x1] %vm460_vm8, %v521_v44  ;;  %v3666_v44 = vunpack.i.h.bf16 %v4851_v43 }
 0x2ec   :  { %v1175_v50 = vsel %vm119_vm4, %v4740_v11, %v3666_v44  ;;  %v3646_v11 = vunpack.i.h.bf16 %v4772_v12 }
 0x2f0   :  { %v3654_v36 = vpop.permute.xlu0 %3653  ;;  %v3659_v53 = vpop.permute.xlu1 %3658 }
 0x2f1   :  { %v575_v54 = vpop.permute.xlu2 %574  ;;  %v715_v55 = vld [vmem:[#allocation2 + $0xd8] sm:$0x7]  ;;  %v3656_v58 = vunpack.i.h.bf16 %v3654_v36  ;;  %v3655_v59 = vunpack.i.l.bf16 %v3654_v36  ;;  %v3661_v9 = vunpack.i.h.bf16 %v3659_v53  ;;  %v3660_v14 = vunpack.i.l.bf16 %v3659_v53 }
 0x2f2   :  { %579 = vst.msk [vmem:[#allocation2 + $0xf8] sm:$0x1] %vm460_vm8, %v575_v54  ;;  %v894_v17 = vrot.slane %v715_v55, 3  ;;  %v845_v57 = vrot.slane %v715_v55, 2  ;;  %v796_v29 = vrot.slane %v715_v55, 1 }
 0x2f3   :  { %v1178_v5 = vsel %vm119_vm4, %v4733_v56, %v3656_v58  ;;  %v1177_v34 = vsel %vm119_vm4, %v4738_v6, %v3655_v59  ;;  %v1210_v6 = vsel %vm1208_vm14, %v1193_v26, %v3650_v22  ;;  %v1197_v59 = vsel %vm1191_vm13, %v1180_v51, %v3646_v11 }
 0x2f4   :  { %v895_v25 = vsel %vm862_vm12, %v893_v31, %v894_v17  ;;  %v846_v1 = vsel %vm813_vm11, %v844_v62, %v845_v57  ;;  %v797_v4 = vsel %vm764_vm10, %v795_v61, %v796_v29  ;;  %v1195_v56 = vsel %vm1191_vm13, %v1178_v5, %v3661_v9  ;;  %v4910_v17 = vld [vmem:[#allocation2 + $0xe0] sm:$0xff]  ;;  %v717_v57 = vld [vmem:[#allocation2 + $0xe8] sm:$0x7] }
 0x2f5   :  { %v3722_v2 = vpack.i.bf16 %v895_v25, %v973_v39  ;;  %v3717_v3 = vpack.i.bf16 %v846_v1, %v967_v28  ;;  %v3712_v15 = vpack.i.bf16 %v797_v4, %v961_v16  ;;  %v1194_v33 = vsel %vm1191_vm13, %v1177_v34, %v3660_v14  ;;  %v711_v4 = vld [vmem:[#allocation2 + $0xb8] sm:$0x7]  ;;  %v4927_v9 = vld [vmem:[#allocation2 + $0xc0] sm:$0xff]  ;;  %v713_v14 = vld [vmem:[#allocation2 + $0xc8] sm:$0x7] }
 0x2f6   :  { %v3651_v28 = vunpack.i.h.bf16 %v4849_v40  ;;  %v896_v61 = vrot.slane %v4910_v17, 3  ;;  %v897_v16 = vrot.slane %v717_v57, 3  ;;  %v847_v37 = vrot.slane %v4910_v17, 2 }
 0x2f7   :  { %3723 = vrot.lane.b32.xlu2 %v3722_v2, %s4371_s7  ;;  %3718 = vrot.lane.b32.xlu1 %v3717_v3, %s4367_s12  ;;  %v848_v0 = vrot.slane %v717_v57, 2  ;;  %v798_v25 = vrot.slane %v4910_v17, 1  ;;  %v799_v1 = vrot.slane %v717_v57, 1  ;;  %v4923_v2 = vld [vmem:[#allocation2 + $0xb0] sm:$0xff]  ;;  %v839_v44 = vrot.slane %v711_v4, 2 }
 0x2f8   :  { %3713 = vrot.lane.b32.xlu0 %v3712_v15, %s4370_s4  ;;  %v3669_v18 = vpop.permute.xlu0 %3668  ;;  %v3674_v21 = vpop.permute.xlu1 %3673  ;;  %v1214_v40 = vsel %vm1208_vm14, %v1197_v59, %v3651_v28  ;;  %v898_v22 = vsel %vm862_vm12, %v896_v61, %v897_v16  ;;  %v841_v7 = vrot.slane %v4927_v9, 2  ;;  %v793_v11 = vrot.slane %v713_v14, 1 }
 0x2f9   :  { %v3671_v41 = vunpack.i.h.bf16 %v3669_v18  ;;  %v3670_v42 = vunpack.i.l.bf16 %v3669_v18  ;;  %v4884_v19 = vpop.permute.xlu2 %3693  ;;  %v3676_v8 = vunpack.i.h.bf16 %v3674_v21  ;;  %v3675_v46 = vunpack.i.l.bf16 %v3674_v21  ;;  %v719_v20 = vld [vmem:[#allocation2 + $0xf8] sm:$0x7] }
 0x2fa   :  { %v3695_v15 = vunpack.i.l.bf16 %v4884_v19  ;;  %v900_v5 = vrot.slane %v719_v20, 3  ;;  %v849_v34 = vsel %vm813_vm11, %v847_v37, %v848_v0  ;;  %v851_v18 = vrot.slane %v719_v20, 2 }
 0x2fb   :  { %v1211_v60 = vsel %vm1208_vm14, %v1194_v33, %v3670_v42  ;;  %v1212_v63 = vsel %vm1208_vm14, %v1195_v56, %v3671_v41  ;;  %v1192_v54 = vsel %vm1191_vm13, %v1175_v50, %v3676_v8  ;;  %v1196_v55 = vsel %vm1191_vm13, %v1179_v52, %v3675_v46 }
 0x2fc   :  { %v1244_v23 = vpack.c.bf16 %v1211_v60, %v1210_v6  ;;  %v4891_v24 = vpack.c.bf16 %v1212_v63, %v1211_v60  ;;  %v800_v21 = vsel %vm764_vm10, %v798_v25, %v799_v1  ;;  %v802_v26 = vrot.slane %v719_v20, 1 }
 0x2fd   :  { %v887_v41 = vrot.slane %v4923_v2, 3  ;;  %v888_v42 = vrot.slane %v711_v4, 3  ;;  %v890_v56 = vrot.slane %v4927_v9, 3  ;;  %v891_v33 = vrot.slane %v713_v14, 3 }
 0x2fe   :  { %1576 = vmatmul.bf16.vlgmr.msrb.gmra.mxu1 %v1244_v23  ;;  %1625 = vmatmul.bf16.vlgmr.msrb.gmra.mxu2 %v4891_v24  ;;  %v842_v8 = vrot.slane %v713_v14, 2  ;;  %v789_v46 = vrot.slane %v4923_v2, 1  ;;  %v721_v14 = vld [vmem:[#allocation2 + $0x108] sm:$0x7] }
 0x2ff   :  { %v889_v16 = vsel %vm862_vm12, %v887_v41, %v888_v42  ;;  %v892_v37 = vsel %vm862_vm12, %v890_v56, %v891_v33  ;;  %v854_v41 = vrot.slane %v721_v14, 2  ;;  %v805_v33 = vrot.slane %v721_v14, 1 }
 0x300   :  { %v3679_v47 = vpop.permute.xlu0 %3678  ;;  %v560_v48 = vpop.permute.xlu1 %559  ;;  %v843_v0 = vsel %vm813_vm11, %v841_v7, %v842_v8 }
 0x301   :  { %v3681_v36 = vunpack.i.h.bf16 %v3679_v47  ;;  %v3680_v53 = vunpack.i.l.bf16 %v3679_v47  ;;  %564 = vst.msk [vmem:[#allocation2 + $0xf6] sm:$0x1] %vm460_vm8, %v560_v48  ;;  %v629_v43 = vpop.permute.xlu2 %628 }
 0x302   :  { %633 = vst.msk [vmem:[#allocation2 + $0x118] sm:$0x1] %vm460_vm8, %v629_v43  ;;  %v790_v43 = vrot.slane %v711_v4, 1  ;;  %v3696_v4 = vunpack.i.h.bf16 %v4884_v19 }
 0x303   :  { %v1209_v38 = vsel %vm1208_vm14, %v1192_v54, %v3681_v36  ;;  %v1213_v31 = vsel %vm1208_vm14, %v1196_v55, %v3680_v53  ;;  %v792_v54 = vrot.slane %v4927_v9, 1 }
 0x304   :  { %v1243_v39 = vpack.c.bf16 %v1210_v6, %v1209_v38  ;;  %v1246_v62 = vpack.c.bf16 %v1213_v31, %v1212_v63  ;;  %v4925_v3 = vpack.c.bf16 %v1214_v40, %v1213_v31  ;;  %v838_v6 = vrot.slane %v4923_v2, 2 }
 0x305   :  { %v794_v1 = vsel %vm764_vm10, %v792_v54, %v793_v11 }
 0x306   :  { %1527 = vmatmul.bf16.vlgmr.msrb.gmra.mxu0 %v1243_v39  ;;  %1674 = vmatmul.bf16.vlgmr.msrb.gmra.mxu3 %v1246_v62 }
 0x308   :  { %v545_v29 = vpop.permute.xlu0 %544  ;;  %v4913_v58 = vpop.permute.xlu1 %3688 }
 0x309   :  { %549 = vst.msk [vmem:[#allocation2 + $0xf4] sm:$0x1] %vm460_vm8, %v545_v29  ;;  %v4917_v12 = vpop.permute.xlu2 %3708  ;;  %v3690_v36 = vunpack.i.l.bf16 %v4913_v58  ;;  %v3691_v61 = vunpack.i.h.bf16 %v4913_v58  ;;  %v791_v58 = vsel %vm764_vm10, %v789_v46, %v790_v43  ;;  %v723_v42 = vld [vmem:[#allocation2 + $0x118] sm:$0x7] }
 0x30a   :  { %v906_v7 = vrot.slane %v723_v42, 3  ;;  %v857_v46 = vrot.slane %v723_v42, 2  ;;  %v808_v43 = vrot.slane %v723_v42, 1  ;;  %v3710_v54 = vunpack.i.l.bf16 %v4917_v12 }
 0x30e   :  { %1581 = vmatmul.bf16.gmra.mxu1 %v1246_v62  ;;  %1630 = vmatmul.bf16.gmra.mxu2 %v4925_v3 }
 0x310   :  { %v3684_v60 = vpop.permute.xlu0 %3683  ;;  %v614_v63 = vpop.permute.xlu1 %613  ;;  %v4937_v23 = vld [vmem:[#allocation2 + $0xf0] sm:$0xff] }
 0x311   :  { %v3686_v27 = vunpack.i.h.bf16 %v3684_v60  ;;  %v3685_v47 = vunpack.i.l.bf16 %v3684_v60  ;;  %618 = vst.msk [vmem:[#allocation2 + $0x116] sm:$0x1] %vm460_vm8, %v614_v63  ;;  %v683_v48 = vpop.permute.xlu2 %682  ;;  %v899_v50 = vrot.slane %v4937_v23, 3  ;;  %v850_v52 = vrot.slane %v4937_v23, 2 }
 0x312   :  { %687 = vst.msk [vmem:[#allocation2 + $0x138] sm:$0x1] %vm460_vm8, %v683_v48  ;;  %v801_v53 = vrot.slane %v4937_v23, 1 }
 0x313   :  { %v1181_v55 = vsel %vm119_vm4, %v4781_v30, %v3685_v47  ;;  %v901_v38 = vsel %vm862_vm12, %v899_v50, %v900_v5  ;;  %v852_v31 = vsel %vm813_vm11, %v850_v52, %v851_v18  ;;  %v1182_v28 = vsel %vm119_vm4, %v4783_v35, %v3686_v27 }
 0x314   :  { %v3747_v39 = vpack.i.bf16 %v901_v38, %v898_v22  ;;  %v3737_v62 = vpack.i.bf16 %v852_v31, %v849_v34  ;;  %v803_v51 = vsel %vm764_vm10, %v801_v53, %v802_v26  ;;  %v1198_v57 = vsel %vm1191_vm13, %v1181_v55, %v3690_v36 }
 0x315   :  { %v3727_v29 = vpack.i.bf16 %v803_v51, %v800_v21  ;;  %v1215_v59 = vsel %vm1208_vm14, %v1198_v57, %v3695_v15  ;;  %v840_v35 = vsel %vm813_vm11, %v838_v6, %v839_v44  ;;  %v3752_v15 = vpack.i.bf16 %v892_v37, %v889_v16 }
 0x316   :  { %3748 = vrot.lane.b32.xlu2 %v3747_v39, %s4371_s7  ;;  %3738 = vrot.lane.b32.xlu1 %v3737_v62, %s4367_s12  ;;  %v1248_v30 = vpack.c.bf16 %v1215_v59, %v1214_v40  ;;  %v1199_v40 = vsel %vm1191_vm13, %v1182_v28, %v3691_v61  ;;  %v3742_v22 = vpack.i.bf16 %v843_v0, %v840_v35  ;;  %v903_v21 = vrot.slane %v721_v14, 3  ;;  %v5010_v61 = vld [vmem:[#allocation2 + $0x120] sm:$0xff]  ;;  %v729_v14 = vld [vmem:[#allocation2 + $0x148] sm:$0x7] }
 0x317   :  { %3728 = vrot.lane.b32.xlu0 %v3727_v29, %s4370_s4  ;;  %1532 = vmatmul.bf16.gmra.mxu0 %v4891_v24  ;;  %v4973_v24 = vld [vmem:[#allocation2 + $0x100] sm:$0xff]  ;;  %v3732_v5 = vpack.i.bf16 %v794_v1, %v791_v58  ;;  %v1216_v34 = vsel %vm1208_vm14, %v1199_v40, %v3696_v4  ;;  %v3711_v37 = vunpack.i.h.bf16 %v4917_v12  ;;  %v908_v35 = vrot.slane %v5010_v61, 3 }
 0x318   :  { %v599_v20 = vpop.permute.xlu0 %598  ;;  %v4966_v25 = vpop.permute.xlu1 %3703  ;;  %1679 = vmatmul.bf16.gmra.mxu3 %v1248_v30  ;;  %v902_v18 = vrot.slane %v4973_v24, 3  ;;  %v853_v26 = vrot.slane %v4973_v24, 2  ;;  %v4980_v19 = vpack.c.bf16 %v1216_v34, %v1215_v59  ;;  %v804_v56 = vrot.slane %v4973_v24, 1  ;;  %v5021_v40 = vld [vmem:[#allocation2 + $0x140] sm:$0xff] }
 0x319   :  { %603 = vst.msk [vmem:[#allocation2 + $0x114] sm:$0x1] %vm460_vm8, %v599_v20  ;;  %v3705_v52 = vunpack.i.l.bf16 %v4966_v25  ;;  %v3706_v59 = vunpack.i.h.bf16 %v4966_v25  ;;  %v859_v20 = vrot.slane %v5010_v61, 2  ;;  %v727_v4 = vld [vmem:[#allocation2 + $0x138] sm:$0x7] }
 0x31a   :  { %v904_v44 = vsel %vm862_vm12, %v902_v18, %v903_v21  ;;  %v855_v8 = vsel %vm813_vm11, %v853_v26, %v854_v41  ;;  %v806_v36 = vsel %vm764_vm10, %v804_v56, %v805_v33  ;;  %v931_v18 = vrot.slane %v727_v4, 3  ;;  %v731_v26 = vld [vmem:[#allocation2 + $0x158] sm:$0x7] }
 0x31b   :  { %v941_v41 = vrot.slane %v729_v14, 1  ;;  %v925_v33 = vrot.slane %v727_v4, 2 }
 0x31e   :  { %3753 = vrot.lane.b32.xlu2 %v3752_v15, %s4371_s7  ;;  %3743 = vrot.lane.b32.xlu1 %v3742_v22, %s4367_s12  ;;  %v5023_v15 = vld [vmem:[#allocation2 + $0x150] sm:$0xff] }
 0x31f   :  { %3733 = vrot.lane.b32.xlu0 %v3732_v5, %s4370_s4  ;;  %1586 = vmatmul.bf16.gmra.mxu1 %v1248_v30  ;;  %v725_v30 = vld [vmem:[#allocation2 + $0x128] sm:$0x7]  ;;  %v962_v42 = vrot.slane %v5023_v15, 1 }
 0x320   :  { %1635 = vmatmul.bf16.gmra.mxu2 %v4980_v19  ;;  %v3699_v6 = vpop.permute.xlu0 %3698  ;;  %v668_v60 = vpop.permute.xlu1 %667  ;;  %v4985_v63 = vld [vmem:[#allocation2 + $0x110] sm:$0xff]  ;;  %v909_v0 = vrot.slane %v725_v30, 3  ;;  %v860_v25 = vrot.slane %v725_v30, 2  ;;  %v811_v1 = vrot.slane %v725_v30, 1 }
 0x321   :  { %v3701_v27 = vunpack.i.h.bf16 %v3699_v6  ;;  %v3700_v47 = vunpack.i.l.bf16 %v3699_v6  ;;  %672 = vst.msk [vmem:[#allocation2 + $0x136] sm:$0x1] %vm460_vm8, %v668_v60  ;;  %v905_v48 = vrot.slane %v4985_v63, 3  ;;  %v856_v50 = vrot.slane %v4985_v63, 2 }
 0x322   :  { %v807_v53 = vrot.slane %v4985_v63, 1  ;;  %v910_v22 = vsel %vm862_vm12, %v908_v35, %v909_v0  ;;  %v861_v5 = vsel %vm813_vm11, %v859_v20, %v860_v25  ;;  %v919_v6 = vrot.slane %v727_v4, 1 }
 0x323   :  { %v1225_v55 = vsel %vm119_vm4, %v4812_v10, %v3700_v47  ;;  %v907_v38 = vsel %vm862_vm12, %v905_v48, %v906_v7  ;;  %v858_v31 = vsel %vm813_vm11, %v856_v50, %v857_v46  ;;  %v1231_v57 = vsel %vm119_vm4, %v4814_v13, %v3701_v27 }
 0x324   :  { %v3767_v11 = vpack.i.bf16 %v907_v38, %v904_v44  ;;  %v3762_v39 = vpack.i.bf16 %v858_v31, %v855_v8  ;;  %v809_v62 = vsel %vm764_vm10, %v807_v53, %v808_v43  ;;  %v1227_v51 = vsel %vm1191_vm13, %v1225_v55, %v3705_v52 }
 0x325   :  { %v3757_v28 = vpack.i.bf16 %v809_v62, %v806_v36  ;;  %v1229_v29 = vsel %vm1208_vm14, %v1227_v51, %v3710_v54  ;;  %v1233_v13 = vsel %vm1191_vm13, %v1231_v57, %v3706_v59  ;;  %v946_v60 = vrot.slane %v5021_v40, 2 }
 0x326   :  { %3768 = vrot.lane.b32.xlu2 %v3767_v11, %s4371_s7  ;;  %3763 = vrot.lane.b32.xlu1 %v3762_v39, %s4367_s12  ;;  %v1250_v10 = vpack.c.bf16 %v1229_v29, %v1216_v34  ;;  %v5018_v58 = vsel %vm1208_vm14, %v1233_v13, %v3711_v37  ;;  %v940_v34 = vrot.slane %v5021_v40, 1  ;;  %v947_v44 = vrot.slane %v729_v14, 2 }
 0x327   :  { %3758 = vrot.lane.b32.xlu0 %v3757_v28, %s4370_s4  ;;  %1537 = vmatmul.bf16.gmra.mxu0 %v4925_v3  ;;  %v810_v3 = vrot.slane %v5010_v61, 1  ;;  %v1251_v12 = vpack.c.bf16 %v5018_v58, %v1229_v29  ;;  %v968_v27 = vrot.slane %v5023_v15, 2  ;;  %v969_v47 = vrot.slane %v731_v26, 2 }
 0x328   :  { %v653_v16 = vpop.permute.xlu0 %652  ;;  %1684 = vmatmul.bf16.gmra.mxu3 %v1250_v10  ;;  %v952_v48 = vrot.slane %v5021_v40, 3  ;;  %v953_v50 = vrot.slane %v729_v14, 3  ;;  %v974_v52 = vrot.slane %v5023_v15, 3  ;;  %v975_v54 = vrot.slane %v731_v26, 3 }
 0x329   :  { %657 = vst.msk [vmem:[#allocation2 + $0x134] sm:$0x1] %vm460_vm8, %v653_v16  ;;  %v812_v21 = vsel %vm764_vm10, %v810_v3, %v811_v1  ;;  %v963_v11 = vrot.slane %v731_v26, 1  ;;  %v948_v39 = vsel %vm813_vm11, %v946_v60, %v947_v44  ;;  %v970_v62 = vsel %vm813_vm11, %v968_v27, %v969_v47 }
 0x32a   :  { %v954_v51 = vsel %vm862_vm12, %v952_v48, %v953_v50  ;;  %v976_v57 = vsel %vm862_vm12, %v974_v52, %v975_v54  ;;  %v942_v28 = vsel %vm764_vm10, %v940_v34, %v941_v41  ;;  %v3792_v59 = vpack.i.bf16 %v970_v62, %v948_v39 }
 0x32b   :  { %v964_v29 = vsel %vm764_vm10, %v962_v42, %v963_v11  ;;  %vm3301_vm8 = vcmask 72704  }
 0x32c   :  { %v3787_v30 = vpack.i.bf16 %v964_v29, %v942_v28 }
 0x32f   :  { %1591 = vmatmul.bf16.gmra.mxu1 %v1250_v10  ;;  %v3797_v10 = vpack.i.bf16 %v976_v57, %v954_v51 }
 0x330   :  { %1640 = vmatmul.bf16.gmra.mxu2 %v1251_v12  ;;  %v5031_v56 = vld [vmem:[#allocation2 + $0x130] sm:$0xff] }
 0x331   :  { %v930_v7 = vrot.slane %v5031_v56, 3  ;;  %v924_v8 = vrot.slane %v5031_v56, 2  ;;  %v918_v46 = vrot.slane %v5031_v56, 1 }
 0x333   :  { %v932_v36 = vsel %vm862_vm12, %v930_v7, %v931_v18  ;;  %v926_v53 = vsel %vm813_vm11, %v924_v8, %v925_v33  ;;  %v920_v43 = vsel %vm764_vm10, %v918_v46, %v919_v6 }
 0x334   :  { %v3782_v55 = vpack.i.bf16 %v932_v36, %v910_v22  ;;  %v3777_v38 = vpack.i.bf16 %v926_v53, %v861_v5  ;;  %v3772_v31 = vpack.i.bf16 %v920_v43, %v812_v21 }
 0x336   :  { %3783 = vrot.lane.b32.xlu2 %v3782_v55, %s4371_s7  ;;  %3778 = vrot.lane.b32.xlu1 %v3777_v38, %s4367_s12 }
 0x337   :  { %3773 = vrot.lane.b32.xlu0 %v3772_v31, %s4370_s4  ;;  %1542 = vmatmul.bf16.gmra.mxu0 %v4980_v19 }
 0x33e   :  { %3793 = vrot.lane.b32.xlu1 %v3792_v59, %s4367_s12  ;;  %3798 = vrot.lane.b32.xlu2 %v3797_v10, %s4371_s7 }
 0x33f   :  { %3788 = vrot.lane.b32.xlu0 %v3787_v30, %s4370_s4 }
 0x351   :  { %v3724_v16 = vpop.permute.xlu2 %3723 }
 0x352   :  { %v3725_v0 = vunpack.i.l.bf16 %v3724_v16  ;;  %v3726_v8 = vunpack.i.h.bf16 %v3724_v16 }
 0x369   :  { %v3719_v19 = vpop.permute.xlu1 %3718 }
 0x36a   :  { %v3720_v13 = vunpack.i.l.bf16 %v3719_v19  ;;  %v3714_v37 = vpop.permute.xlu0 %3713  ;;  %v3721_v18 = vunpack.i.h.bf16 %v3719_v19 }
 0x36b   :  { %v3715_v35 = vunpack.i.l.bf16 %v3714_v37  ;;  %v3716_v14 = vunpack.i.h.bf16 %v3714_v37 }
 0x36d   :  { %v1237_v20 = vsel %vm119_vm4, %v4854_v45, %v3715_v35  ;;  %v1185_v21 = vsel %vm119_vm4, %v4857_v32, %v3716_v14 }
 0x36e   :  { %v1239_v25 = vsel %vm1191_vm13, %v1237_v20, %v3720_v13  ;;  %v1202_v47 = vsel %vm1191_vm13, %v1185_v21, %v3721_v18 }
 0x36f   :  { %v1241_v3 = vsel %vm1208_vm14, %v1239_v25, %v3725_v0  ;;  %v1219_v54 = vsel %vm1208_vm14, %v1202_v47, %v3726_v8 }
 0x370   :  { %v1252_v1 = vpack.c.bf16 %v1241_v3, %v5018_v58  ;;  %v3749_v12 = vpop.permute.xlu2 %3748 }
 0x371   :  { %v3751_v48 = vunpack.i.h.bf16 %v3749_v12  ;;  %v3750_v50 = vunpack.i.l.bf16 %v3749_v12 }
 0x372   :  { %1689 = vmatmul.bf16.gmra.mxu3 %v1252_v1 }
 0x378   :  { %v3754_v43 = vpop.permute.xlu2 %3753 }
 0x379   :  { %v3756_v10 = vunpack.i.h.bf16 %v3754_v43 }
 0x37b   :  { %v1577_v45 = vpop.f32.mrf.mxu1 }
 0x380   :  { %v3769_v1 = vpop.permute.xlu2 %3768 }
 0x381   :  { %v1626_v58 = vpop.f32.mrf.mxu2  ;;  %v3771_v18 = vunpack.i.h.bf16 %v3769_v1 }
 0x383   :  { %v1528_v4 = vpop.f32.mrf.mxu0  ;;  %v5101_v5 = vpop.f32.mrf.mxu1 }
 0x384   :  { %v1578_v22 = vadd.f32 %v1577_v45, %v1528_v4 }
 0x386   :  { %v1627_v34 = vadd.f32 %v1626_v58, %v1578_v22 }
 0x388   :  { %v3739_v26 = vpop.permute.xlu1 %3738 }
 0x389   :  { %v3741_v41 = vunpack.i.h.bf16 %v3739_v26  ;;  %v3740_v42 = vunpack.i.l.bf16 %v3739_v26  ;;  %v3729_v33 = vpop.permute.xlu0 %3728  ;;  %v5105_v6 = vpop.f32.mrf.mxu2  ;;  %v3770_v26 = vunpack.i.l.bf16 %v3769_v1 }
 0x38a   :  { %v3731_v60 = vunpack.i.h.bf16 %v3729_v33  ;;  %v3730_v44 = vunpack.i.l.bf16 %v3729_v33  ;;  %v1675_v7 = vpop.f32.mrf.mxu3 }
 0x38b   :  { %v5107_v46 = vadd.f32 %v1675_v7, %v1627_v34  ;;  %v5109_v27 = vpop.f32.mrf.mxu0  ;;  %v1582_v39 = vpop.f32.mrf.mxu1 }
 0x38c   :  { %v1187_v32 = vsel %vm119_vm4, %v4937_v23, %v3731_v60  ;;  %v1186_v52 = vsel %vm119_vm4, %v4910_v17, %v3730_v44  ;;  %v3755_v17 = vunpack.i.l.bf16 %v3754_v43 }
 0x38d   :  { %v1203_v36 = vsel %vm1191_vm13, %v1186_v52, %v3740_v42  ;;  %v1204_v53 = vsel %vm1191_vm13, %v1187_v32, %v3741_v41 }
 0x38e   :  { %v1220_v55 = vsel %vm1208_vm14, %v1203_v36, %v3750_v50  ;;  %v1221_v38 = vsel %vm1208_vm14, %v1204_v53, %v3751_v48 }
 0x38f   :  { %v5121_v31 = vpack.c.bf16 %v1220_v55, %v1219_v54  ;;  %v5123_v11 = vpack.c.bf16 %v1221_v38, %v1220_v55 }
 0x390   :  { %v3744_v23 = vpop.permute.xlu1 %3743 }
 0x391   :  { %v3745_v62 = vunpack.i.l.bf16 %v3744_v23  ;;  %v3734_v51 = vpop.permute.xlu0 %3733  ;;  %1645 = vmatmul.bf16.gmra.mxu2 %v5121_v31  ;;  %1694 = vmatmul.bf16.gmra.mxu3 %v5123_v11  ;;  %v3746_v57 = vunpack.i.h.bf16 %v3744_v23  ;;  %v1631_v59 = vpop.f32.mrf.mxu2 }
 0x392   :  { %v3736_v28 = vunpack.i.h.bf16 %v3734_v51  ;;  %v3735_v29 = vunpack.i.l.bf16 %v3734_v51  ;;  %v5127_v30 = vpop.f32.mrf.mxu3 }
 0x393   :  { %v5137_v22 = vpop.f32.mrf.mxu1 }
 0x394   :  { %v1184_v19 = vsel %vm119_vm4, %v4927_v9, %v3736_v28  ;;  %v1183_v16 = vsel %vm119_vm4, %v4923_v2, %v3735_v29  ;;  %v1533_v13 = vpop.f32.mrf.mxu0 }
 0x395   :  { %v1583_v37 = vadd.f32 %v1582_v39, %v1533_v13  ;;  %v1200_v35 = vsel %vm1191_vm13, %v1183_v16, %v3745_v62  ;;  %v1201_v0 = vsel %vm1191_vm13, %v1184_v19, %v3746_v57 }
 0x396   :  { %v1217_v20 = vsel %vm1208_vm14, %v1200_v35, %v3755_v17  ;;  %v1218_v25 = vsel %vm1208_vm14, %v1201_v0, %v3756_v10 }
 0x397   :  { %v1632_v3 = vadd.f32 %v1631_v59, %v1583_v37  ;;  %v1253_v58 = vpack.c.bf16 %v1218_v25, %v1217_v20  ;;  %v1254_v4 = vpack.c.bf16 %v1219_v54, %v1218_v25  ;;  %v3784_v54 = vpop.permute.xlu2 %3783 }
 0x398   :  { %v3764_v45 = vpop.permute.xlu1 %3763  ;;  %v3785_v28 = vunpack.i.l.bf16 %v3784_v54 }
 0x399   :  { %v3766_v14 = vunpack.i.h.bf16 %v3764_v45  ;;  %v3765_v9 = vunpack.i.l.bf16 %v3764_v45  ;;  %v3759_v12 = vpop.permute.xlu0 %3758  ;;  %1547 = vmatmul.bf16.gmra.mxu0 %v1253_v58  ;;  %1596 = vmatmul.bf16.gmra.mxu1 %v1254_v4  ;;  %v5143_v33 = vpop.f32.mrf.mxu2 }
 0x39a   :  { %v3761_v2 = vunpack.i.h.bf16 %v3759_v12  ;;  %v3760_v34 = vunpack.i.l.bf16 %v3759_v12 }
 0x39b   :  { %v1680_v21 = vpop.f32.mrf.mxu3 }
 0x39c   :  { %v1189_v41 = vsel %vm119_vm4, %v4985_v63, %v3761_v2  ;;  %v1188_v42 = vsel %vm119_vm4, %v4973_v24, %v3760_v34  ;;  %v5145_v60 = vpop.f32.mrf.mxu0  ;;  %v5147_v44 = vadd.f32 %v1680_v21, %v1632_v3  ;;  %v1587_v24 = vpop.f32.mrf.mxu1 }
 0x39d   :  { %v1205_v7 = vsel %vm1191_vm13, %v1188_v42, %v3765_v9  ;;  %v1206_v8 = vsel %vm1191_vm13, %v1189_v41, %v3766_v14 }
 0x39e   :  { %v1222_v47 = vsel %vm1208_vm14, %v1205_v7, %v3770_v26  ;;  %v1223_v48 = vsel %vm1208_vm14, %v1206_v8, %v3771_v18 }
 0x39f   :  { %v1257_v50 = vpack.c.bf16 %v1222_v47, %v1221_v38  ;;  %v1258_v32 = vpack.c.bf16 %v1223_v48, %v1222_v47  ;;  %v3786_v38 = vunpack.i.h.bf16 %v3784_v54  ;;  %v3799_v1 = vpop.permute.xlu2 %3798 }
 0x3a0   :  { %v3801_v58 = vunpack.i.h.bf16 %v3799_v1  ;;  %v3800_v14 = vunpack.i.l.bf16 %v3799_v1 }
 0x3a1   :  { %1650 = vmatmul.bf16.gmra.mxu2 %v1257_v50  ;;  %1699 = vmatmul.bf16.gmra.mxu3 %v1258_v32 }
 0x3a3   :  { %v5153_v63 = vpop.f32.mrf.mxu3  ;;  %v1636_v53 = vpop.f32.mrf.mxu2 }
 0x3a4   :  { %v1538_v52 = vpop.f32.mrf.mxu0  ;;  %v1589_v21 = vpop.f32.mrf.mxu1 }
 0x3a5   :  { %v1588_v36 = vadd.f32 %v1587_v24, %v1538_v52 }
 0x3a7   :  { %v1637_v43 = vadd.f32 %v1636_v53, %v1588_v36 }
 0x3a8   :  { %v3779_v55 = vpop.permute.xlu1 %3778 }
 0x3a9   :  { %v3781_v39 = vunpack.i.h.bf16 %v3779_v55  ;;  %v3780_v23 = vunpack.i.l.bf16 %v3779_v55  ;;  %v3774_v62 = vpop.permute.xlu0 %3773  ;;  %1552 = vmatmul.bf16.gmra.mxu0 %v5121_v31  ;;  %1601 = vmatmul.bf16.gmra.mxu1 %v5123_v11 }
 0x3aa   :  { %v3776_v51 = vunpack.i.h.bf16 %v3774_v62  ;;  %v3775_v17 = vunpack.i.l.bf16 %v3774_v62 }
 0x3ab   :  { %v1685_v57 = vpop.f32.mrf.mxu3 }
 0x3ac   :  { %v1226_v29 = vsel %vm119_vm4, %v5031_v56, %v3776_v51  ;;  %v1190_v59 = vsel %vm119_vm4, %v5010_v61, %v3775_v17  ;;  %v5161_v10 = vadd.f32 %v1685_v57, %v1637_v43  ;;  %v1540_v26 = vpop.f32.mrf.mxu0  ;;  %v1592_v7 = vpop.f32.mrf.mxu1 }
 0x3ad   :  { %v1207_v19 = vsel %vm1191_vm13, %v1190_v59, %v3780_v23  ;;  %v1228_v16 = vsel %vm1191_vm13, %v1226_v29, %v3781_v39 }
 0x3ae   :  { %v1224_v13 = vsel %vm1208_vm14, %v1207_v19, %v3785_v28  ;;  %v1230_v31 = vsel %vm1208_vm14, %v1228_v16, %v3786_v38  ;;  %v1580_v38 = vadd.f32 %v5101_v5, %v5109_v27  ;;  %v1585_v16 = vadd.f32 %v5137_v22, %v5145_v60 }
 0x3af   :  { %v1259_v11 = vpack.c.bf16 %v1224_v13, %v1223_v48  ;;  %v1260_v37 = vpack.c.bf16 %v1230_v31, %v1224_v13  ;;  %v1590_v27 = vadd.f32 %v1589_v21, %v1540_v26 }
 0x3b0   :  { %v3794_v20 = vpop.permute.xlu1 %3793  ;;  %v1629_v29 = vadd.f32 %v5105_v6, %v1580_v38  ;;  %v1634_v5 = vadd.f32 %v5143_v33, %v1585_v16 }
 0x3b1   :  { %v3789_v35 = vpop.permute.xlu0 %3788  ;;  %1655 = vmatmul.bf16.gmra.mxu2 %v1259_v11  ;;  %1704 = vmatmul.bf16.gmra.mxu3 %v1260_v37  ;;  %v3796_v25 = vunpack.i.h.bf16 %v3794_v20  ;;  %v3795_v3 = vunpack.i.l.bf16 %v3794_v20  ;;  %v1762_v20 = vmul.f32 %v5147_v44, %v5147_v44 }
 0x3b2   :  { %v3791_v0 = vunpack.i.h.bf16 %v3789_v35  ;;  %v3790_v56 = vunpack.i.l.bf16 %v3789_v35  ;;  %v5199_v13 = vadd.f32 %v5127_v30, %v1629_v29  ;;  %v1760_v30 = vmul.f32 %v5107_v46, %v5107_v46 }
 0x3b3   :  { %v5219_v60 = vadd.f32 %v5153_v63, %v1634_v5  ;;  %v1715_v63 = vsel %vm165_vm15, %v5107_v46, 0.0 }
 0x3b4   :  { %v1238_v61 = vsel %vm119_vm4, %v5023_v15, %v3791_v0  ;;  %v1232_v45 = vsel %vm119_vm4, %v5021_v40, %v3790_v56  ;;  %v1638_v15 = vpop.f32.mrf.mxu2  ;;  %v1687_v40 = vpop.f32.mrf.mxu3  ;;  %v1761_v22 = vmul.f32 %v5199_v13, %v5199_v13  ;;  %v1716_v56 = vsel %vm165_vm15, %v5199_v13, 0.0 }
 0x3b5   :  { %v1240_v4 = vsel %vm1191_vm13, %v1238_v61, %v3796_v25  ;;  %v1234_v9 = vsel %vm1191_vm13, %v1232_v45, %v3795_v3  ;;  %v1543_v8 = vpop.f32.mrf.mxu0  ;;  %v1639_v25 = vadd.f32 %v1638_v15, %v1590_v27  ;;  %v1776_v61 = vsel %vm165_vm15, %v1760_v30, 0.0 }
 0x3b6   :  { %v1242_v12 = vsel %vm1208_vm14, %v1240_v4, %v3801_v58  ;;  %v1236_v2 = vsel %vm1208_vm14, %v1234_v9, %v3800_v14  ;;  %v1593_v33 = vadd.f32 %v1592_v7, %v1543_v8  ;;  %v1777_v3 = vsel %vm165_vm15, %v1761_v22, 0.0 }
 0x3b7   :  { %v1262_v34 = vpack.c.bf16 %v1242_v12, %v1236_v2  ;;  %v1261_v18 = vpack.c.bf16 %v1236_v2, %v1230_v31  ;;  %v1718_v45 = vsel %vm165_vm15, %v5147_v44, 0.0  ;;  %v1763_v58 = vmul.f32 %v5219_v60, %v5219_v60 }
 0x3b8   :  { %v5241_v4 = vadd.f32 %v1687_v40, %v1639_v25  ;;  %v1717_v9 = vadd.f32 %v1716_v56, %v1715_v63  ;;  %v1764_v12 = vmul.f32 %v5161_v10, %v5161_v10  ;;  %v1720_v15 = vsel %vm165_vm15, %v5219_v60, 0.0 }
 0x3b9   :  { %1557 = vmatmul.bf16.gmra.mxu0 %v1257_v50  ;;  %1606 = vmatmul.bf16.gmra.mxu1 %v1258_v32  ;;  %v1594_v50 = vpop.f32.mrf.mxu1 }
 0x3ba   :  { %v1719_v7 = vadd.f32 %v1718_v45, %v1717_v9 }
 0x3bc   :  { %v1641_v41 = vpop.f32.mrf.mxu2 }
 0x3bd   :  { %v1545_v32 = vpop.f32.mrf.mxu0  ;;  %v1642_v14 = vadd.f32 %v1641_v41, %v1593_v33  ;;  %v1778_v41 = vadd.f32 %v1777_v3, %v1776_v61 }
 0x3c1   :  { %1660 = vmatmul.bf16.gmra.mxu2 %v1261_v18  ;;  %1709 = vmatmul.bf16.gmra.mxu3 %v1262_v34  ;;  %v1779_v18 = vsel %vm165_vm15, %v1762_v20, 0.0 }
 0x3c4   :  { %v1643_v47 = vpop.f32.mrf.mxu2 }
 0x3c9   :  { %1562 = vmatmul.bf16.gmra.mxu0 %v1259_v11  ;;  %1611 = vmatmul.bf16.gmra.mxu1 %v1260_v37  ;;  %v1595_v11 = vadd.f32 %v1594_v50, %v1545_v32  ;;  %v1781_v50 = vsel %vm165_vm15, %v1763_v58, 0.0  ;;  %v1765_v32 = vmul.f32 %v5241_v4, %v5241_v4 }
 0x3cb   :  { %v1644_v2 = vadd.f32 %v1643_v47, %v1595_v11  ;;  %v1785_v27 = vsel %vm165_vm15, %v1765_v32, 0.0 }
 0x3f5   :  { %v5175_v42 = vpop.f32.mrf.mxu3 }
 0x3f6   :  { %v5253_v40 = vadd.f32 %v5175_v42, %v1642_v14  ;;  %v1722_v42 = vsel %vm165_vm15, %v5161_v10, 0.0 }
 0x3f8   :  { %v1766_v38 = vmul.f32 %v5253_v40, %v5253_v40 }
 0x3fd   :  { %v5177_v48 = vpop.f32.mrf.mxu3 }
 0x3fe   :  { %v5258_v8 = vadd.f32 %v5177_v48, %v1644_v2  ;;  %v1780_v48 = vadd.f32 %v1779_v18, %v1778_v41 }
 0x400   :  { %v1767_v16 = vmul.f32 %v5258_v8, %v5258_v8 }
 0x402   :  { %v1789_v25 = vsel %vm165_vm15, %v1767_v16, 0.0 }
 0x414   :  { %v1646_v24 = vpop.f32.mrf.mxu2  ;;  %v5179_v52 = vpop.f32.mrf.mxu3 }
 0x416   :  { %v1548_v36 = vpop.f32.mrf.mxu0  ;;  %v1597_v53 = vpop.f32.mrf.mxu1 }
 0x417   :  { %v1598_v37 = vadd.f32 %v1597_v53, %v1548_v36  ;;  %v1721_v53 = vadd.f32 %v1720_v15, %v1719_v7 }
 0x419   :  { %v1647_v34 = vadd.f32 %v1646_v24, %v1598_v37  ;;  %v1787_v37 = vsel %vm165_vm15, %v1766_v38, 0.0 }
 0x41c   :  { %v5181_v43 = vpop.f32.mrf.mxu2  ;;  %v5183_v54 = vpop.f32.mrf.mxu3 }
 0x41e   :  { %v1550_v55 = vpop.f32.mrf.mxu0  ;;  %v1599_v39 = vpop.f32.mrf.mxu1 }
 0x41f   :  { %v1600_v1 = vadd.f32 %v1599_v39, %v1550_v55  ;;  %v5272_v55 = vadd.f32 %v5179_v52, %v1647_v34  ;;  %v1723_v52 = vadd.f32 %v1722_v42, %v1721_v53 }
 0x421   :  { %v1649_v47 = vadd.f32 %v5181_v43, %v1600_v1  ;;  %v1783_v43 = vsel %vm165_vm15, %v1764_v12, 0.0  ;;  %v1730_v61 = vsel %vm165_vm15, %v5272_v55, 0.0 }
 0x423   :  { %v5286_v5 = vadd.f32 %v5183_v54, %v1649_v47  ;;  %v1768_v54 = vmul.f32 %v5272_v55, %v5272_v55 }
 0x424   :  { %v5185_v23 = vpop.f32.mrf.mxu2  ;;  %v5187_v62 = vpop.f32.mrf.mxu3 }
 0x425   :  { %v1769_v63 = vmul.f32 %v5286_v5, %v5286_v5  ;;  %v1791_v58 = vsel %vm165_vm15, %v1768_v54, 0.0  ;;  %v1732_v12 = vsel %vm165_vm15, %v5286_v5, 0.0 }
 0x426   :  { %v1553_v51 = vpop.f32.mrf.mxu0  ;;  %v1602_v17 = vpop.f32.mrf.mxu1 }
 0x427   :  { %v1603_v21 = vadd.f32 %v1602_v17, %v1553_v51  ;;  %v1724_v17 = vsel %vm165_vm15, %v5241_v4, 0.0  ;;  %v1793_v15 = vsel %vm165_vm15, %v1769_v63, 0.0 }
 0x428   :  { %v1725_v11 = vadd.f32 %v1724_v17, %v1723_v52 }
 0x429   :  { %v1652_v29 = vadd.f32 %v5185_v23, %v1603_v21  ;;  %v1726_v23 = vsel %vm165_vm15, %v5253_v40, 0.0 }
 0x42a   :  { %v1727_v20 = vadd.f32 %v1726_v23, %v1725_v11 }
 0x42c   :  { %v5191_v57 = vpop.f32.mrf.mxu2  ;;  %v5193_v28 = vpop.f32.mrf.mxu3 }
 0x42e   :  { %v1555_v59 = vpop.f32.mrf.mxu0  ;;  %v1604_v19 = vpop.f32.mrf.mxu1 }
 0x42f   :  { %v1605_v24 = vadd.f32 %v1604_v19, %v1555_v59  ;;  %v1782_v19 = vadd.f32 %v1781_v50, %v1780_v48 }
 0x431   :  { %v1654_v30 = vadd.f32 %v5191_v57, %v1605_v24  ;;  %v1784_v33 = vadd.f32 %v1783_v43, %v1782_v19 }
 0x433   :  { %v1786_v56 = vadd.f32 %v1785_v27, %v1784_v33 }
 0x434   :  { %v5206_v31 = vpop.f32.mrf.mxu2  ;;  %v5208_v6 = vpop.f32.mrf.mxu3 }
 0x435   :  { %v1788_v1 = vadd.f32 %v1787_v37, %v1786_v56 }
 0x436   :  { %v1558_v35 = vpop.f32.mrf.mxu0  ;;  %v1607_v0 = vpop.f32.mrf.mxu1 }
 0x437   :  { %v1608_v59 = vadd.f32 %v1607_v0, %v1558_v35  ;;  %v1728_v35 = vsel %vm165_vm15, %v5258_v8, 0.0  ;;  %v5304_v0 = vadd.f32 %v5187_v62, %v1652_v29  ;;  %v5317_v62 = vadd.f32 %v5193_v28, %v1654_v30 }
 0x438   :  { %v1729_v45 = vadd.f32 %v1728_v35, %v1727_v20  ;;  %v1790_v28 = vadd.f32 %v1789_v25, %v1788_v1 }
 0x439   :  { %v1657_v57 = vadd.f32 %v5206_v31, %v1608_v59  ;;  %v1770_v49 = vmul.f32 %v5304_v0, %v5304_v0  ;;  %v1734_v41 = vsel %vm165_vm15, %v5304_v0, 0.0  ;;  %v1771_v7 = vmul.f32 %v5317_v62, %v5317_v62 }
 0x43a   :  { %v1731_v18 = vadd.f32 %v1730_v61, %v1729_v45  ;;  %v1792_v42 = vadd.f32 %v1791_v58, %v1790_v28  ;;  %v1736_v24 = vsel %vm165_vm15, %v5317_v62, 0.0 }
 0x43b   :  { %v5325_v2 = vadd.f32 %v5208_v6, %v1657_v57  ;;  %v1795_v32 = vsel %vm165_vm15, %v1770_v49, 0.0 }
 0x43c   :  { %v1658_v26 = vpop.f32.mrf.mxu2  ;;  %v1707_v36 = vpop.f32.mrf.mxu3  ;;  %v1733_v6 = vadd.f32 %v1732_v12, %v1731_v18  ;;  %v1794_v43 = vadd.f32 %v1793_v15, %v1792_v42 }
 0x43d   :  { %v1772_v48 = vmul.f32 %v5325_v2, %v5325_v2 }
 0x43e   :  { %v1560_v39 = vpop.f32.mrf.mxu0  ;;  %v1609_v51 = vpop.f32.mrf.mxu1  ;;  %v1796_v29 = vadd.f32 %v1795_v32, %v1794_v43 }
 0x43f   :  { %v1610_v22 = vadd.f32 %v1609_v51, %v1560_v39  ;;  %v1735_v39 = vadd.f32 %v1734_v41, %v1733_v6  ;;  %v1797_v51 = vsel %vm165_vm15, %v1771_v7, 0.0  ;;  %v1799_v16 = vsel %vm165_vm15, %v1772_v48, 0.0 }
 0x441   :  { %v1659_v31 = vadd.f32 %v1658_v26, %v1610_v22  ;;  %v4374_v26 = vmov 128.0   ;;  %v1737_v59 = vadd.f32 %v1736_v24, %v1735_v39  ;;  %v1798_v22 = vadd.f32 %v1797_v51, %v1796_v29 }
 0x442   :  { %4077 = vrcp.f32 %v4374_v26 }
 0x443   :  { %v5332_v47 = vadd.f32 %v1707_v36, %v1659_v31  ;;  %v1738_v36 = vsel %vm165_vm15, %v5325_v2, 0.0  ;;  %v1800_v56 = vadd.f32 %v1799_v16, %v1798_v22 }
 0x444   :  { %v1661_v3 = vpop.f32.mrf.mxu2  ;;  %v1710_v21 = vpop.f32.mrf.mxu3  ;;  %v1739_v33 = vadd.f32 %v1738_v36, %v1737_v59 }
 0x445   :  { %v1773_v17 = vmul.f32 %v5332_v47, %v5332_v47  ;;  %v1740_v27 = vsel %vm165_vm15, %v5332_v47, 0.0 }
 0x446   :  { %v1563_v14 = vpop.f32.mrf.mxu0  ;;  %v1612_v9 = vpop.f32.mrf.mxu1  ;;  %v1741_v20 = vadd.f32 %v1740_v27, %v1739_v33 }
 0x447   :  { %v1613_v34 = vadd.f32 %v1612_v9, %v1563_v14  ;;  %v1801_v54 = vsel %vm165_vm15, %v1773_v17, 0.0 }
 0x448   :  { %v4078_v38 = vpop.eup %4077  ;;  %v1802_v31 = vadd.f32 %v1801_v54, %v1800_v56 }
 0x449   :  { %v1662_v50 = vadd.f32 %v1661_v3, %v1613_v34  ;;  %v1753_v57 = vmul.f32 128.0, %v4078_v38  ;;  %vm1757_vm1 = vweird.f32 %v4078_v38 }
 0x44b   :  { %v5339_v53 = vadd.f32 %v1710_v21, %v1662_v50  ;;  %v1754_v45 = vsub.f32 1.0, %v1753_v57 }
 0x44c   :  { %v1663_v11 = vpop.f32.mrf.mxu2  ;;  %v1712_v25 = vpop.f32.mrf.mxu3 }
 0x44d   :  { %v1774_v23 = vmul.f32 %v5339_v53, %v5339_v53  ;;  %v1742_v37 = vsel %vm165_vm15, %v5339_v53, 0.0  ;;  %v1755_v28 = vmul.f32 %v4078_v38, %v1754_v45 }
 0x44e   :  { %v1565_v19 = vpop.f32.mrf.mxu0  ;;  %v1614_v52 = vpop.f32.mrf.mxu1  ;;  %v1743_v3 = vadd.f32 %v1742_v37, %v1741_v20 }
 0x44f   :  { %v1615_v30 = vadd.f32 %v1614_v52, %v1565_v19  ;;  %v1803_v63 = vsel %vm165_vm15, %v1774_v23, 0.0  ;;  %v1756_v41 = vadd.f32 %v4078_v38, %v1755_v28 }
 0x450   :  { %v1804_v14 = vadd.f32 %v1803_v63, %v1802_v31 }
 0x451   :  { %v1664_v35 = vadd.f32 %v1663_v11, %v1615_v30  ;;  %v1758_v32 = vsel %vm1757_vm1, %v4078_v38, %v1756_v41  ;;  %v1817_v38 = vld [vmem:[%s6309_s5] sm:$0x1]  ;;  %s4375_s5 = smov 16  }
 0x452   :  { %v1830_v11 = vld [vmem:[%s6310_s6] sm:$0x1]  ;;  %s4376_s6 = smov 48  }
 0x453   :  { %v1713_v61 = vadd.f32 %v1712_v25, %v1664_v35 }
 0x455   :  { %v1744_v1 = vsel %vm165_vm15, %v1713_v61, 0.0  ;;  %v1775_v58 = vmul.f32 %v1713_v61, %v1713_v61 }
 0x456   :  { %v1745_v9 = vadd.f32 %v1744_v1, %v1743_v3 }
 0x457   :  { %v1805_v12 = vsel %vm165_vm15, %v1775_v58, 0.0 }
 0x458   :  { %v1746_v49 = vrot.slane %v1745_v9, 4  ;;  %v1806_v34 = vadd.f32 %v1805_v12, %v1804_v14 }
 0x45a   :  { %v1747_v18 = vadd.f32 %v1746_v49, %v1745_v9  ;;  %v1807_v15 = vrot.slane %v1806_v34, 4 }
 0x45c   :  { %v1748_v21 = vrot.slane %v1747_v18, 2  ;;  %v1808_v26 = vadd.f32 %v1807_v15, %v1806_v34 }
 0x45e   :  { %v1749_v7 = vadd.f32 %v1748_v21, %v1747_v18  ;;  %v1809_v50 = vrot.slane %v1808_v26, 2 }
 0x460   :  { %v1750_v42 = vrot.slane %v1749_v7, 1  ;;  %v1810_v6 = vadd.f32 %v1809_v50, %v1808_v26 }
 0x462   :  { %v1751_v24 = vadd.f32 %v1750_v42, %v1749_v7  ;;  %v1811_v48 = vrot.slane %v1810_v6, 1 }
 0x464   :  { %v1759_v43 = vmul.f32 %v1758_v32, %v1751_v24  ;;  %v1812_v39 = vadd.f32 %v1811_v48, %v1810_v6 }
 0x466   :  { %v1813_v51 = vmul.f32 %v1812_v39, %v1758_v32  ;;  %v1814_v36 = vmul.f32 %v1759_v43, %v1759_v43 }
 0x468   :  { %v1815_v17 = vsub.f32 %v1813_v51, %v1814_v36 }
 0x46a   :  { %v1816_v29 = vmax.f32 %v1815_v17, 0.0 }
 0x46c   :  { %v1818_v59 = vadd.f32 1e-05, %v1816_v29 }
 0x46e   :  { %4079 = vrsqrt.f32 %v1818_v59  ;;  %vm1825_vm3 = vweird.f32 %v1818_v59 }
 0x474   :  { %v4080_v19 = vpop.eup %4079 }
 0x475   :  { %v1820_v52 = vmul.f32 %v4080_v19, %v1818_v59  ;;  %vm1826_vm2 = vweird.f32 %v4080_v19 }
 0x476   :  { %vm1827_vm5 = vmor %vm1825_vm3, %vm1826_vm2 }
 0x477   :  { %v1821_v16 = vmul.f32 %v4080_v19, %v1820_v52 }
 0x479   :  { %v1822_v27 = vmul.f32 0.5, %v1821_v16 }
 0x47b   :  { %v1823_v23 = vsub.f32 1.5, %v1822_v27 }
 0x47d   :  { %v1824_v30 = vmul.f32 %v4080_v19, %v1823_v23 }
 0x47f   :  { %v1828_v22 = vsel %vm1827_vm5, %v4080_v19, %v1824_v30 }
 0x480   :  { %v1829_v33 = vmul.f32 %v1828_v22, %v1817_v38 }
 0x482   :  { %v1831_v54 = vmul.f32 %v1829_v33, %v1759_v43  ;;  %v1834_v37 = vperm.slane %v1829_v33, 0 }
 0x484   :  { %v1832_v35 = vsub.f32 %v1830_v11, %v1831_v54  ;;  %v1851_v57 = vmul.f32 %v1834_v37, %v1713_v61  ;;  %v1840_v20 = vmul.f32 %v1834_v37, %v5161_v10  ;;  %v1841_v25 = vmul.f32 %v1834_v37, %v5241_v4 }
 0x485   :  { %v1838_v63 = vmul.f32 %v1834_v37, %v5147_v44  ;;  %v1839_v31 = vmul.f32 %v1834_v37, %v5219_v60  ;;  %v1836_v3 = vmul.f32 %v1834_v37, %v5107_v46  ;;  %v1837_v1 = vmul.f32 %v1834_v37, %v5199_v13 }
 0x486   :  { %v1853_v56 = vperm.slane %v1832_v35, 0  ;;  %v1846_v61 = vmul.f32 %v1834_v37, %v5304_v0  ;;  %v1847_v10 = vmul.f32 %v1834_v37, %v5317_v62  ;;  %v1844_v46 = vmul.f32 %v1834_v37, %v5272_v55 }
 0x487   :  { %v1845_v21 = vmul.f32 %v1834_v37, %v5286_v5  ;;  %v1842_v62 = vmul.f32 %v1834_v37, %v5253_v40  ;;  %v1843_v50 = vmul.f32 %v1834_v37, %v5258_v8  ;;  %v1850_v6 = vmul.f32 %v1834_v37, %v5339_v53 }
 0x488   :  { %v1870_v45 = vadd.f32 %v1853_v56, %v1851_v57  ;;  %v1859_v58 = vadd.f32 %v1853_v56, %v1840_v20  ;;  %v1860_v14 = vadd.f32 %v1853_v56, %v1841_v25  ;;  %v1857_v9 = vadd.f32 %v1853_v56, %v1838_v63 }
 0x489   :  { %v1858_v12 = vadd.f32 %v1853_v56, %v1839_v31  ;;  %v1855_v49 = vadd.f32 %v1853_v56, %v1836_v3  ;;  %v1856_v44 = vadd.f32 %v1853_v56, %v1837_v1  ;;  %v1865_v60 = vadd.f32 %v1853_v56, %v1846_v61 }
 0x48a   :  { %v1886_v34 = vmax.f32 %v1870_v45, 0.0  ;;  %v1875_v4 = vmax.f32 %v1859_v58, 0.0  ;;  %v1876_v28 = vmax.f32 %v1860_v14, 0.0  ;;  %v1873_v18 = vmax.f32 %v1857_v9, 0.0  ;;  %v5443_v58 = vld [vmem:[#allocation3 + $0xa0] sm:$0xff] }
 0x48b   :  { %v1874_v13 = vmax.f32 %v1858_v12, 0.0  ;;  %v1866_v15 = vadd.f32 %v1853_v56, %v1847_v10  ;;  %v1871_v26 = vmax.f32 %v1855_v49, 0.0  ;;  %v1863_v0 = vadd.f32 %v1853_v56, %v1844_v46  ;;  %v1925_v12 = vld [vmem:[#allocation3 + $0xa8] sm:$0x3]  ;;  %v5451_v49 = vld [vmem:[#allocation3] sm:$0xff] }
 0x48c   :  { %1903 = vst.msk [vmem:[#allocation3 + $0x121] sm:$0xff] %vm165_vm15, %v1886_v34  ;;  %v1872_v41 = vmax.f32 %v1856_v44, 0.0  ;;  %v1864_v7 = vadd.f32 %v1853_v56, %v1845_v21  ;;  %v1881_v55 = vmax.f32 %v1865_v60, 0.0  ;;  %v1861_v42 = vadd.f32 %v1853_v56, %v1842_v62 }
 0x48d   :  { %1892 = vst.msk [vmem:[#allocation3 + $0x51] sm:$0xff] %vm165_vm15, %v1875_v4  ;;  %v1882_v5 = vmax.f32 %v1866_v15, 0.0  ;;  %v1862_v32 = vadd.f32 %v1853_v56, %v1843_v50  ;;  %v1848_v24 = vmul.f32 %v1834_v37, %v5325_v2  ;;  %v1879_v40 = vmax.f32 %v1863_v0, 0.0 }
 0x48e   :  { %1893 = vst.msk [vmem:[#allocation3 + $0x61] sm:$0xff] %vm165_vm15, %v1876_v28  ;;  %v1869_v48 = vadd.f32 %v1853_v56, %v1850_v6  ;;  %v1849_v43 = vmul.f32 %v1834_v37, %v5332_v47  ;;  %v1880_v8 = vmax.f32 %v1864_v7, 0.0  ;;  %v1877_v51 = vmax.f32 %v1861_v42, 0.0  ;;  %v5461_v28 = vld [vmem:[#allocation3 + $0x8] sm:$0x3] }
 0x48f   :  { %1890 = vst.msk [vmem:[#allocation3 + $0x31] sm:$0xff] %vm165_vm15, %v1873_v18  ;;  %v1867_v39 = vadd.f32 %v1853_v56, %v1848_v24  ;;  %v1878_v17 = vmax.f32 %v1862_v32, 0.0  ;;  %v2033_v4 = vrot.slane %v5443_v58, 1  ;;  %v2034_v18 = vrot.slane %v1925_v12, 1 }
 0x490   :  { %1891 = vst.msk [vmem:[#allocation3 + $0x41] sm:$0xff] %vm165_vm15, %v1874_v13  ;;  %v1868_v53 = vadd.f32 %v1853_v56, %v1849_v43  ;;  %v1885_v29 = vmax.f32 %v1869_v48, 0.0  ;;  %v2009_v13 = vrot.slane %v5451_v49, 1  ;;  %v2010_v50 = vrot.slane %v5461_v28, 1 }
 0x491   :  { %1888 = vst.msk [vmem:[#allocation3 + $0x11] sm:$0xff] %vm165_vm15, %v1871_v26  ;;  %v1883_v19 = vmax.f32 %v1867_v39, 0.0  ;;  %v2098_v42 = vrot.slane %v1925_v12, 2  ;;  %v5499_v39 = vsel %vm764_vm10, %v2033_v4, %v2034_v18 }
 0x492   :  { %1889 = vst.msk [vmem:[#allocation3 + $0x21] sm:$0xff] %vm165_vm15, %v1872_v41  ;;  %v1884_v16 = vmax.f32 %v1868_v53, 0.0 }
 0x493   :  { %1898 = vst.msk [vmem:[#allocation3 + $0xd1] sm:$0xff] %vm165_vm15, %v1881_v55  ;;  %v5458_v34 = vld [vmem:[#allocation3 + $0x120] sm:$0xff]  ;;  %v2097_v55 = vrot.slane %v5443_v58, 2 }
 0x494   :  { %v5386_v36 = vld [vmem:[#allocation3 + $0x50] sm:$0xff]  ;;  %1899 = vst.msk [vmem:[#allocation3 + $0xe1] sm:$0xff] %vm165_vm15, %v1882_v5  ;;  %v5467_v60 = vld [vmem:[#allocation3 + $0x58] sm:$0x3] }
 0x495   :  { %v5389_v2 = vld [vmem:[#allocation3 + $0x60] sm:$0xff]  ;;  %1896 = vst.msk [vmem:[#allocation3 + $0xb1] sm:$0xff] %vm165_vm15, %v1879_v40  ;;  %v5478_v62 = vld [vmem:[#allocation3 + $0x68] sm:$0x3]  ;;  %v2024_v6 = vrot.slane %v5386_v36, 1  ;;  %v2025_v32 = vrot.slane %v5467_v60, 1 }
 0x496   :  { %v3812_v47 = vpack.i.bf16 %v5389_v2, %v5386_v36  ;;  %v5394_v59 = vld [vmem:[#allocation3 + $0x30] sm:$0xff]  ;;  %1897 = vst.msk [vmem:[#allocation3 + $0xc1] sm:$0xff] %vm165_vm15, %v1880_v8  ;;  %v5421_v54 = vld [vmem:[#allocation3 + $0x38] sm:$0x3]  ;;  %v2027_v40 = vrot.slane %v5389_v2, 1  ;;  %v2028_v43 = vrot.slane %v5478_v62, 1 }
 0x497   :  { %v5397_v52 = vld [vmem:[#allocation3 + $0x40] sm:$0xff]  ;;  %1894 = vst.msk [vmem:[#allocation3 + $0x71] sm:$0xff] %vm165_vm15, %v1877_v51  ;;  %v2018_v56 = vrot.slane %v5394_v59, 1  ;;  %v2019_v3 = vrot.slane %v5421_v54, 1  ;;  %v5484_v7 = vld [vmem:[#allocation3 + $0x48] sm:$0x3] }
 0x498   :  { %3813 = vrot.lane.b32.xlu1 %v3812_v47, %s4370_s4  ;;  %v3807_v27 = vpack.i.bf16 %v5397_v52, %v5394_v59  ;;  %v5403_v23 = vld [vmem:[#allocation3 + $0x10] sm:$0xff]  ;;  %1895 = vst.msk [vmem:[#allocation3 + $0x81] sm:$0xff] %vm165_vm15, %v1878_v17  ;;  %v5469_v46 = vld [vmem:[#allocation3 + $0x18] sm:$0x3]  ;;  %v2021_v8 = vrot.slane %v5397_v52, 1  ;;  %v2022_v53 = vrot.slane %v5484_v7, 1  ;;  %v5509_v47 = vsel %vm764_vm10, %v2009_v13, %v2010_v50 }
 0x499   :  { %v5406_v38 = vld [vmem:[#allocation3 + $0x20] sm:$0xff]  ;;  %1902 = vst.msk [vmem:[#allocation3 + $0x111] sm:$0xff] %vm165_vm15, %v1885_v29  ;;  %v5419_v11 = vld [vmem:[#allocation3 + $0x28] sm:$0x3]  ;;  %v5449_v9 = vsel %vm764_vm10, %v2018_v56, %v2019_v3  ;;  %v2012_v5 = vrot.slane %v5403_v23, 1  ;;  %v2013_v24 = vrot.slane %v5469_v46, 1 }
 0x49a   :  { %3808 = vrot.lane.b32.xlu0 %v3807_v27, %s4370_s4  ;;  %v3802_v30 = vpack.i.bf16 %v5406_v38, %v5403_v23  ;;  %1900 = vst.msk [vmem:[#allocation3 + $0xf1] sm:$0xff] %vm165_vm15, %v1883_v19  ;;  %v5413_v22 = vld [vmem:[#allocation3 + $0xd0] sm:$0xff]  ;;  %v2015_v20 = vrot.slane %v5406_v38, 1  ;;  %v2016_v31 = vrot.slane %v5419_v11, 1  ;;  %v1931_v29 = vld [vmem:[#allocation3 + $0xd8] sm:$0x3]  ;;  %v5531_v18 = vsel %vm764_vm10, %v2021_v8, %v2022_v53 }
 0x49b   :  { %v5415_v33 = vld [vmem:[#allocation3 + $0xe0] sm:$0xff]  ;;  %1901 = vst.msk [vmem:[#allocation3 + $0x101] sm:$0xff] %vm165_vm15, %v1884_v16  ;;  %v3614_v16 = vld [vmem:[#allocation12 + $0x58] sm:$0xff]  ;;  %v2042_v27 = vrot.slane %v5413_v22, 1  ;;  %v2107_v53 = vrot.slane %v1931_v29, 2 }
 0x49c   :  { %3803 = vrot.lane.b32.xlu2 %v3802_v30, %s4370_s4  ;;  %v5423_v37 = vld [vmem:[#allocation3 + $0xb0] sm:$0xff]  ;;  %v3827_v57 = vpack.i.bf16 %v5415_v33, %v5413_v22  ;;  %v5446_v14 = vsel %vm764_vm10, %v2015_v20, %v2016_v31  ;;  %v5454_v61 = vld [vmem:[#allocation3 + $0xb8] sm:$0x3]  ;;  %6317 = vst [vmem:[#allocation18_spill] sm:$0xff] %v5499_v39  ;;  %v5513_v30 = vsel %vm764_vm10, %v2024_v6, %v2025_v32 }
 0x49d   :  { %v5425_v35 = vld [vmem:[#allocation3 + $0xc0] sm:$0xff]  ;;  %v5465_v44 = vpack.i.bf16 %v5449_v9, %v5446_v14  ;;  %v2036_v15 = vrot.slane %v5423_v37, 1  ;;  %v2037_v0 = vrot.slane %v5454_v61, 1  ;;  %6318 = vst [vmem:[#allocation19_spill] sm:$0xff] %v5513_v30  ;;  %v5518_v56 = vld [vmem:[#allocation3 + $0xc8] sm:$0x3]  ;;  %v5521_v20 = vsel %vm813_vm11, %v2097_v55, %v2098_v42  ;;  %2869 = vmatpush.bf16.msra.mxu2 %v3614_v16 }
 0x49e   :  { %v5431_v25 = vld [vmem:[#allocation3 + $0x70] sm:$0xff]  ;;  %v3822_v1 = vpack.i.bf16 %v5425_v35, %v5423_v37  ;;  %v5527_v12 = vld [vmem:[#allocation3 + $0x78] sm:$0x3]  ;;  %v2040_v55 = vrot.slane %v5518_v56, 1  ;;  %v1933_v42 = vld [vmem:[#allocation3 + $0xe8] sm:$0x3] }
 0x49f   :  { %v5433_v63 = vld [vmem:[#allocation3 + $0x80] sm:$0xff]  ;;  %v5502_v51 = vsel %vm764_vm10, %v2036_v15, %v2037_v0  ;;  %v5534_v15 = vsel %vm764_vm10, %v2027_v40, %v2028_v43  ;;  %v2039_v0 = vrot.slane %v5425_v35, 1  ;;  %v2031_v6 = vrot.slane %v5527_v12, 1 }
 0x4a0   :  { %3828 = vrot.lane.b32.xlu1 %v3827_v57, %s4370_s4  ;;  %v3817_v45 = vpack.i.bf16 %v5433_v63, %v5431_v25  ;;  %v5456_v10 = vld [vmem:[#allocation3 + $0x110] sm:$0xff]  ;;  %v5505_v17 = vld [vmem:[#allocation3 + $0x118] sm:$0x3]  ;;  %v5516_v57 = vsel %vm764_vm10, %v2012_v5, %v2013_v24  ;;  %v3862_v3 = vpack.i.bf16 %v5502_v51, %v5499_v39  ;;  %6319 = vst [vmem:[#allocation20_spill] sm:$0xff] %v5534_v15  ;;  %v2100_v32 = vrot.slane %v5423_v37, 2 }
 0x4a1   :  { %v5473_v21 = vld [vmem:[#allocation3 + $0xf0] sm:$0xff]  ;;  %v3837_v41 = vpack.i.bf16 %v5458_v34, %v5456_v10  ;;  %v2054_v31 = vrot.slane %v5456_v10, 1  ;;  %v3842_v50 = vpack.i.bf16 %v5516_v57, %v5509_v47  ;;  %v1935_v5 = vld [vmem:[#allocation3 + $0xf8] sm:$0x3]  ;;  %v2101_v24 = vrot.slane %v5454_v61, 2 }
 0x4a2   :  { %3823 = vrot.lane.b32.xlu0 %v3822_v1, %s4370_s4  ;;  %v5475_v26 = vld [vmem:[#allocation3 + $0x100] sm:$0xff]  ;;  %v1937_v19 = vld [vmem:[#allocation3 + $0x108] sm:$0x3]  ;;  %v2055_v1 = vrot.slane %v5505_v17, 1  ;;  %v2106_v40 = vrot.slane %v5413_v22, 2  ;;  %v2109_v61 = vrot.slane %v5415_v33, 2 }
 0x4a3   :  { %v3832_v48 = vpack.i.bf16 %v5475_v26, %v5473_v21  ;;  %v2051_v4 = vrot.slane %v5475_v26, 1  ;;  %v2052_v13 = vrot.slane %v1937_v19, 1  ;;  %v2110_v39 = vrot.slane %v1933_v42, 2 }
 0x4a4   :  { %3818 = vrot.lane.b32.xlu2 %v3817_v45, %s4370_s4  ;;  %v2043_v45 = vrot.slane %v1931_v29, 1  ;;  %v5550_v43 = vsel %vm764_vm10, %v2054_v31, %v2055_v1  ;;  %v3610_v31 = vld [vmem:[#allocation12 + $0x38] sm:$0xff]  ;;  %v2112_v29 = vrot.slane %v5473_v21, 2 }
 0x4a5   :  { %v5556_v16 = vsel %vm764_vm10, %v2051_v4, %v2052_v13  ;;  %v3618_v1 = vld [vmem:[#allocation12 + $0x78] sm:$0xff]  ;;  %2724 = vmatpush.bf16.msra.mxu1 %v3610_v31  ;;  %v2048_v31 = vrot.slane %v5473_v21, 1  ;;  %v2077_v13 = vrot.slane %v5469_v46, 2 }
 0x4a6   :  { %v5553_v8 = vsel %vm764_vm10, %v2042_v27, %v2043_v45  ;;  %v5567_v27 = vsel %vm813_vm11, %v2106_v40, %v2107_v53  ;;  %v2113_v45 = vrot.slane %v1935_v5, 2  ;;  %3014 = vmatpush.bf16.msra.mxu3 %v3618_v1  ;;  %v2115_v40 = vrot.slane %v5475_v26, 2 }
 0x4a7   :  { %v2119_v53 = vrot.slane %v5505_v17, 2  ;;  %v2049_v1 = vrot.slane %v1935_v5, 1 }
 0x4a8   :  { %3848 = vrot.lane.b32.xlu1 %v5465_v44, %s4375_s5 }
 0x4a9   :  { %v5615_v5 = vsel %vm764_vm10, %v2048_v31, %v2049_v1 }
 0x4aa   :  { %3838 = vrot.lane.b32.xlu0 %v3837_v41, %s4370_s4  ;;  %v2030_v41 = vrot.slane %v5431_v25, 1 }
 0x4ac   :  { %3833 = vrot.lane.b32.xlu2 %v3832_v48, %s4370_s4  ;;  %v3852_v48 = vpack.i.bf16 %v5513_v30, %v5531_v18  ;;  %v5571_v4 = vsel %vm764_vm10, %v2030_v41, %v2031_v6  ;;  %v2116_v41 = vrot.slane %v1937_v19, 2  ;;  %v2046_v19 = vrot.slane %v1933_v42, 1 }
 0x4b0   :  { %3863 = vrot.lane.b32.xlu1 %v3862_v3, %s4375_s5  ;;  %v5559_v3 = vsel %vm813_vm11, %v2100_v32, %v2101_v24  ;;  %v2114_v24 = vsel %vm813_vm11, %v2112_v29, %v2113_v45  ;;  %v2045_v32 = vrot.slane %v5415_v33, 1  ;;  %v2076_v45 = vrot.slane %v5403_v23, 2 }
 0x4b2   :  { %3843 = vrot.lane.b32.xlu0 %v3842_v50, %s4375_s5  ;;  %v5564_v50 = vsel %vm764_vm10, %v2039_v0, %v2040_v55  ;;  %v2111_v0 = vsel %vm813_vm11, %v2109_v61, %v2110_v39  ;;  %v5580_v55 = vpack.i.bf16 %v5550_v43, %v5556_v16  ;;  %v3857_v39 = vpack.i.bf16 %v5571_v4, %v5534_v15 }
 0x4b3   :  { %v5584_v6 = vpack.i.bf16 %v2114_v24, %v2111_v0  ;;  %v5594_v61 = vsel %vm813_vm11, %v2115_v40, %v2116_v41  ;;  %v5602_v17 = vpack.i.bf16 %v5553_v8, %v5564_v50  ;;  %v5609_v0 = vld [vmem:[#allocation3 + $0x88] sm:$0x3]  ;;  %v5612_v42 = vsel %vm764_vm10, %v2045_v32, %v2046_v19 }
 0x4b4   :  { %3853 = vrot.lane.b32.xlu2 %v3852_v48, %s4375_s5  ;;  %v2118_v48 = vrot.slane %v5456_v10, 2  ;;  %v3882_v24 = vpack.i.bf16 %v5446_v14, %v5516_v57  ;;  %v2125_v40 = vrot.slane %v5433_v63, 1  ;;  %v2126_v41 = vrot.slane %v5609_v0, 1 }
 0x4b5   :  { %v3887_v32 = vpack.i.bf16 %v5531_v18, %v5449_v9 }
 0x4b6   :  { %v5598_v29 = vsel %vm813_vm11, %v2118_v48, %v2119_v53  ;;  %v5624_v48 = vpack.i.bf16 %v5615_v5, %v5612_v42  ;;  %v2079_v53 = vrot.slane %v5406_v38, 2  ;;  %v5633_v31 = vsel %vm764_vm10, %v2125_v40, %v2126_v41 }
 0x4b7   :  { %v3897_v19 = vpack.i.bf16 %v5633_v31, %v5571_v4  ;;  %v2082_v40 = vrot.slane %v5394_v59, 2  ;;  %v2083_v41 = vrot.slane %v5421_v54, 2  ;;  %v2085_v54 = vrot.slane %v5397_v52, 2 }
 0x4b8   :  { %3878 = vrot.lane.b32.xlu1 %v5580_v55, %s4375_s5 }
 0x4ba   :  { %3858 = vrot.lane.b32.xlu0 %v3857_v39, %s4375_s5  ;;  %v2080_v39 = vrot.slane %v5419_v11, 2 }
 0x4bc   :  { %3868 = vrot.lane.b32.xlu2 %v5602_v17, %s4375_s5  ;;  %v2081_v1 = vsel %vm813_vm11, %v2079_v53, %v2080_v39  ;;  %v2078_v53 = vsel %vm813_vm11, %v2076_v45, %v2077_v13  ;;  %v2084_v39 = vsel %vm813_vm11, %v2082_v40, %v2083_v41  ;;  %v2088_v13 = vrot.slane %v5386_v36, 2  ;;  %v3609_v40 = vld [vmem:[#allocation12 + $0x30] sm:$0xff] }
 0x4bd   :  { %v3902_v11 = vpack.i.bf16 %v2081_v1, %v5502_v51  ;;  %v3907_v46 = vpack.i.bf16 %v2081_v1, %v2078_v53  ;;  %v2089_v45 = vrot.slane %v5467_v60, 2  ;;  %v3927_v1 = vpack.i.bf16 %v5531_v18, %v5516_v57  ;;  %2725 = vmatpush.bf16.msra.mxu1 %v3609_v40 }
 0x4be   :  { %v2091_v60 = vrot.slane %v5389_v2, 2 }
 0x4bf   :  { %v2090_v41 = vsel %vm813_vm11, %v2088_v13, %v2089_v45  ;;  %v1922_v13 = vld [vmem:[#allocation3 + $0x90] sm:$0xff]  ;;  %v1923_v45 = vld [vmem:[#allocation3 + $0x98] sm:$0x3] }
 0x4c0   :  { %3883 = vrot.lane.b32.xlu1 %v3882_v24, %s4376_s6  ;;  %v3892_v24 = vpack.i.bf16 %v5534_v15, %v5513_v30  ;;  %v2074_v30 = vrot.slane %v5461_v28, 2  ;;  %v3917_v15 = vpack.i.bf16 %v2078_v53, %v2084_v39 }
 0x4c2   :  { %3873 = vrot.lane.b32.xlu0 %v5624_v48, %s4375_s5 }
 0x4c4   :  { %3888 = vrot.lane.b32.xlu2 %v3887_v32, %s4376_s6  ;;  %v3613_v32 = vld [vmem:[#allocation12 + $0x50] sm:$0xff] }
 0x4c5   :  { %2870 = vmatpush.bf16.msra.mxu2 %v3613_v32  ;;  %v3617_v32 = vld [vmem:[#allocation12 + $0x70] sm:$0xff] }
 0x4c6   :  { %3015 = vmatpush.bf16.msra.mxu3 %v3617_v32  ;;  %v2150_v32 = vrot.slane %v1923_v45, 2 }
 0x4c8   :  { %3898 = vrot.lane.b32.xlu1 %v3897_v19, %s4376_s6  ;;  %v2073_v19 = vrot.slane %v5451_v49, 2 }
 0x4ca   :  { %3893 = vrot.lane.b32.xlu0 %v3892_v24, %s4376_s6 }
 0x4cc   :  { %3903 = vrot.lane.b32.xlu2 %v3902_v11, %s4376_s6  ;;  %v2086_v11 = vrot.slane %v5484_v7, 2 }
 0x4ce   :  { %v2087_v28 = vsel %vm813_vm11, %v2085_v54, %v2086_v11  ;;  %v2133_v11 = vrot.slane %v5433_v63, 2 }
 0x4cf   :  { %v3932_v53 = vpack.i.bf16 %v2090_v41, %v2087_v28  ;;  %v3952_v28 = vpack.i.bf16 %v1922_v13, %v5571_v4  ;;  %v2149_v41 = vrot.slane %v1922_v13, 2 }
 0x4d0   :  { %3913 = vrot.lane.b32.xlu1 %v5465_v44, %s4370_s4  ;;  %v2075_v44 = vsel %vm813_vm11, %v2073_v19, %v2074_v30  ;;  %v2092_v30 = vrot.slane %v5478_v62, 2  ;;  %v2095_v19 = vrot.slane %v5527_v12, 2  ;;  %v2134_v62 = vrot.slane %v5609_v0, 2 }
 0x4d1   :  { %v3922_v7 = vpack.i.bf16 %v2084_v39, %v2075_v44  ;;  %v2143_v12 = vrot.slane %v1922_v13, 1  ;;  %v3616_v13 = vld [vmem:[#allocation12 + $0x68] sm:$0xff] }
 0x4d2   :  { %3908 = vrot.lane.b32.xlu0 %v3907_v46, %s4375_s5  ;;  %v2094_v46 = vrot.slane %v5431_v25, 2  ;;  %v2135_v44 = vsel %vm813_vm11, %v2133_v11, %v2134_v62  ;;  %3016 = vmatpush.bf16.msra.mxu3 %v3616_v13 }
 0x4d4   :  { %3918 = vrot.lane.b32.xlu2 %v3917_v15, %s4376_s6  ;;  %v2093_v15 = vsel %vm813_vm11, %v2091_v60, %v2092_v30  ;;  %v2096_v54 = vsel %vm813_vm11, %v2094_v46, %v2095_v19  ;;  %v2103_v60 = vrot.slane %v5425_v35, 2  ;;  %v2104_v30 = vrot.slane %v5518_v56, 2  ;;  %v3612_v46 = vld [vmem:[#allocation12 + $0x48] sm:$0xff] }
 0x4d5   :  { %v3947_v39 = vpack.i.bf16 %v5633_v31, %v2093_v15  ;;  %v3957_v40 = vpack.i.bf16 %v2096_v54, %v2093_v15  ;;  %2871 = vmatpush.bf16.msra.mxu2 %v3612_v46  ;;  %v2136_v46 = vrot.slane %v5458_v34, 2 }
 0x4d8   :  { %3928 = vrot.lane.b32.xlu1 %v3927_v1, %s4370_s4  ;;  %v2144_v1 = vrot.slane %v1923_v45, 1 }
 0x4da   :  { %3923 = vrot.lane.b32.xlu0 %v3922_v7, %s4375_s5  ;;  %v2145_v0 = vsel %vm764_vm10, %v2143_v12, %v2144_v1  ;;  %v6321_v12 = vpack.i.bf16 %v5559_v3, %v5567_v27  ;;  %v1941_v1 = vld [vmem:[#allocation3 + $0x128] sm:$0x3] }
 0x4db   :  { %v3972_v7 = vpack.i.bf16 %v2135_v44, %v2145_v0  ;;  %v3967_v15 = vpack.i.bf16 %v2145_v0, %v5633_v31 }
 0x4dc   :  { %3933 = vrot.lane.b32.xlu2 %v3932_v53, %s4375_s5 }
 0x4e0   :  { %3943 = vrot.lane.b32.xlu1 %v3932_v53, %s4376_s6  ;;  %v2151_v53 = vsel %vm813_vm11, %v2149_v41, %v2150_v32  ;;  %v4022_v41 = vpack.i.bf16 %v5556_v16, %v5615_v5 }
 0x4e1   :  { %v3977_v19 = vpack.i.bf16 %v5564_v50, %v2151_v53  ;;  %v3605_v53 = vld [vmem:[#allocation12 + $0x10] sm:$0xff] }
 0x4e2   :  { %3938 = vrot.lane.b32.xlu0 %v3892_v24, %s4370_s4  ;;  %v3962_v24 = vpack.i.bf16 %v2135_v44, %v2096_v54  ;;  %v3608_v54 = vld [vmem:[#allocation12 + $0x28] sm:$0xff]  ;;  %v4007_v44 = vpack.i.bf16 %v5612_v42, %v5502_v51 }
 0x4e3   :  { %2726 = vmatpush.bf16.msra.mxu1 %v3608_v54  ;;  %v1943_v54 = vld [vmem:[#allocation3 + $0x138] sm:$0x3] }
 0x4e4   :  { %3948 = vrot.lane.b32.xlu2 %v3947_v39, %s4375_s5  ;;  %v2105_v39 = vsel %vm813_vm11, %v2103_v60, %v2104_v30  ;;  %v3607_v60 = vld [vmem:[#allocation12 + $0x20] sm:$0xff]  ;;  %v3604_v30 = vld [vmem:[#allocation12 + $0x8] sm:$0xff] }
 0x4e5   :  { %v3987_v62 = vpack.i.bf16 %v2105_v39, %v5553_v8  ;;  %v3982_v56 = vpack.i.bf16 %v2105_v39, %v5559_v3  ;;  %v1942_v39 = vld [vmem:[#allocation3 + $0x130] sm:$0xff] }
 0x4e7   :  { %2727 = vmatpush.bf16.msra.mxu1 %v3607_v60 }
 0x4e8   :  { %3958 = vrot.lane.b32.xlu1 %v3957_v40, %s4376_s6  ;;  %v6320_v40 = vpack.i.bf16 %v5567_v27, %v5521_v20  ;;  %v3606_v20 = vld [vmem:[#allocation12 + $0x18] sm:$0xff] }
 0x4e9   :  { %2411 = vmatpush.bf16.msra.mxu0 %v3606_v20 }
 0x4ea   :  { %3953 = vrot.lane.b32.xlu0 %v3952_v28, %s4370_s4 }
 0x4ec   :  { %3963 = vrot.lane.b32.xlu2 %v3962_v24, %s4375_s5  ;;  %v2129_v24 = vrot.slane %v1941_v1, 1 }
 0x4ed   :  { %2412 = vmatpush.bf16.msra.mxu0 %v3605_v53  ;;  %v2152_v53 = vrot.slane %v1942_v39, 2 }
 0x4f0   :  { %3973 = vrot.lane.b32.xlu1 %v3972_v7, %s4376_s6  ;;  %v3611_v7 = vld [vmem:[#allocation12 + $0x40] sm:$0xff] }
 0x4f1   :  { %2872 = vmatpush.bf16.msra.mxu2 %v3611_v7  ;;  %2413 = vmatpush.bf16.msra.mxu0 %v3604_v30  ;;  %v2153_v30 = vrot.slane %v1943_v54, 2 }
 0x4f2   :  { %3968 = vrot.lane.b32.xlu0 %v3967_v15, %s4370_s4 }
 0x4f4   :  { %3978 = vrot.lane.b32.xlu2 %v3977_v19, %s4376_s6  ;;  %v2137_v19 = vrot.slane %v1941_v1, 2  ;;  %v4042_v1 = vpack.i.bf16 %v1942_v39, %v5550_v43 }
 0x4f6   :  { %v5696_v11 = vpop.permute.xlu2 %3803  ;;  %v2138_v13 = vsel %vm813_vm11, %v2136_v46, %v2137_v19  ;;  %v2154_v19 = vsel %vm813_vm11, %v2152_v53, %v2153_v30 }
 0x4f7   :  { %v4052_v7 = vpack.i.bf16 %v2138_v13, %v5598_v29 }
 0x4f8   :  { %3988 = vrot.lane.b32.xlu1 %v3987_v62, %s4376_s6 }
 0x4fa   :  { %3983 = vrot.lane.b32.xlu0 %v3982_v56, %s4375_s5 }
 0x4fc   :  { %3993 = vrot.lane.b32.xlu2 %v5602_v17, %s4370_s4  ;;  %v2128_v17 = vrot.slane %v5458_v34, 1  ;;  %v6322_v34 = vpack.i.bf16 %v5598_v29, %v5594_v61 }
 0x4fe   :  { %v5704_v45 = vpop.permute.xlu2 %3818  ;;  %v5729_v27 = vsel %vm764_vm10, %v2128_v17, %v2129_v24 }
 0x500   :  { %4003 = vrot.lane.b32.xlu1 %v6320_v40, %s4375_s5  ;;  %v2146_v40 = vrot.slane %v1942_v39, 1  ;;  %v4067_v39 = vpack.i.bf16 %v2154_v19, %v2138_v13 }
 0x502   :  { %3998 = vrot.lane.b32.xlu0 %v6321_v12, %s4376_s6 }
 0x504   :  { %4008 = vrot.lane.b32.xlu2 %v4007_v44, %s4370_s4  ;;  %v2147_v44 = vrot.slane %v1943_v54, 1 }
 0x506   :  { %v5717_v28 = vpop.permute.xlu2 %3833 }
 0x508   :  { %4018 = vrot.lane.b32.xlu1 %v5624_v48, %s4376_s6  ;;  %v4032_v48 = vpack.i.bf16 %v5729_v27, %v5594_v61  ;;  %v2148_v61 = vsel %vm764_vm10, %v2146_v40, %v2147_v44 }
 0x509   :  { %v4062_v46 = vpack.i.bf16 %v2148_v61, %v5729_v27 }
 0x50a   :  { %4013 = vrot.lane.b32.xlu0 %v5584_v6, %s4375_s5  ;;  %v5726_v3 = vpop.permute.xlu1 %3813 }
 0x50c   :  { %4023 = vrot.lane.b32.xlu2 %v4022_v41, %s4370_s4  ;;  %v5732_v32 = vpop.permute.xlu0 %3808  ;;  %v3615_v41 = vld [vmem:[#allocation12 + $0x60] sm:$0xff] }
 0x50d   :  { %3017 = vmatpush.bf16.msra.mxu3 %v3615_v41 }
 0x50e   :  { %v5734_v0 = vpop.permute.xlu2 %3853 }
 0x510   :  { %4033 = vrot.lane.b32.xlu1 %v4032_v48, %s4375_s5  ;;  %v3603_v48 = vld [vmem:[#allocation12] sm:$0xff] }
 0x511   :  { %2414 = vmatpush.bf16.msra.mxu0 %v3603_v48 }
 0x512   :  { %4028 = vrot.lane.b32.xlu0 %v5584_v6, %s4376_s6  ;;  %v3829_v15 = vpop.permute.xlu1 %3828 }
 0x513   :  { %v3831_v12 = vunpack.i.h.bf16 %v3829_v15  ;;  %v3830_v17 = vunpack.i.l.bf16 %v3829_v15 }
 0x514   :  { %4038 = vrot.lane.b32.xlu2 %v5580_v55, %s4376_s6  ;;  %v3824_v62 = vpop.permute.xlu0 %3823 }
 0x515   :  { %v3825_v44 = vunpack.i.l.bf16 %v3824_v62 }
 0x516   :  { %v3869_v56 = vpop.permute.xlu2 %3868 }
 0x517   :  { %v3871_v6 = vunpack.i.h.bf16 %v3869_v56  ;;  %v3870_v24 = vunpack.i.l.bf16 %v3869_v56 }
 0x518   :  { %4048 = vrot.lane.b32.xlu1 %v6322_v34, %s4376_s6  ;;  %v3826_v34 = vunpack.i.h.bf16 %v3824_v62 }
 0x519   :  { %v2310_v55 = vsel %vm165_vm15, %v5413_v22, %v3871_v6  ;;  %v2309_v20 = vsel %vm165_vm15, %v5425_v35, %v3870_v24 }
 0x51a   :  { %4043 = vrot.lane.b32.xlu0 %v4042_v1, %s4370_s4  ;;  %v5756_v60 = vpop.permute.xlu1 %3848  ;;  %v5760_v15 = vsel %vm119_vm4, %v2309_v20, %v3830_v17  ;;  %v5763_v22 = vsel %vm119_vm4, %v2310_v55, %v3831_v12 }
 0x51b   :  { %v3850_v1 = vunpack.i.l.bf16 %v5756_v60 }
 0x51c   :  { %4053 = vrot.lane.b32.xlu2 %v4052_v7, %s4375_s5  ;;  %v3839_v35 = vpop.permute.xlu0 %3838 }
 0x51d   :  { %v2301_v30 = vsel %vm165_vm15, %v5406_v38, %v3850_v1  ;;  %v3840_v62 = vunpack.i.l.bf16 %v3839_v35 }
 0x51e   :  { %v5766_v29 = vpop.permute.xlu2 %3888 }
 0x520   :  { %4063 = vrot.lane.b32.xlu1 %v4062_v46, %s4370_s4 }
 0x522   :  { %4058 = vrot.lane.b32.xlu0 %v4062_v46, %s4376_s6  ;;  %v3864_v54 = vpop.permute.xlu1 %3863 }
 0x523   :  { %v3866_v56 = vunpack.i.h.bf16 %v3864_v54  ;;  %v3865_v40 = vunpack.i.l.bf16 %v3864_v54 }
 0x524   :  { %4068 = vrot.lane.b32.xlu2 %v4067_v39, %s4376_s6  ;;  %v3844_v12 = vpop.permute.xlu0 %3843 }
 0x525   :  { %v2307_v17 = vsel %vm165_vm15, %v5443_v58, %v3865_v40  ;;  %v2308_v13 = vsel %vm165_vm15, %v5423_v37, %v3866_v56  ;;  %v3846_v7 = vunpack.i.h.bf16 %v3844_v12  ;;  %v3845_v58 = vunpack.i.l.bf16 %v3844_v12 }
 0x526   :  { %v5776_v6 = vsel %vm119_vm4, %v2307_v17, %v3825_v44  ;;  %v5778_v24 = vpop.permute.xlu2 %3903  ;;  %v5784_v20 = vsel %vm119_vm4, %v2308_v13, %v3826_v34  ;;  %v3810_v37 = vunpack.i.l.bf16 %v5732_v32  ;;  %v3806_v56 = vunpack.i.h.bf16 %v5696_v11 }
 0x527   :  { %v2300_v39 = vsel %vm165_vm15, %v5403_v23, %v3846_v7  ;;  %v2299_v54 = vsel %vm165_vm15, %v5451_v49, %v3845_v58  ;;  %v3805_v40 = vunpack.i.l.bf16 %v5696_v11  ;;  %v3841_v44 = vunpack.i.h.bf16 %v3839_v35 }
 0x528   :  { %v2317_v19 = vsel %vm119_vm4, %v2301_v30, %v3810_v37  ;;  %v3890_v12 = vunpack.i.l.bf16 %v5766_v29  ;;  %v2316_v1 = vsel %vm119_vm4, %v2300_v39, %v3806_v56  ;;  %v3851_v39 = vunpack.i.h.bf16 %v5756_v60 }
 0x529   :  { %v2315_v49 = vsel %vm119_vm4, %v2299_v54, %v3805_v40 }
 0x52a   :  { %v3879_v55 = vpop.permute.xlu1 %3878  ;;  %v2334_v23 = vsel %vm2331_vm6, %v2317_v19, %v3890_v12  ;;  %v3835_v19 = vunpack.i.l.bf16 %v5717_v28  ;;  %v2302_v40 = vsel %vm165_vm15, %v5394_v59, %v3851_v39 }
 0x52b   :  { %v3880_v41 = vunpack.i.l.bf16 %v3879_v55  ;;  %v3881_v53 = vunpack.i.h.bf16 %v3879_v55 }
 0x52c   :  { %v5786_v48 = vpop.permute.xlu0 %3858 }
 0x52d   :  { %v2313_v46 = vsel %vm165_vm15, %v5475_v26, %v3880_v41  ;;  %v2314_v38 = vsel %vm165_vm15, %v5456_v10, %v3881_v53 }
 0x52e   :  { %v5790_v61 = vpop.permute.xlu2 %3918  ;;  %v5806_v34 = vsel %vm119_vm4, %v2313_v46, %v3840_v62  ;;  %v5812_v55 = vsel %vm119_vm4, %v2314_v38, %v3841_v44  ;;  %v3836_v46 = vunpack.i.h.bf16 %v5717_v28  ;;  %v3855_v38 = vunpack.i.l.bf16 %v5734_v0 }
 0x52f   :  { %v3815_v44 = vunpack.i.l.bf16 %v5726_v3  ;;  %v3811_v28 = vunpack.i.h.bf16 %v5732_v32 }
 0x530   :  { %v2303_v12 = vsel %vm165_vm15, %v5397_v52, %v3855_v38 }
 0x532   :  { %v3884_v17 = vpop.permute.xlu1 %3883 }
 0x533   :  { %v3886_v26 = vunpack.i.h.bf16 %v3884_v17  ;;  %v3885_v13 = vunpack.i.l.bf16 %v3884_v17 }
 0x534   :  { %v3874_v10 = vpop.permute.xlu0 %3873 }
 0x535   :  { %v2332_v11 = vsel %vm2331_vm6, %v2315_v49, %v3885_v13  ;;  %v2333_v35 = vsel %vm2331_vm6, %v2316_v1, %v3886_v26  ;;  %v3876_v41 = vunpack.i.h.bf16 %v3874_v10  ;;  %v3875_v7 = vunpack.i.l.bf16 %v3874_v10 }
 0x536   :  { %v5816_v58 = vpop.permute.xlu2 %3933  ;;  %v2348_v53 = vpack.c.bf16 %v2333_v35, %v2332_v11  ;;  %v2809_v30 = vpack.c.bf16 %v2334_v23, %v2333_v35  ;;  %v2318_v26 = vsel %vm119_vm4, %v2302_v40, %v3811_v28  ;;  %v3891_v13 = vunpack.i.h.bf16 %v5766_v29 }
 0x537   :  { %v2312_v37 = vsel %vm165_vm15, %v5473_v21, %v3876_v41  ;;  %v2311_v62 = vsel %vm165_vm15, %v5415_v33, %v3875_v7  ;;  %v2319_v1 = vsel %vm119_vm4, %v2303_v12, %v3815_v44  ;;  %v3906_v29 = vunpack.i.h.bf16 %v5778_v24 }
 0x538   :  { %3491 = vmatmul.msk.bf16.vlgmr.msra.gmra.mxu0 %vm1191_vm13, %v2348_v53  ;;  %3539 = vmatmul.msk.bf16.vlgmr.msra.gmra.mxu2 %vm1191_vm13, %v2809_v30  ;;  %v5831_v56 = vsel %vm119_vm4, %v2312_v37, %v3836_v46  ;;  %v5834_v21 = vsel %vm119_vm4, %v2311_v62, %v3835_v19  ;;  %v2335_v59 = vsel %vm2331_vm6, %v2318_v26, %v3891_v13  ;;  %v3920_v37 = vunpack.i.l.bf16 %v5790_v61 }
 0x539   :  { %v2349_v53 = vpack.c.bf16 %v2335_v59, %v2334_v23  ;;  %v3856_v23 = vunpack.i.h.bf16 %v5734_v0  ;;  %v3816_v28 = vunpack.i.h.bf16 %v5726_v3  ;;  %v3820_v26 = vunpack.i.l.bf16 %v5704_v45 }
 0x53a   :  { %v5827_v54 = vpop.permute.xlu1 %3898 }
 0x53b   :  { %v2304_v0 = vsel %vm165_vm15, %v5386_v36, %v3856_v23 }
 0x53c   :  { %v5836_v33 = vpop.permute.xlu0 %3893 }
 0x53d   :  { %v3895_v17 = vunpack.i.l.bf16 %v5836_v33 }
 0x53e   :  { %v5842_v60 = vpop.permute.xlu2 %3948 }
 0x53f   :  { %v5852_v10 = vsel %vm2331_vm6, %v2319_v1, %v3895_v17  ;;  %v3921_v1 = vunpack.i.h.bf16 %v5790_v61 }
 0x540   :  { %v2810_v30 = vpack.c.bf16 %v5852_v10, %v2335_v59 }
 0x542   :  { %v3914_v49 = vpop.permute.xlu1 %3913 }
 0x543   :  { %v3916_v32 = vunpack.i.h.bf16 %v3914_v49  ;;  %v3915_v11 = vunpack.i.l.bf16 %v3914_v49  ;;  %v3905_v49 = vunpack.i.l.bf16 %v5778_v24 }
 0x544   :  { %v3909_v35 = vpop.permute.xlu0 %3908 }
 0x545   :  { %v3911_v41 = vunpack.i.h.bf16 %v3909_v35  ;;  %v3910_v7 = vunpack.i.l.bf16 %v3909_v35  ;;  %v3896_v35 = vunpack.i.h.bf16 %v5836_v33  ;;  %v5892_v24 = vsel %vm2331_vm6, %v5776_v6, %v3905_v49 }
 0x546   :  { %v5854_v52 = vpop.permute.xlu2 %3963 }
 0x547   :  { %v2618_v62 = vsel %vm165_vm15, %v5446_v14, %v3911_v41  ;;  %v2617_v46 = vsel %vm165_vm15, %v5516_v57, %v3910_v7  ;;  %v3860_v14 = vunpack.i.l.bf16 %v5786_v48 }
 0x548   :  { %v2634_v19 = vsel %vm119_vm4, %v2618_v62, %v3916_v32  ;;  %v2633_v39 = vsel %vm119_vm4, %v2617_v46, %v3915_v11  ;;  %3492 = vmatmul.msk.bf16.gmra.mxu0 %vm1191_vm13, %v2349_v53  ;;  %3540 = vmatmul.msk.bf16.gmra.mxu2 %vm1191_vm13, %v2810_v30  ;;  %v3900_v11 = vunpack.i.l.bf16 %v5827_v54 }
 0x549   :  { %v5869_v38 = vsel %vm2331_vm6, %v2634_v19, %v3920_v37  ;;  %v2649_v40 = vsel %vm2331_vm6, %v2633_v39, %v3906_v29  ;;  %v2305_v59 = vsel %vm165_vm15, %v5389_v2, %v3860_v14  ;;  %v2320_v2 = vsel %vm119_vm4, %v2304_v0, %v3816_v28 }
 0x54a   :  { %v2954_v44 = vpack.c.bf16 %v5869_v38, %v2649_v40  ;;  %v3929_v57 = vpop.permute.xlu1 %3928  ;;  %v2321_v30 = vsel %vm119_vm4, %v2305_v59, %v3820_v26  ;;  %v3935_v29 = vunpack.i.l.bf16 %v5816_v58  ;;  %v2337_v19 = vsel %vm2331_vm6, %v2320_v2, %v3896_v35 }
 0x54b   :  { %v3930_v12 = vunpack.i.l.bf16 %v3929_v57  ;;  %v3931_v53 = vunpack.i.h.bf16 %v3929_v57  ;;  %v3901_v59 = vunpack.i.h.bf16 %v5827_v54  ;;  %v3950_v35 = vunpack.i.l.bf16 %v5842_v60 }
 0x54c   :  { %v3924_v17 = vpop.permute.xlu0 %3923  ;;  %3563 = vmatmul.msk.bf16.vlgmr.msra.gmra.mxu3 %vm1191_vm13, %v2954_v44  ;;  %v2620_v57 = vsel %vm165_vm15, %v5531_v18, %v3935_v29  ;;  %v3861_v18 = vunpack.i.h.bf16 %v5786_v48  ;;  %v3936_v48 = vunpack.i.h.bf16 %v5816_v58 }
 0x54d   :  { %v3925_v13 = vunpack.i.l.bf16 %v3924_v17  ;;  %v3926_v3 = vunpack.i.h.bf16 %v3924_v17 }
 0x54e   :  { %v5883_v32 = vpop.permute.xlu2 %3978 }
 0x54f   :  { %v3981_v41 = vunpack.i.h.bf16 %v5883_v32  ;;  %v2616_v36 = vsel %vm165_vm15, %v5509_v47, %v3925_v13  ;;  %v2619_v6 = vsel %vm165_vm15, %v5449_v9, %v3926_v3  ;;  %v2350_v9 = vpack.c.bf16 %v2337_v19, %v5852_v10 }
 0x550   :  { %v2632_v61 = vsel %vm119_vm4, %v2616_v36, %v3930_v12  ;;  %v2635_v44 = vsel %vm119_vm4, %v2619_v6, %v3931_v53  ;;  %v2306_v10 = vsel %vm165_vm15, %v5431_v25, %v3861_v18 }
 0x551   :  { %v5898_v7 = vsel %vm2331_vm6, %v5784_v20, %v3981_v41  ;;  %v2648_v33 = vsel %vm2331_vm6, %v2632_v61, %v3921_v1  ;;  %v2338_v20 = vsel %vm2331_vm6, %v2321_v30, %v3900_v11  ;;  %v3951_v1 = vunpack.i.h.bf16 %v5842_v60  ;;  %v6323_v30 = vld [vmem:[#allocation20_spill] sm:$0xff] }
 0x552   :  { %v2352_v47 = vpack.c.bf16 %v5898_v7, %v5892_v24  ;;  %v2664_v37 = vpack.c.bf16 %v2649_v40, %v2648_v33  ;;  %v3944_v62 = vpop.permute.xlu1 %3943  ;;  %v2811_v40 = vpack.c.bf16 %v2338_v20, %v2337_v19  ;;  %v3821_v11 = vunpack.i.h.bf16 %v5704_v45 }
 0x553   :  { %v3945_v46 = vunpack.i.l.bf16 %v3944_v62  ;;  %v3946_v39 = vunpack.i.h.bf16 %v3944_v62  ;;  %v2803_v2 = vsel %vm165_vm15, %v5433_v63, %v3951_v1  ;;  %v2622_v45 = vsel %vm165_vm15, %v6323_v30, %v3950_v35  ;;  %v6324_v63 = vld [vmem:[#allocation19_spill] sm:$0xff] }
 0x554   :  { %v3939_v23 = vpop.permute.xlu0 %3938  ;;  %3515 = vmatmul.msk.bf16.vlgmr.msra.gmra.mxu1 %vm1191_vm13, %v2664_v37  ;;  %v2322_v61 = vsel %vm119_vm4, %v2306_v10, %v3821_v11 }
 0x555   :  { %v3940_v14 = vunpack.i.l.bf16 %v3939_v23  ;;  %v2651_v12 = vsel %vm2331_vm6, %v2635_v44, %v3945_v46  ;;  %v2339_v25 = vsel %vm2331_vm6, %v2322_v61, %v3901_v59  ;;  %v3941_v53 = vunpack.i.h.bf16 %v3939_v23 }
 0x556   :  { %v5913_v28 = vpop.permute.xlu2 %3993  ;;  %v2665_v54 = vpack.c.bf16 %v2651_v12, %v5869_v38  ;;  %v2621_v46 = vsel %vm165_vm15, %v6324_v63, %v3936_v48 }
 0x557   :  { %v2636_v17 = vsel %vm119_vm4, %v2620_v57, %v3940_v14  ;;  %v2637_v38 = vsel %vm119_vm4, %v2621_v46, %v3941_v53  ;;  %v3996_v46 = vunpack.i.h.bf16 %v5913_v28 }
 0x558   :  { %3493 = vmatmul.msk.bf16.gmra.mxu0 %vm1191_vm13, %v2350_v9  ;;  %3541 = vmatmul.msk.bf16.gmra.mxu2 %vm1191_vm13, %v2811_v40  ;;  %v5921_v26 = vsel %vm2331_vm6, %v2636_v17, %v3946_v39  ;;  %v2351_v39 = vpack.c.bf16 %v2339_v25, %v2338_v20 }
 0x559   :  { %v2955_v0 = vpack.c.bf16 %v5921_v26, %v2651_v12 }
 0x55a   :  { %v3959_v13 = vpop.permute.xlu1 %3958 }
 0x55b   :  { %v3961_v29 = vunpack.i.h.bf16 %v3959_v13  ;;  %v3960_v60 = vunpack.i.l.bf16 %v3959_v13  ;;  %v3966_v13 = vunpack.i.h.bf16 %v5854_v52 }
 0x55c   :  { %v3954_v49 = vpop.permute.xlu0 %3953  ;;  %3564 = vmatmul.msk.bf16.gmra.mxu3 %vm1191_vm13, %v2955_v0 }
 0x55d   :  { %v3956_v41 = vunpack.i.h.bf16 %v3954_v49  ;;  %v3955_v36 = vunpack.i.l.bf16 %v3954_v49  ;;  %v2653_v44 = vsel %vm2331_vm6, %v2637_v38, %v3960_v60  ;;  %v3965_v49 = vunpack.i.l.bf16 %v5854_v52 }
 0x55e   :  { %v5930_v3 = vpop.permute.xlu2 %4008  ;;  %v2666_v48 = vpack.c.bf16 %v2653_v44, %v5921_v26  ;;  %v2948_v52 = vsel %vm165_vm15, %v5633_v31, %v3966_v13 }
 0x55f   :  { %v2805_v37 = vsel %vm119_vm4, %v2803_v2, %v3956_v41  ;;  %v2638_v58 = vsel %vm119_vm4, %v2622_v45, %v3955_v36  ;;  %v2623_v61 = vsel %vm165_vm15, %v5571_v4, %v3965_v49 }
 0x560   :  { %v2654_v57 = vsel %vm2331_vm6, %v2638_v58, %v3961_v29 }
 0x561   :  { %v2956_v40 = vpack.c.bf16 %v2654_v57, %v2653_v44 }
 0x562   :  { %v3974_v33 = vpop.permute.xlu1 %3973 }
 0x563   :  { %v3975_v6 = vunpack.i.l.bf16 %v3974_v33  ;;  %v3976_v2 = vunpack.i.h.bf16 %v3974_v33 }
 0x564   :  { %v3969_v62 = vpop.permute.xlu0 %3968  ;;  %3516 = vmatmul.msk.bf16.gmra.mxu1 %vm1191_vm13, %v2665_v54 }
 0x565   :  { %v2807_v19 = vsel %vm2331_vm6, %v2805_v37, %v3975_v6  ;;  %v3971_v59 = vunpack.i.h.bf16 %v3969_v62  ;;  %v3970_v11 = vunpack.i.l.bf16 %v3969_v62 }
 0x566   :  { %v5949_v23 = vpop.permute.xlu2 %4023  ;;  %v2812_v14 = vpack.c.bf16 %v2807_v19, %v2339_v25 }
 0x567   :  { %v2639_v25 = vsel %vm119_vm4, %v2623_v61, %v3970_v11  ;;  %v4011_v11 = vunpack.i.h.bf16 %v5930_v3 }
 0x568   :  { %3494 = vmatmul.msk.bf16.gmra.mxu0 %vm1191_vm13, %v2351_v39  ;;  %3542 = vmatmul.msk.bf16.gmra.mxu2 %vm1191_vm13, %v2812_v14  ;;  %v2655_v54 = vsel %vm2331_vm6, %v2639_v25, %v3976_v2 }
 0x569   :  { %v2667_v37 = vpack.c.bf16 %v2655_v54, %v2654_v57  ;;  %v4010_v57 = vunpack.i.l.bf16 %v5930_v3 }
 0x56a   :  { %v3989_v9 = vpop.permute.xlu1 %3988 }
 0x56b   :  { %v3990_v12 = vunpack.i.l.bf16 %v3989_v9  ;;  %v3991_v14 = vunpack.i.h.bf16 %v3989_v9 }
 0x56c   :  { %v3984_v17 = vpop.permute.xlu0 %3983  ;;  %3565 = vmatmul.msk.bf16.gmra.mxu3 %vm1191_vm13, %v2956_v40 }
 0x56d   :  { %v2342_v20 = vsel %vm2331_vm6, %v5760_v15, %v3990_v12  ;;  %v3985_v6 = vunpack.i.l.bf16 %v3984_v17 }
 0x56e   :  { %v4039_v0 = vpop.permute.xlu2 %4038  ;;  %v2813_v18 = vpack.c.bf16 %v2342_v20, %v5898_v7 }
 0x56f   :  { %v4041_v10 = vunpack.i.h.bf16 %v4039_v0  ;;  %v4040_v1 = vunpack.i.l.bf16 %v4039_v0  ;;  %v2625_v62 = vsel %vm165_vm15, %v5502_v51, %v3985_v6  ;;  %v6325_v51 = vld [vmem:[#allocation18_spill] sm:$0xff] }
 0x571   :  { %v5963_v35 = vsel %vm2331_vm6, %v5806_v34, %v4041_v10  ;;  %v5967_v41 = vsel %vm2331_vm6, %v5831_v56, %v4040_v1  ;;  %v2950_v34 = vsel %vm119_vm4, %v2948_v52, %v3971_v59  ;;  %v3980_v56 = vunpack.i.l.bf16 %v5883_v32 }
 0x572   :  { %v2815_v15 = vpack.c.bf16 %v5963_v35, %v5967_v41  ;;  %v4004_v36 = vpop.permute.xlu1 %4003 }
 0x573   :  { %v2952_v26 = vsel %vm2331_vm6, %v2950_v34, %v3980_v56 }
 0x574   :  { %v3999_v53 = vpop.permute.xlu0 %3998  ;;  %3517 = vmatmul.msk.bf16.gmra.mxu1 %vm1191_vm13, %v2666_v48  ;;  %v2957_v31 = vpack.c.bf16 %v2952_v26, %v2655_v54  ;;  %v4025_v48 = vunpack.i.l.bf16 %v5949_v23 }
 0x575   :  { %v4000_v63 = vunpack.i.l.bf16 %v3999_v53  ;;  %v4001_v9 = vunpack.i.h.bf16 %v3999_v53 }
 0x578   :  { %3495 = vmatmul.msk.bf16.gmra.mxu0 %vm1191_vm13, %v2352_v47  ;;  %3543 = vmatmul.msk.bf16.gmra.mxu2 %vm1191_vm13, %v2813_v18  ;;  %v3986_v47 = vunpack.i.h.bf16 %v3984_v17 }
 0x57a   :  { %v4019_v4 = vpop.permute.xlu1 %4018  ;;  %v2626_v58 = vsel %vm165_vm15, %v5564_v50, %v3986_v47 }
 0x57b   :  { %v4021_v33 = vunpack.i.h.bf16 %v4019_v4  ;;  %v4020_v30 = vunpack.i.l.bf16 %v4019_v4  ;;  %v2642_v39 = vsel %vm119_vm4, %v2626_v58, %v3996_v46 }
 0x57c   :  { %v5987_v45 = vpop.permute.xlu0 %4013  ;;  %3566 = vmatmul.msk.bf16.gmra.mxu3 %vm1191_vm13, %v2957_v31  ;;  %v2658_v44 = vsel %vm2331_vm6, %v2642_v39, %v4000_v63 }
 0x57d   :  { %v2343_v32 = vsel %vm2331_vm6, %v5763_v22, %v4020_v30  ;;  %v2344_v29 = vsel %vm2331_vm6, %v5834_v21, %v4021_v33  ;;  %v3995_v22 = vunpack.i.l.bf16 %v5913_v28  ;;  %v4005_v21 = vunpack.i.l.bf16 %v4004_v36  ;;  %v4209_v30 = vld [vmem:[#allocation3 + $0x120] sm:$0xff] }
 0x57e   :  { %v2353_v60 = vpack.c.bf16 %v2343_v32, %v2342_v20  ;;  %v2354_v24 = vpack.c.bf16 %v5967_v41, %v2344_v29  ;;  %v2814_v7 = vpack.c.bf16 %v2344_v29, %v2343_v32  ;;  %v4006_v20 = vunpack.i.h.bf16 %v4004_v36 }
 0x57f   :  { %v2641_v38 = vsel %vm119_vm4, %v2625_v62, %v3995_v22  ;;  %v2624_v50 = vsel %vm165_vm15, %v6325_v51, %v4005_v21  ;;  %v4015_v18 = vunpack.i.l.bf16 %v5987_v45  ;;  %v4016_v54 = vunpack.i.h.bf16 %v5987_v45  ;;  %v4054_v62 = vpop.permute.xlu2 %4053 }
 0x580   :  { %v2657_v28 = vsel %vm2331_vm6, %v2641_v38, %v3991_v14  ;;  %v2640_v12 = vsel %vm119_vm4, %v2624_v50, %v4010_v57  ;;  %v2627_v49 = vsel %vm165_vm15, %v5553_v8, %v4006_v20  ;;  %v4056_v63 = vunpack.i.h.bf16 %v4054_v62 }
 0x581   :  { %v2958_v40 = vpack.c.bf16 %v2658_v44, %v2657_v28  ;;  %v2656_v0 = vsel %vm2331_vm6, %v2640_v12, %v4001_v9  ;;  %v2628_v10 = vsel %vm165_vm15, %v5612_v42, %v4015_v18  ;;  %v2643_v2 = vsel %vm119_vm4, %v2627_v49, %v4011_v11  ;;  %v6064_v12 = vld [vmem:[%s6312_s8] ss:$0 sm:$0xff]  ;;  %s4378_s8 = smov 9  }
 0x582   :  { %v2668_v13 = vpack.c.bf16 %v2657_v28, %v2656_v0  ;;  %v4034_v61 = vpop.permute.xlu1 %4033  ;;  %v2644_v34 = vsel %vm119_vm4, %v2628_v10, %v4025_v48  ;;  %v2629_v29 = vsel %vm165_vm15, %v5615_v5, %v4016_v54  ;;  %v4055_v46 = vunpack.i.l.bf16 %v4054_v62 }
 0x583   :  { %v4036_v56 = vunpack.i.h.bf16 %v4034_v61  ;;  %v4035_v4 = vunpack.i.l.bf16 %v4034_v61  ;;  %v2949_v39 = vsel %vm165_vm15, %v5729_v27, %v4056_v63 }
 0x584   :  { %v4029_v19 = vpop.permute.xlu0 %4028  ;;  %3518 = vmatmul.msk.bf16.gmra.mxu1 %vm1191_vm13, %v2667_v37  ;;  %v2631_v14 = vsel %vm165_vm15, %v5550_v43, %v4055_v46 }
 0x585   :  { %v4031_v1 = vunpack.i.h.bf16 %v4029_v19  ;;  %v4030_v59 = vunpack.i.l.bf16 %v4029_v19  ;;  %v2804_v32 = vsel %vm165_vm15, %v4209_v30, %v4036_v56 }
 0x587   :  { %v2659_v8 = vsel %vm2331_vm6, %v2643_v2, %v4030_v59  ;;  %v2660_v25 = vsel %vm2331_vm6, %v2644_v34, %v4031_v1  ;;  %v4069_v21 = vpop.permute.xlu2 %4068 }
 0x588   :  { %3496 = vmatmul.msk.bf16.gmra.mxu0 %vm1191_vm13, %v2353_v60  ;;  %3544 = vmatmul.msk.bf16.gmra.mxu2 %vm1191_vm13, %v2814_v7  ;;  %v2959_v53 = vpack.c.bf16 %v2660_v25, %v2659_v8  ;;  %v4026_v7 = vunpack.i.h.bf16 %v5949_v23  ;;  %v4071_v50 = vunpack.i.h.bf16 %v4069_v21  ;;  %v4070_v28 = vunpack.i.l.bf16 %v4069_v21 }
 0x58a   :  { %v4049_v33 = vpop.permute.xlu1 %4048  ;;  %v2645_v6 = vsel %vm119_vm4, %v2629_v29, %v4026_v7 }
 0x58b   :  { %v4051_v60 = vunpack.i.h.bf16 %v4049_v33 }
 0x58c   :  { %v4044_v17 = vpop.permute.xlu0 %4043  ;;  %3567 = vmatmul.msk.bf16.gmra.mxu3 %vm1191_vm13, %v2958_v40 }
 0x58d   :  { %v4046_v26 = vunpack.i.h.bf16 %v4044_v17 }
 0x58f   :  { %v2806_v41 = vsel %vm119_vm4, %v2804_v32, %v4046_v26 }
 0x592   :  { %v4064_v23 = vpop.permute.xlu1 %4063 }
 0x593   :  { %v4066_v22 = vunpack.i.h.bf16 %v4064_v23  ;;  %v4065_v19 = vunpack.i.l.bf16 %v4064_v23 }
 0x594   :  { %v4059_v52 = vpop.permute.xlu0 %4058  ;;  %3519 = vmatmul.msk.bf16.gmra.mxu1 %vm1191_vm13, %v2668_v13 }
 0x595   :  { %v4060_v36 = vunpack.i.l.bf16 %v4059_v52  ;;  %v4061_v31 = vunpack.i.h.bf16 %v4059_v52  ;;  %v2647_v51 = vsel %vm119_vm4, %v2631_v14, %v4065_v19 }
 0x596   :  { %v2663_v57 = vsel %vm2331_vm6, %v2647_v51, %v4070_v28 }
 0x597   :  { %v2347_v42 = vsel %vm2331_vm6, %v5812_v55, %v4060_v36  ;;  %v4045_v55 = vunpack.i.l.bf16 %v4044_v17  ;;  %v2808_v45 = vsel %vm2331_vm6, %v2806_v41, %v4061_v31 }
 0x598   :  { %v2355_v3 = vpack.c.bf16 %v2347_v42, %v5963_v35  ;;  %3497 = vmatmul.msk.bf16.gmra.mxu0 %vm1191_vm13, %v2354_v24  ;;  %3545 = vmatmul.msk.bf16.gmra.mxu2 %vm1191_vm13, %v2815_v15  ;;  %v2669_v35 = vpack.c.bf16 %v2659_v8, %v2658_v44  ;;  %v2630_v15 = vsel %vm165_vm15, %v5556_v16, %v4035_v4  ;;  %v4050_v24 = vunpack.i.l.bf16 %v4049_v33 }
 0x599   :  { %v2646_v47 = vsel %vm119_vm4, %v2630_v15, %v4045_v55  ;;  %v2816_v37 = vpack.c.bf16 %v2808_v45, %v2347_v42  ;;  %v2951_v44 = vsel %vm119_vm4, %v2949_v39, %v4066_v22  ;;  %vm3284_vm4 = vcmask 48128  }
 0x59a   :  { %v2661_v5 = vsel %vm2331_vm6, %v2645_v6, %v4050_v24  ;;  %v2662_v58 = vsel %vm2331_vm6, %v2646_v47, %v4051_v60  ;;  %v2953_v40 = vsel %vm2331_vm6, %v2951_v44, %v4071_v50 }
 0x59b   :  { %v2960_v16 = vpack.c.bf16 %v2662_v58, %v2661_v5  ;;  %v2670_v38 = vpack.c.bf16 %v2661_v5, %v2660_v25  ;;  %v2961_v27 = vpack.c.bf16 %v2953_v40, %v2663_v57  ;;  %v2671_v9 = vpack.c.bf16 %v2663_v57, %v2662_v58 }
 0x59c   :  { %3568 = vmatmul.msk.bf16.gmra.mxu3 %vm1191_vm13, %v2959_v53 }
 0x5a4   :  { %3520 = vmatmul.msk.bf16.gmra.mxu1 %vm1191_vm13, %v2669_v35 }
 0x5a8   :  { %3498 = vmatmul.msk.bf16.gmra.mxu0 %vm1191_vm13, %v2355_v3  ;;  %3546 = vmatmul.msk.bf16.gmra.mxu2 %vm1191_vm13, %v2816_v37 }
 0x5ac   :  { %3569 = vmatmul.msk.bf16.gmra.mxu3 %vm1191_vm13, %v2960_v16 }
 0x5b4   :  { %3521 = vmatmul.msk.bf16.gmra.mxu1 %vm1191_vm13, %v2670_v38 }
 0x5bb   :  { %v2874_v17 = vpop.f32.mrf.mxu2 }
 0x5bc   :  { %3570 = vmatmul.msk.bf16.gmra.mxu3 %vm1191_vm13, %v2961_v27  ;;  %v2875_v43 = vadd.f32 %v6064_v12, %v2874_v17 }
 0x5be   :  { %4081 = vtanh.f32 %v2875_v43 }
 0x5c3   :  { %v2876_v20 = vpop.f32.mrf.mxu2 }
 0x5c4   :  { %v4082_v0 = vpop.eup %4081  ;;  %3522 = vmatmul.msk.bf16.gmra.mxu1 %vm1191_vm13, %v2671_v9  ;;  %v2877_v11 = vadd.f32 %v6064_v12, %v2876_v20 }
 0x5c5   :  { %3155 = vrot.lane.b32.xlu1 %v4082_v0, %s4377_s1 }
 0x5cb   :  { %v2879_v18 = vpop.f32.mrf.mxu2 }
 0x5cc   :  { %v2880_v25 = vadd.f32 %v6064_v12, %v2879_v18 }
 0x5cf   :  { %v3019_v13 = vpop.f32.mrf.mxu3 }
 0x5d0   :  { %v3020_v49 = vadd.f32 %v6064_v12, %v3019_v13 }
 0x5d1   :  { %v2729_v10 = vpop.f32.mrf.mxu1 }
 0x5d2   :  { %4083 = vtanh.f32 %v3020_v49  ;;  %v2730_v1 = vadd.f32 %v6064_v12, %v2729_v10 }
 0x5d3   :  { %v2881_v59 = vpop.f32.mrf.mxu2 }
 0x5d4   :  { %4085 = vtanh.f32 %v2730_v1  ;;  %v2882_v32 = vadd.f32 %v6064_v12, %v2881_v59 }
 0x5d5   :  { %4087 = vtanh.f32 %v2877_v11 }
 0x5d7   :  { %v3021_v48 = vpop.f32.mrf.mxu3 }
 0x5d8   :  { %v4084_v52 = vpop.eup %4083  ;;  %v3022_v36 = vadd.f32 %v6064_v12, %v3021_v48 }
 0x5d9   :  { %3219 = vrot.lane.b32.xlu2 %v4084_v52, %s4378_s8  ;;  %v2731_v61 = vpop.f32.mrf.mxu1 }
 0x5da   :  { %v4086_v2 = vpop.eup %4085  ;;  %v2732_v34 = vadd.f32 %v6064_v12, %v2731_v61  ;;  %4089 = vtanh.f32 %v3022_v36 }
 0x5db   :  { %3091 = vrot.lane.b32.xlu0 %v4086_v2, %s4379_s22  ;;  %v2884_v8 = vpop.f32.mrf.mxu2  ;;  %v4088_v3 = vpop.eup %4087 }
 0x5dc   :  { %4091 = vtanh.f32 %v2732_v34  ;;  %v2885_v24 = vadd.f32 %v6064_v12, %v2884_v8 }
 0x5dd   :  { %4093 = vtanh.f32 %v2880_v25 }
 0x5df   :  { %v3024_v42 = vpop.f32.mrf.mxu3 }
 0x5e0   :  { %v4090_v53 = vpop.eup %4089  ;;  %v3025_v56 = vadd.f32 %v6064_v12, %v3024_v42 }
 0x5e1   :  { %v2734_v54 = vpop.f32.mrf.mxu1  ;;  %3157 = vrot.lane.b32.xlu2 %v4088_v3, %s4377_s1 }
 0x5e2   :  { %v4092_v26 = vpop.eup %4091  ;;  %v2735_v4 = vadd.f32 %v6064_v12, %v2734_v54 }
 0x5e3   :  { %3221 = vrot.lane.b32.xlu0 %v4090_v53, %s4378_s8  ;;  %3093 = vrot.lane.b32.xlu1 %v4092_v26, %s4379_s22  ;;  %v2886_v31 = vpop.f32.mrf.mxu2  ;;  %v4094_v30 = vpop.eup %4093 }
 0x5e4   :  { %4095 = vtanh.f32 %v2735_v4  ;;  %v2887_v16 = vadd.f32 %v6064_v12, %v2886_v31 }
 0x5e5   :  { %4097 = vtanh.f32 %v3025_v56 }
 0x5e7   :  { %v3026_v33 = vpop.f32.mrf.mxu3 }
 0x5e8   :  { %v3027_v55 = vadd.f32 %v6064_v12, %v3026_v33 }
 0x5e9   :  { %v2736_v29 = vpop.f32.mrf.mxu1 }
 0x5ea   :  { %v4096_v35 = vpop.eup %4095  ;;  %v2737_v41 = vadd.f32 %v6064_v12, %v2736_v29  ;;  %4099 = vtanh.f32 %v3027_v55 }
 0x5eb   :  { %v4098_v15 = vpop.eup %4097  ;;  %3159 = vrot.lane.b32.xlu0 %v4094_v30, %s4377_s1  ;;  %3095 = vrot.lane.b32.xlu2 %v4096_v35, %s4379_s22  ;;  %v2889_v60 = vpop.f32.mrf.mxu2 }
 0x5ec   :  { %4101 = vtanh.f32 %v2737_v41  ;;  %3223 = vrot.lane.b32.xlu1 %v4098_v15, %s4378_s8  ;;  %v2890_v50 = vadd.f32 %v6064_v12, %v2889_v60  ;;  %v6127_v41 = vpop.f32.mrf.mxu0 }
 0x5ed   :  { %4103 = vtanh.f32 %v2882_v32 }
 0x5ee   :  { %4105 = vtanh.f32 %v2885_v24 }
 0x5ef   :  { %v3029_v45 = vpop.f32.mrf.mxu3 }
 0x5f0   :  { %v3030_v7 = vadd.f32 %v6064_v12, %v3029_v45  ;;  %v4100_v47 = vpop.eup %4099 }
 0x5f1   :  { %v2739_v6 = vpop.f32.mrf.mxu1 }
 0x5f2   :  { %v4102_v37 = vpop.eup %4101  ;;  %v2740_v5 = vadd.f32 %v6064_v12, %v2739_v6  ;;  %4107 = vtanh.f32 %v3030_v7 }
 0x5f3   :  { %v4104_v58 = vpop.eup %4103  ;;  %3097 = vrot.lane.b32.xlu0 %v4102_v37, %s4379_s22  ;;  %3225 = vrot.lane.b32.xlu2 %v4100_v47, %s4378_s8  ;;  %v2891_v62 = vpop.f32.mrf.mxu2 }
 0x5f4   :  { %4109 = vtanh.f32 %v2740_v5  ;;  %3161 = vrot.lane.b32.xlu1 %v4104_v58, %s4377_s1  ;;  %v4106_v63 = vpop.eup %4105  ;;  %v2892_v43 = vadd.f32 %v6064_v12, %v2891_v62 }
 0x5f5   :  { %4111 = vtanh.f32 %v2887_v16  ;;  %v6138_v16 = vpop.f32.mrf.mxu0 }
 0x5f7   :  { %v3031_v23 = vpop.f32.mrf.mxu3 }
 0x5f8   :  { %v4108_v46 = vpop.eup %4107  ;;  %v3032_v22 = vadd.f32 %v6064_v12, %v3031_v23 }
 0x5f9   :  { %v2741_v19 = vpop.f32.mrf.mxu1 }
 0x5fa   :  { %v4110_v21 = vpop.eup %4109  ;;  %v2742_v38 = vadd.f32 %v6064_v12, %v2741_v19 }
 0x5fb   :  { %3227 = vrot.lane.b32.xlu0 %v4108_v46, %s4378_s8  ;;  %3163 = vrot.lane.b32.xlu2 %v4106_v63, %s4377_s1  ;;  %v2894_v39 = vpop.f32.mrf.mxu2  ;;  %v4112_v51 = vpop.eup %4111 }
 0x5fc   :  { %4113 = vtanh.f32 %v2742_v38  ;;  %3099 = vrot.lane.b32.xlu1 %v4110_v21, %s4379_s22  ;;  %v2895_v59 = vadd.f32 %v6064_v12, %v2894_v39 }
 0x5fd   :  { %4115 = vtanh.f32 %v3032_v22 }
 0x5ff   :  { %v3034_v14 = vpop.f32.mrf.mxu3 }
 0x600   :  { %v3035_v44 = vadd.f32 %v6064_v12, %v3034_v14 }
 0x601   :  { %v2744_v28 = vpop.f32.mrf.mxu1 }
 0x602   :  { %v4114_v57 = vpop.eup %4113  ;;  %v2745_v40 = vadd.f32 %v6064_v12, %v2744_v28  ;;  %4117 = vtanh.f32 %v3035_v44 }
 0x603   :  { %v4116_v27 = vpop.eup %4115  ;;  %3165 = vrot.lane.b32.xlu0 %v4112_v51, %s4377_s1  ;;  %3101 = vrot.lane.b32.xlu2 %v4114_v57, %s4379_s22  ;;  %v2896_v17 = vpop.f32.mrf.mxu2 }
 0x604   :  { %4119 = vtanh.f32 %v2745_v40  ;;  %3229 = vrot.lane.b32.xlu1 %v4116_v27, %s4378_s8  ;;  %v2897_v53 = vadd.f32 %v6064_v12, %v2896_v17  ;;  %v6149_v51 = vpop.f32.mrf.mxu0 }
 0x605   :  { %4121 = vtanh.f32 %v2890_v50 }
 0x606   :  { %4123 = vtanh.f32 %v2892_v43 }
 0x607   :  { %v3036_v9 = vpop.f32.mrf.mxu3 }
 0x608   :  { %v3037_v20 = vadd.f32 %v6064_v12, %v3036_v9  ;;  %v4118_v0 = vpop.eup %4117 }
 0x609   :  { %v2746_v18 = vpop.f32.mrf.mxu1 }
 0x60a   :  { %v4120_v13 = vpop.eup %4119  ;;  %v2747_v49 = vadd.f32 %v6064_v12, %v2746_v18  ;;  %4125 = vtanh.f32 %v3037_v20 }
 0x60b   :  { %v4122_v10 = vpop.eup %4121  ;;  %3103 = vrot.lane.b32.xlu0 %v4120_v13, %s4379_s22  ;;  %3231 = vrot.lane.b32.xlu2 %v4118_v0, %s4378_s8  ;;  %v2899_v1 = vpop.f32.mrf.mxu2 }
 0x60c   :  { %4127 = vtanh.f32 %v2747_v49  ;;  %3167 = vrot.lane.b32.xlu1 %v4122_v10, %s4377_s1  ;;  %v4124_v48 = vpop.eup %4123  ;;  %v2900_v31 = vadd.f32 %v6064_v12, %v2899_v1  ;;  %v2423_v49 = vpop.f32.mrf.mxu0 }
 0x60d   :  { %4129 = vtanh.f32 %v2895_v59 }
 0x60f   :  { %v3039_v11 = vpop.f32.mrf.mxu3 }
 0x610   :  { %v4126_v52 = vpop.eup %4125  ;;  %v3040_v36 = vadd.f32 %v6064_v12, %v3039_v11 }
 0x611   :  { %v2749_v61 = vpop.f32.mrf.mxu1 }
 0x612   :  { %v4128_v2 = vpop.eup %4127  ;;  %v2750_v34 = vadd.f32 %v6064_v12, %v2749_v61 }
 0x613   :  { %3233 = vrot.lane.b32.xlu0 %v4126_v52, %s4378_s8  ;;  %3169 = vrot.lane.b32.xlu2 %v4124_v48, %s4377_s1  ;;  %v2901_v8 = vpop.f32.mrf.mxu2  ;;  %v4130_v3 = vpop.eup %4129  ;;  %v2417_v52 = vadd.f32 %v6064_v12, %v6127_v41  ;;  %v2422_v41 = vadd.f32 %v6064_v12, %v6149_v51 }
 0x614   :  { %4131 = vtanh.f32 %v2750_v34  ;;  %3105 = vrot.lane.b32.xlu1 %v4128_v2, %s4379_s22  ;;  %v2902_v24 = vadd.f32 %v6064_v12, %v2901_v8 }
 0x615   :  { %4133 = vtanh.f32 %v3040_v36 }
 0x617   :  { %v3041_v25 = vpop.f32.mrf.mxu3 }
 0x618   :  { %v3042_v42 = vadd.f32 %v6064_v12, %v3041_v25 }
 0x619   :  { %v2751_v56 = vpop.f32.mrf.mxu1 }
 0x61a   :  { %v4132_v54 = vpop.eup %4131  ;;  %v2752_v26 = vadd.f32 %v6064_v12, %v2751_v56  ;;  %4135 = vtanh.f32 %v3042_v42  ;;  %v2426_v42 = vpop.f32.mrf.mxu0  ;;  %v2419_v56 = vadd.f32 %v6064_v12, %v6138_v16 }
 0x61b   :  { %v4134_v4 = vpop.eup %4133  ;;  %3171 = vrot.lane.b32.xlu0 %v4130_v3, %s4377_s1  ;;  %3107 = vrot.lane.b32.xlu2 %v4132_v54, %s4379_s22  ;;  %v2904_v55 = vpop.f32.mrf.mxu2 }
 0x61c   :  { %4137 = vtanh.f32 %v2752_v26  ;;  %3235 = vrot.lane.b32.xlu1 %v4134_v4, %s4378_s8  ;;  %v2905_v22 = vadd.f32 %v6064_v12, %v2904_v55 }
 0x61d   :  { %4139 = vtanh.f32 %v2897_v53 }
 0x61e   :  { %4141 = vtanh.f32 %v2900_v31 }
 0x61f   :  { %v3044_v33 = vpop.f32.mrf.mxu3 }
 0x620   :  { %v3045_v30 = vadd.f32 %v6064_v12, %v3044_v33  ;;  %v4136_v32 = vpop.eup %4135 }
 0x621   :  { %v2754_v29 = vpop.f32.mrf.mxu1 }
 0x622   :  { %v4138_v35 = vpop.eup %4137  ;;  %v2755_v15 = vadd.f32 %v6064_v12, %v2754_v29  ;;  %4143 = vtanh.f32 %v3045_v30 }
 0x623   :  { %v4140_v60 = vpop.eup %4139  ;;  %3109 = vrot.lane.b32.xlu0 %v4138_v35, %s4379_s22  ;;  %3237 = vrot.lane.b32.xlu2 %v4136_v32, %s4378_s8  ;;  %v2906_v58 = vpop.f32.mrf.mxu2 }
 0x624   :  { %4145 = vtanh.f32 %v2755_v15  ;;  %3173 = vrot.lane.b32.xlu1 %v4140_v60, %s4377_s1  ;;  %v4142_v7 = vpop.eup %4141  ;;  %v2907_v50 = vadd.f32 %v6064_v12, %v2906_v58  ;;  %v2428_v60 = vpop.f32.mrf.mxu0 }
 0x625   :  { %4147 = vtanh.f32 %v2902_v24 }
 0x627   :  { %v3046_v45 = vpop.f32.mrf.mxu3 }
 0x628   :  { %v4144_v47 = vpop.eup %4143  ;;  %v3047_v6 = vadd.f32 %v6064_v12, %v3046_v45 }
 0x629   :  { %v2756_v37 = vpop.f32.mrf.mxu1 }
 0x62a   :  { %v4146_v5 = vpop.eup %4145  ;;  %v2757_v62 = vadd.f32 %v6064_v12, %v2756_v37 }
 0x62b   :  { %3239 = vrot.lane.b32.xlu0 %v4144_v47, %s4378_s8  ;;  %3175 = vrot.lane.b32.xlu2 %v4142_v7, %s4377_s1  ;;  %v4148_v46 = vpop.eup %4147  ;;  %v2909_v44 = vpop.f32.mrf.mxu2 }
 0x62c   :  { %4149 = vtanh.f32 %v2757_v62  ;;  %3111 = vrot.lane.b32.xlu1 %v4146_v5, %s4379_s22  ;;  %v2910_v28 = vadd.f32 %v6064_v12, %v2909_v44  ;;  %v2424_v62 = vadd.f32 %v6064_v12, %v2423_v49 }
 0x62d   :  { %4151 = vtanh.f32 %v3047_v6 }
 0x62f   :  { %v3049_v23 = vpop.f32.mrf.mxu3 }
 0x630   :  { %v3050_v63 = vadd.f32 %v6064_v12, %v3049_v23 }
 0x631   :  { %v2759_v19 = vpop.f32.mrf.mxu1 }
 0x632   :  { %v4150_v21 = vpop.eup %4149  ;;  %v2760_v38 = vadd.f32 %v6064_v12, %v2759_v19  ;;  %4153 = vtanh.f32 %v3050_v63 }
 0x633   :  { %v4152_v39 = vpop.eup %4151  ;;  %v6144_v14 = vpop.permute.xlu2 %3219  ;;  %3177 = vrot.lane.b32.xlu0 %v4148_v46, %s4377_s1  ;;  %3113 = vrot.lane.b32.xlu2 %v4150_v21, %s4379_s22 }
 0x634   :  { %4155 = vtanh.f32 %v2760_v38  ;;  %3241 = vrot.lane.b32.xlu1 %v4152_v39, %s4378_s8  ;;  %v2911_v0 = vpop.f32.mrf.mxu2  ;;  %v2431_v46 = vpop.f32.mrf.mxu0  ;;  %v2427_v39 = vadd.f32 %v6064_v12, %v2426_v42 }
 0x635   :  { %4157 = vtanh.f32 %v2905_v22  ;;  %v2912_v1 = vadd.f32 %v6064_v12, %v2911_v0 }
 0x636   :  { %4159 = vtanh.f32 %v2907_v50 }
 0x637   :  { %v3051_v57 = vpop.f32.mrf.mxu3  ;;  %4161 = vtanh.f32 %v2910_v28  ;;  %v3156_v4 = vpop.permute.xlu1 %3155 }
 0x638   :  { %v4154_v40 = vpop.eup %4153  ;;  %v3052_v30 = vadd.f32 %v6064_v12, %v3051_v57 }
 0x639   :  { %v2761_v27 = vpop.f32.mrf.mxu1 }
 0x63a   :  { %v4156_v17 = vpop.eup %4155  ;;  %v2762_v43 = vadd.f32 %v6064_v12, %v2761_v27  ;;  %v2429_v27 = vadd.f32 %v6064_v12, %v2428_v60 }
 0x63b   :  { %v4158_v9 = vpop.eup %4157  ;;  %3115 = vrot.lane.b32.xlu0 %v4156_v17, %s4379_s22  ;;  %3243 = vrot.lane.b32.xlu2 %v4154_v40, %s4378_s8  ;;  %v3158_v20 = vpop.permute.xlu2 %3157 }
 0x63c   :  { %4163 = vtanh.f32 %v2762_v43  ;;  %3179 = vrot.lane.b32.xlu1 %v4158_v9, %s4377_s1  ;;  %v4160_v13 = vpop.eup %4159  ;;  %v2433_v57 = vpop.f32.mrf.mxu0 }
 0x63d   :  { %v4162_v10 = vpop.eup %4161 }
 0x63f   :  { %v3054_v18 = vpop.f32.mrf.mxu3 }
 0x640   :  { %v3055_v34 = vadd.f32 %v6064_v12, %v3054_v18 }
 0x641   :  { %v2764_v59 = vpop.f32.mrf.mxu1 }
 0x642   :  { %v4164_v11 = vpop.eup %4163  ;;  %v2765_v48 = vadd.f32 %v6064_v12, %v2764_v59 }
 0x643   :  { %3183 = vrot.lane.b32.xlu0 %v4162_v10, %s4377_s1  ;;  %3181 = vrot.lane.b32.xlu2 %v4160_v13, %s4377_s1  ;;  %v2432_v10 = vadd.f32 %v6064_v12, %v2431_v46 }
 0x644   :  { %4165 = vtanh.f32 %v2765_v48  ;;  %3117 = vrot.lane.b32.xlu1 %v4164_v11, %s4379_s22  ;;  %v2436_v49 = vpop.f32.mrf.mxu0 }
 0x645   :  { %4167 = vtanh.f32 %v2912_v1  ;;  %v3096_v36 = vpop.permute.xlu2 %3095 }
 0x646   :  { %4169 = vtanh.f32 %v2417_v52 }
 0x647   :  { %v3056_v61 = vpop.f32.mrf.mxu3 }
 0x648   :  { %v3057_v2 = vadd.f32 %v6064_v12, %v3056_v61 }
 0x649   :  { %v2766_v8 = vpop.f32.mrf.mxu1 }
 0x64a   :  { %v4166_v25 = vpop.eup %4165  ;;  %v2767_v3 = vadd.f32 %v6064_v12, %v2766_v8  ;;  %4171 = vtanh.f32 %v3057_v2  ;;  %v2434_v2 = vadd.f32 %v6064_v12, %v2433_v57 }
 0x64b   :  { %v4168_v53 = vpop.eup %4167  ;;  %3119 = vrot.lane.b32.xlu2 %v4166_v25, %s4379_s22 }
 0x64c   :  { %4173 = vtanh.f32 %v2767_v3  ;;  %3185 = vrot.lane.b32.xlu1 %v4168_v53, %s4377_s1  ;;  %v4170_v54 = vpop.eup %4169 }
 0x64d   :  { %4175 = vtanh.f32 %v3055_v34  ;;  %v3092_v26 = vpop.permute.xlu0 %3091  ;;  %v3226_v55 = vpop.permute.xlu2 %3225 }
 0x64e   :  { %v3268_v31 = vsel %vm3267_vm7, %v4170_v54, %v3092_v26  ;;  %4177 = vtanh.f32 %v2419_v56  ;;  %v2438_v34 = vpop.f32.mrf.mxu0  ;;  %v2437_v26 = vadd.f32 %v6064_v12, %v2436_v49 }
 0x64f   :  { %v3285_v33 = vsel %vm3284_vm4, %v3268_v31, %v3156_v4  ;;  %4179 = vtanh.f32 %v3052_v30 }
 0x650   :  { %v3302_v32 = vsel %vm3301_vm8, %v3285_v33, %v6144_v14  ;;  %v4172_v29 = vpop.eup %4171  ;;  %4181 = vtanh.f32 %v2422_v41 }
 0x651   :  { %3319 = vst.msk [vmem:[%s6313_s9] sm:$0xff] %vm3318_vm9, %v3302_v32  ;;  %4183 = vtanh.f32 %v2424_v62 }
 0x652   :  { %v4174_v35 = vpop.eup %4173  ;;  %4185 = vtanh.f32 %v2427_v39 }
 0x653   :  { %v4176_v15 = vpop.eup %4175  ;;  %3121 = vrot.lane.b32.xlu0 %v4174_v35, %s4379_s22  ;;  %3249 = vrot.lane.b32.xlu2 %v4172_v29, %s4378_s8  ;;  %4187 = vtanh.f32 %v2429_v27  ;;  %v2439_v35 = vadd.f32 %v6064_v12, %v2438_v34 }
 0x654   :  { %3247 = vrot.lane.b32.xlu1 %v4176_v15, %s4378_s8  ;;  %v4178_v45 = vpop.eup %4177  ;;  %4189 = vtanh.f32 %v2432_v10 }
 0x655   :  { %v3222_v24 = vpop.permute.xlu0 %3221  ;;  %v3094_v7 = vpop.permute.xlu1 %3093  ;;  %4191 = vtanh.f32 %v2434_v2 }
 0x656   :  { %v3269_v47 = vsel %vm3267_vm7, %v4178_v45, %v3094_v7  ;;  %v3164_v37 = vpop.permute.xlu2 %3163  ;;  %v4180_v58 = vpop.eup %4179  ;;  %4193 = vtanh.f32 %v2437_v26 }
 0x657   :  { %v3286_v6 = vsel %vm3284_vm4, %v3269_v47, %v3158_v20  ;;  %v4182_v16 = vpop.eup %4181  ;;  %v2441_v33 = vpop.f32.mrf.mxu0  ;;  %4195 = vtanh.f32 %v2439_v35 }
 0x658   :  { %v3303_v5 = vsel %vm3301_vm8, %v3286_v6, %v3222_v24  ;;  %v3270_v23 = vsel %vm3267_vm7, %v4182_v16, %v3096_v36  ;;  %v4184_v14 = vpop.eup %4183 }
 0x659   :  { %3320 = vst.msk [vmem:[%s6313_s9 + $0x8] sm:$0xff] %vm3318_vm9, %v3303_v5  ;;  %v4186_v9 = vpop.eup %4185 }
 0x65a   :  { %v4188_v1 = vpop.eup %4187 }
 0x65b   :  { %3245 = vrot.lane.b32.xlu0 %v4180_v58, %s4378_s8  ;;  %v4190_v8 = vpop.eup %4189 }
 0x65c   :  { %v4192_v31 = vpop.eup %4191 }
 0x65d   :  { %v3160_v63 = vpop.permute.xlu0 %3159  ;;  %v4194_v15 = vpop.eup %4193 }
 0x65e   :  { %v3287_v22 = vsel %vm3284_vm4, %v3270_v23, %v3160_v63  ;;  %v3224_v19 = vpop.permute.xlu1 %3223  ;;  %v3102_v38 = vpop.permute.xlu2 %3101 }
 0x65f   :  { %v3304_v21 = vsel %vm3301_vm8, %v3287_v22, %v3224_v19  ;;  %v3273_v59 = vsel %vm3267_vm7, %v4188_v1, %v3102_v38  ;;  %v2443_v6 = vpop.f32.mrf.mxu0  ;;  %v4196_v5 = vpop.eup %4195 }
 0x660   :  { %3321 = vst.msk [vmem:[%s6313_s9 + $0x10] sm:$0xff] %vm3318_vm9, %v3304_v21  ;;  %v2444_v22 = vadd.f32 %v6064_v12, %v2443_v6 }
 0x665   :  { %v3098_v44 = vpop.permute.xlu0 %3097 }
 0x666   :  { %v3271_v51 = vsel %vm3267_vm7, %v4184_v14, %v3098_v44  ;;  %v3162_v50 = vpop.permute.xlu1 %3161  ;;  %v3232_v17 = vpop.permute.xlu2 %3231 }
 0x667   :  { %v3288_v28 = vsel %vm3284_vm4, %v3271_v51, %v3162_v50  ;;  %v2446_v19 = vpop.f32.mrf.mxu0 }
 0x668   :  { %v3305_v40 = vsel %vm3301_vm8, %v3288_v28, %v3226_v55  ;;  %v2447_v28 = vadd.f32 %v6064_v12, %v2446_v19 }
 0x669   :  { %3322 = vst.msk [vmem:[%s6313_s9 + $0x18] sm:$0xff] %vm3318_vm9, %v3305_v40 }
 0x66d   :  { %v3228_v43 = vpop.permute.xlu0 %3227 }
 0x66e   :  { %v3100_v20 = vpop.permute.xlu1 %3099  ;;  %v3170_v36 = vpop.permute.xlu2 %3169 }
 0x66f   :  { %v3272_v0 = vsel %vm3267_vm7, %v4186_v9, %v3100_v20  ;;  %v2448_v40 = vpop.f32.mrf.mxu0 }
 0x670   :  { %v3289_v18 = vsel %vm3284_vm4, %v3272_v0, %v3164_v37  ;;  %v2442_v37 = vadd.f32 %v6064_v12, %v2441_v33 }
 0x671   :  { %v3306_v13 = vsel %vm3301_vm8, %v3289_v18, %v3228_v43 }
 0x672   :  { %3323 = vst.msk [vmem:[%s6313_s9 + $0x20] sm:$0xff] %vm3318_vm9, %v3306_v13  ;;  %4197 = vtanh.f32 %v2442_v37 }
 0x673   :  { %4199 = vtanh.f32 %v2444_v22 }
 0x674   :  { %4201 = vtanh.f32 %v2447_v28 }
 0x675   :  { %v3166_v11 = vpop.permute.xlu0 %3165 }
 0x676   :  { %v3290_v48 = vsel %vm3284_vm4, %v3273_v59, %v3166_v11  ;;  %v3230_v52 = vpop.permute.xlu1 %3229  ;;  %v3108_v54 = vpop.permute.xlu2 %3107 }
 0x677   :  { %v3307_v61 = vsel %vm3301_vm8, %v3290_v48, %v3230_v52  ;;  %v3276_v60 = vsel %vm3267_vm7, %v4194_v15, %v3108_v54  ;;  %v2451_v49 = vpop.f32.mrf.mxu0 }
 0x678   :  { %3324 = vst.msk [vmem:[%s6313_s9 + $0x28] sm:$0xff] %vm3318_vm9, %v3307_v61  ;;  %v4198_v38 = vpop.eup %4197  ;;  %v2452_v61 = vadd.f32 %v6064_v12, %v2451_v49 }
 0x679   :  { %v4200_v57 = vpop.eup %4199 }
 0x67a   :  { %v4202_v18 = vpop.eup %4201  ;;  %4203 = vtanh.f32 %v2452_v61 }
 0x67d   :  { %v3104_v25 = vpop.permute.xlu0 %3103 }
 0x67e   :  { %v3274_v42 = vsel %vm3267_vm7, %v4190_v8, %v3104_v25  ;;  %v3168_v3 = vpop.permute.xlu1 %3167  ;;  %v3238_v41 = vpop.permute.xlu2 %3237 }
 0x67f   :  { %v3291_v53 = vsel %vm3284_vm4, %v3274_v42, %v3168_v3  ;;  %v2449_v42 = vadd.f32 %v6064_v12, %v2448_v40 }
 0x680   :  { %v3308_v56 = vsel %vm3301_vm8, %v3291_v53, %v3232_v17  ;;  %v4204_v3 = vpop.eup %4203 }
 0x681   :  { %3325 = vst.msk [vmem:[%s6313_s9 + $0x30] sm:$0xff] %vm3318_vm9, %v3308_v56 }
 0x685   :  { %v3234_v4 = vpop.permute.xlu0 %3233 }
 0x686   :  { %v3106_v55 = vpop.permute.xlu1 %3105  ;;  %v3176_v58 = vpop.permute.xlu2 %3175 }
 0x687   :  { %v3275_v30 = vsel %vm3267_vm7, %v4192_v31, %v3106_v55 }
 0x688   :  { %v3292_v32 = vsel %vm3284_vm4, %v3275_v30, %v3170_v36  ;;  %v2453_v36 = vpop.f32.mrf.mxu0 }
 0x689   :  { %v3309_v29 = vsel %vm3301_vm8, %v3292_v32, %v3234_v4  ;;  %v2454_v2 = vadd.f32 %v6064_v12, %v2453_v36 }
 0x68a   :  { %3326 = vst.msk [vmem:[%s6313_s9 + $0x38] sm:$0xff] %vm3318_vm9, %v3309_v29 }
 0x68b   :  { %4205 = vtanh.f32 %v2454_v2 }
 0x68c   :  { %4207 = vtanh.f32 %v2449_v42 }
 0x68d   :  { %v3172_v24 = vpop.permute.xlu0 %3171 }
 0x68e   :  { %v3293_v45 = vsel %vm3284_vm4, %v3276_v60, %v3172_v24  ;;  %v3236_v7 = vpop.permute.xlu1 %3235  ;;  %v3114_v14 = vpop.permute.xlu2 %3113 }
 0x68f   :  { %v3310_v47 = vsel %vm3301_vm8, %v3293_v45, %v3236_v7  ;;  %v3279_v27 = vsel %vm3267_vm7, %v4200_v57, %v3114_v14 }
 0x690   :  { %3327 = vst.msk [vmem:[%s6313_s9 + $0x40] sm:$0xff] %vm3318_vm9, %v3310_v47 }
 0x691   :  { %v4206_v53 = vpop.eup %4205 }
 0x692   :  { %v4208_v12 = vpop.eup %4207 }
 0x695   :  { %v3110_v62 = vpop.permute.xlu0 %3109 }
 0x696   :  { %v3277_v16 = vsel %vm3267_vm7, %v4196_v5, %v3110_v62  ;;  %v3174_v23 = vpop.permute.xlu1 %3173  ;;  %v3244_v0 = vpop.permute.xlu2 %3243 }
 0x697   :  { %v3294_v63 = vsel %vm3284_vm4, %v3277_v16, %v3174_v23 }
 0x698   :  { %v3311_v46 = vsel %vm3301_vm8, %v3294_v63, %v3238_v41 }
 0x699   :  { %3328 = vst.msk [vmem:[%s6313_s9 + $0x48] sm:$0xff] %vm3318_vm9, %v3311_v46 }
 0x69d   :  { %v3240_v21 = vpop.permute.xlu0 %3239 }
 0x69e   :  { %v3112_v39 = vpop.permute.xlu1 %3111  ;;  %v3182_v48 = vpop.permute.xlu2 %3181 }
 0x69f   :  { %v3278_v44 = vsel %vm3267_vm7, %v4198_v38, %v3112_v39 }
 0x6a0   :  { %v3295_v51 = vsel %vm3284_vm4, %v3278_v44, %v3176_v58 }
 0x6a1   :  { %v3312_v50 = vsel %vm3301_vm8, %v3295_v51, %v3240_v21 }
 0x6a2   :  { %3329 = vst.msk [vmem:[%s6313_s9 + $0x50] sm:$0xff] %vm3318_vm9, %v3312_v50 }
 0x6a5   :  { %v3178_v17 = vpop.permute.xlu0 %3177 }
 0x6a6   :  { %v3296_v43 = vsel %vm3284_vm4, %v3279_v27, %v3178_v17  ;;  %v3242_v9 = vpop.permute.xlu1 %3241  ;;  %v3120_v34 = vpop.permute.xlu2 %3119 }
 0x6a7   :  { %v3313_v20 = vsel %vm3301_vm8, %v3296_v43, %v3242_v9  ;;  %v3282_v56 = vsel %vm3267_vm7, %v4204_v3, %v3120_v34 }
 0x6a8   :  { %3330 = vst.msk [vmem:[%s6313_s9 + $0x58] sm:$0xff] %vm3318_vm9, %v3313_v20 }
 0x6ad   :  { %v3116_v13 = vpop.permute.xlu0 %3115 }
 0x6ae   :  { %v3280_v10 = vsel %vm3267_vm7, %v4202_v18, %v3116_v13  ;;  %v3180_v1 = vpop.permute.xlu1 %3179  ;;  %v3250_v33 = vpop.permute.xlu2 %3249 }
 0x6af   :  { %v3297_v59 = vsel %vm3284_vm4, %v3280_v10, %v3180_v1 }
 0x6b0   :  { %v3314_v11 = vsel %vm3301_vm8, %v3297_v59, %v3244_v0 }
 0x6b1   :  { %3331 = vst.msk [vmem:[%s6313_s9 + $0x60] sm:$0xff] %vm3318_vm9, %v3314_v11 }
 0x6b5   :  { %v3184_v8 = vpop.permute.xlu0 %3183 }
 0x6b6   :  { %v3118_v52 = vpop.permute.xlu1 %3117  ;;  %v3299_v26 = vsel %vm3284_vm4, %v3282_v56, %v3184_v8 }
 0x6b7   :  { %v3281_v29 = vsel %vm3267_vm7, %v4208_v12, %v3118_v52 }
 0x6b8   :  { %v3298_v41 = vsel %vm3284_vm4, %v3281_v29, %v3182_v48 }
 0x6be   :  { %v3186_v25 = vpop.permute.xlu1 %3185 }
 0x6c5   :  { %v3122_v54 = vpop.permute.xlu0 %3121 }
 0x6c6   :  { %v3283_v4 = vsel %vm3267_vm7, %v4206_v53, %v3122_v54  ;;  %v3248_v31 = vpop.permute.xlu1 %3247 }
 0x6c7   :  { %v3300_v55 = vsel %vm3284_vm4, %v3283_v4, %v3186_v25  ;;  %v3316_v30 = vsel %vm3301_vm8, %v3299_v26, %v3248_v31 }
 0x6c8   :  { %v3317_v32 = vsel %vm3301_vm8, %v3300_v55, %v3250_v33  ;;  %3333 = vst.msk [vmem:[%s6313_s9 + $0x70] sm:$0xff] %vm3318_vm9, %v3316_v30 }
 0x6c9   :  { %3334 = vst.msk [vmem:[%s6313_s9 + $0x78] sm:$0xff] %vm3318_vm9, %v3317_v32 }
 0x6cd   :  { %v3246_v35 = vpop.permute.xlu0 %3245 }
 0x6ce   :  { %v3315_v15 = vsel %vm3301_vm8, %v3298_v41, %v3246_v35 }
 0x6cf   :  { %3332 = vst.msk [vmem:[%s6313_s9 + $0x68] sm:$0xff] %vm3318_vm9, %v3315_v15 }
 0x6d0   :  { %3339 = vsyncpa [#allocation5], 1 }
 0x6d1   :  { %3340 = vsyncpa [#allocation7], 1 }
 0x6d2   :  { %3341 = vsyncpa [#allocation10], 1 }
 0x6d3   :  { %3342 = vsyncpa [#allocation13], 1 }

</bundles_post_ra>
